<compile_context>
chip_gen: v6e
topology: v6e:2x2x1
jax: 0.10.0
libtpu: 0.0.40
codegen_flags: <defaults>
</compile_context>

<pallas_src>
import functools
import math

import jax
import jax.numpy as jnp
from jax.experimental import pallas as pl
from jax.experimental.pallas import tpu as pltpu

HIDDEN = 128
INPUT = 64
LAYERS = 5
CLASSES = 40
CLASSES_PAD = 128   # lane-dense head output (sliced back to 40 outside the kernel)
B_PAD = 8           # pad batch to a full sublane group


def _sigmoid(x):
    # sigmoid(x) == 0.5 * tanh(0.5 * x) + 0.5 : one EUP op + two VPU ops.
    return 0.5 * jnp.tanh(0.5 * x) + 0.5


# ----------------------------------------------------------------------------
# Fused Pallas kernel: one grid step == one BiLSTM layer (both directions).
# ----------------------------------------------------------------------------
def birnn_kernel(x_ref, wih_ref, whh_ref, b_ref, fcw_ref, fcb_ref, out_ref,
                 act_ref, preg_ref, *, T, Bp):
    H = HIDDEN
    G = 4 * H
    layer = pl.program_id(0)

    # Layer 0: seed the activation scratch with the (zero-padded) input.
    @pl.when(layer == 0)
    def _():
        act_ref[...] = x_ref[...]

    # Fused input projection for BOTH directions: one K<=256, N=1024 bf16 MXU matmul
    # with f32 accumulation.  Bias (b_ih + b_hh, both directions) fused along N.
    lhs = act_ref[...].astype(jnp.bfloat16)                       # (T*Bp, 2H)
    preg_ref[...] = (jnp.dot(lhs, wih_ref[...],
                             preferred_element_type=jnp.float32)
                     + b_ref[...])                                 # (T*Bp, 8H)

    whh_f = whh_ref[0]                                             # (H, 4H) bf16
    whh_b = whh_ref[1]

    def lstm_cell(gates, c_prev):
        # PyTorch gate order: i, f, g, o (128-lane aligned slices); f32 element-wise math.
        i = _sigmoid(gates[:, 0 * H:1 * H])
        f = _sigmoid(gates[:, 1 * H:2 * H])
        g = jnp.tanh(gates[:, 2 * H:3 * H])
        o = _sigmoid(gates[:, 3 * H:4 * H])
        c = f * c_prev + i * g
        h = o * jnp.tanh(c)
        return h, c

    h_f = jnp.zeros((Bp, H), jnp.float32)
    c_f = jnp.zeros((Bp, H), jnp.float32)
    h_b = jnp.zeros((Bp, H), jnp.float32)
    c_b = jnp.zeros((Bp, H), jnp.float32)

    # Both directions over T timesteps, fully unrolled (T small & static).
    # Forward consumes timestep t, backward consumes T-1-t (index reversal, no copies).
    for t in range(T):
        tb = T - 1 - t
        g_f = preg_ref[t * Bp:(t + 1) * Bp, 0:G] + jnp.dot(
            h_f.astype(jnp.bfloat16), whh_f, preferred_element_type=jnp.float32)
        h_f, c_f = lstm_cell(g_f, c_f)
        act_ref[t * Bp:(t + 1) * Bp, 0:H] = h_f
        g_b = preg_ref[tb * Bp:(tb + 1) * Bp, G:2 * G] + jnp.dot(
            h_b.astype(jnp.bfloat16), whh_b, preferred_element_type=jnp.float32)
        h_b, c_b = lstm_cell(g_b, c_b)
        act_ref[tb * Bp:(tb + 1) * Bp, H:2 * H] = h_b

    # Head only on the last layer: (fwd + bwd) hidden at the last timestep -> fc.
    @pl.when(layer == pl.num_programs(0) - 1)
    def _():
        last = (T - 1) * Bp
        h_last = act_ref[last:last + Bp, 0:H] + act_ref[last:last + Bp, H:2 * H]
        out_ref[...] = (jnp.dot(h_last, fcw_ref[...],
                                preferred_element_type=jnp.float32)
                        + fcb_ref[...])                            # (Bp, 128) lane-dense


# ----------------------------------------------------------------------------
# Wrapper
# ----------------------------------------------------------------------------
def birnn_classifier_forward(params, x_btd):
    B, T, D = x_btd.shape
    assert D == INPUT and B <= B_PAD
    Bp = B_PAD
    # time-major, pad batch to 8 sublanes and features to 256 lanes (layer-0 weight rows
    # 64:256 are zero), flatten (T, Bp) rows into a lane-friendly 2-D slab.
    x_tbd = jnp.transpose(x_btd, (1, 0, 2)).astype(jnp.float32)            # (T, B, D)
    x_pad = jnp.pad(x_tbd, ((0, 0), (0, Bp - B), (0, 2 * HIDDEN - D)))     # (T, Bp, 256)
    x_flat = x_pad.reshape(T * Bp, 2 * HIDDEN)

    kernel = functools.partial(birnn_kernel, T=T, Bp=Bp)

    grid_spec = pltpu.PrefetchScalarGridSpec(
        num_scalar_prefetch=0,
        grid=(LAYERS,),
        in_specs=[
            # constant-index blocks are fetched once; per-layer blocks are pipelined
            # (layer l+1 weights DMA'd while layer l's recurrence runs).
            pl.BlockSpec((T * Bp, 2 * HIDDEN), lambda l: (0, 0)),               # x (layer 0)
            pl.BlockSpec((None, 2 * HIDDEN, 8 * HIDDEN), lambda l: (l, 0, 0)),   # W_ih^T fused
            pl.BlockSpec((None, 2, HIDDEN, 4 * HIDDEN), lambda l: (l, 0, 0, 0)), # W_hh^T
            pl.BlockSpec((None, 1, 8 * HIDDEN), lambda l: (l, 0, 0)),            # bias fused
            pl.BlockSpec((HIDDEN, CLASSES_PAD), lambda l: (0, 0)),               # fc weight
            pl.BlockSpec((1, CLASSES_PAD), lambda l: (0, 0)),                    # fc bias
        ],
        out_specs=pl.BlockSpec((Bp, CLASSES_PAD), lambda l: (0, 0)),
        scratch_shapes=[
            pltpu.VMEM((T * Bp, 2 * HIDDEN), jnp.float32),   # act : [h_fwd | h_bwd] lanes
            pltpu.VMEM((T * Bp, 8 * HIDDEN), jnp.float32),   # preg: [fwd 4H | bwd 4H] lanes
        ],
    )

    logits_pad = pl.pallas_call(
        kernel,
        out_shape=jax.ShapeDtypeStruct((Bp, CLASSES_PAD), jnp.float32),
        grid_spec=grid_spec,
        compiler_params=pltpu.CompilerParams(
            dimension_semantics=("arbitrary",)),      # layers are sequential
    )(x_flat, params["wih_all"], params["whh_all"], params["b_all"],
      params["fc_wT_pad"], params["fc_b_pad"])

    return logits_pad[:B, :CLASSES]


# ----------------------------------------------------------------------------
# Deterministic parameter init (PyTorch-style uniform(-1/sqrt(H), 1/sqrt(H)))
# ----------------------------------------------------------------------------
def init_params(key):
    stdv = 1.0 / math.sqrt(HIDDEN)
    raw = []
    for layer in range(LAYERS):
        din = INPUT if layer == 0 else 2 * HIDDEN
        dirs = []
        for _d in range(2):
            key, k1, k2, k3, k4 = jax.random.split(key, 5)
            w_ih = jax.random.uniform(k1, (4 * HIDDEN, din), jnp.float32, -stdv, stdv)
            w_hh = jax.random.uniform(k2, (4 * HIDDEN, HIDDEN), jnp.float32, -stdv, stdv)
            b_ih = jax.random.uniform(k3, (4 * HIDDEN,), jnp.float32, -stdv, stdv)
            b_hh = jax.random.uniform(k4, (4 * HIDDEN,), jnp.float32, -stdv, stdv)
            dirs.append({"wihT": w_ih.T, "whhT": w_hh.T, "b": b_ih + b_hh})
        raw.append(dirs)
    key, k1, k2 = jax.random.split(key, 3)
    fc_w = jax.random.uniform(k1, (CLASSES, HIDDEN), jnp.float32, -stdv, stdv)
    fc_b = jax.random.uniform(k2, (CLASSES,), jnp.float32, -stdv, stdv)

    params = {"raw": raw, "fc_w": fc_w, "fc_b": fc_b}

    # ---- packed / fused layouts for the kernel ----
    wih_list, whh_list, b_list = [], [], []
    for l in range(LAYERS):
        wf, wb = raw[l][0]["wihT"], raw[l][1]["wihT"]            # (din, 512)
        if l == 0:
            wf = jnp.pad(wf, ((0, 2 * HIDDEN - INPUT), (0, 0)))  # zero rows 64:256
            wb = jnp.pad(wb, ((0, 2 * HIDDEN - INPUT), (0, 0)))
        wih_list.append(jnp.concatenate([wf, wb], axis=1))       # (256, 1024)
        whh_list.append(jnp.stack([raw[l][0]["whhT"], raw[l][1]["whhT"]]))   # (2,128,512)
        b_list.append(jnp.concatenate([raw[l][0]["b"], raw[l][1]["b"]]).reshape(1, 8 * HIDDEN))
    params["wih_all"] = jnp.stack(wih_list).astype(jnp.bfloat16)  # (5, 256, 1024) bf16
    params["whh_all"] = jnp.stack(whh_list).astype(jnp.bfloat16)  # (5, 2, 128, 512) bf16
    params["b_all"] = jnp.stack(b_list)                           # (5, 1, 1024) f32
    params["fc_wT_pad"] = jnp.zeros((HIDDEN, CLASSES_PAD),
                                    jnp.float32).at[:, :CLASSES].set(fc_w.T)   # (128,128)
    params["fc_b_pad"] = jnp.zeros((1, CLASSES_PAD),
                                   jnp.float32).at[:, :CLASSES].set(fc_b)      # (1,128)
    return params


# ----------------------------------------------------------------------------
# Pure-JAX reference.  matmul_dtype lets us mirror the kernel's precision choice
# (bf16 matmul operands, f32 accumulation / element-wise) for a tight logic check.
# ----------------------------------------------------------------------------
def _ref_lstm_dir(x_tbd, wihT, whhT, b, md):
    H = whhT.shape[0]
    B = x_tbd.shape[1]
    wih_md = wihT.astype(md)
    whh_md = whhT.astype(md)

    def step(carry, x_t):
        h, c = carry
        gates = (jnp.dot(x_t.astype(md), wih_md, preferred_element_type=jnp.float32)
                 + jnp.dot(h.astype(md), whh_md, preferred_element_type=jnp.float32)
                 + b)
        i = _sigmoid(gates[:, :H])
        f = _sigmoid(gates[:, H:2 * H])
        g = jnp.tanh(gates[:, 2 * H:3 * H])
        o = _sigmoid(gates[:, 3 * H:4 * H])
        c = f * c + i * g
        h = o * jnp.tanh(c)
        return (h, c), h

    init = (jnp.zeros((B, H), jnp.float32), jnp.zeros((B, H), jnp.float32))
    _, hs = jax.lax.scan(step, init, x_tbd)
    return hs


def reference_forward(params, x_btd, matmul_dtype=jnp.float32):
    x = jnp.transpose(x_btd, (1, 0, 2)).astype(jnp.float32)
    for layer in range(LAYERS):
        pf, pb = params["raw"][layer]
        h_f = _ref_lstm_dir(x, pf["wihT"], pf["whhT"], pf["b"], matmul_dtype)
        h_b = _ref_lstm_dir(x[::-1], pb["wihT"], pb["whhT"], pb["b"], matmul_dtype)[::-1]
        x = jnp.concatenate([h_f, h_b], axis=-1)
    h = x[-1, :, :HIDDEN] + x[-1, :, HIDDEN:]
    return h @ params["fc_w"].T + params["fc_b"]


# ----------------------------------------------------------------------------
if __name__ == "__main__":
    key = jax.random.PRNGKey(0)
    pkey, xkey = jax.random.split(key)
    params = init_params(pkey)

    B, T = 2, 8  # small batch / sequence; feature dim fixed at 64 by the module
    x = jax.random.normal(xkey, (B, T, INPUT), jnp.float32)

    forward = jax.jit(birnn_classifier_forward)
    logits = jax.block_until_ready(forward(params, x))
    assert logits.shape == (B, CLASSES), logits.shape

    # Tight check against a reference using the same precision choices (catches logic bugs).
    ref_matched = jax.block_until_ready(reference_forward(params, x, jnp.bfloat16))
    err_matched = float(jnp.max(jnp.abs(logits - ref_matched)))
    assert err_matched < 5e-3, f"mismatch vs matched-precision reference: {err_matched}"

    # Loose sanity check against the full-f32 reference (documents bf16 operand drift).
    ref_f32 = jax.block_until_ready(reference_forward(params, x, jnp.float32))
    err_f32 = float(jnp.max(jnp.abs(logits - ref_f32)))
    assert err_f32 < 1e-1, f"excessive bf16 drift vs f32 reference: {err_f32}"

    print("KERNEL_OK")
</pallas_src>

<mosaic_0001>
module attributes {stable_mosaic.version = 11 : i64} {
  func.func @birnn_kernel(%arg0: i32, %arg1: memref<64x256xf32, #tpu.memory_space<vmem>>, %arg2: memref<1x256x1024xbf16, #tpu.memory_space<vmem>>, %arg3: memref<1x2x128x512xbf16, #tpu.memory_space<vmem>>, %arg4: memref<1x1x1024xf32, #tpu.memory_space<vmem>>, %arg5: memref<128x128xf32, #tpu.memory_space<vmem>>, %arg6: memref<1x128xf32, #tpu.memory_space<vmem>>, %arg7: memref<8x128xf32, #tpu.memory_space<vmem>>, %arg8: memref<64x256xf32, #tpu.memory_space<vmem>>, %arg9: memref<64x1024xf32, #tpu.memory_space<vmem>>) attributes {dimension_semantics = [#tpu.dimension_semantics<arbitrary>], iteration_bounds = array<i64: 5>, scalar_prefetch = 0 : i64, scratch_operands = 2 : i64, tpu.core_type = #tpu.core_type<tc>, window_params = [{pipeline_mode = #tpu.pipeline_mode<synchronous>, transform_indices = @transform_0, window_bounds = array<i64: 64, 256>}, {transform_indices = @transform_1, window_bounds = array<i64: 1, 256, 1024>}, {transform_indices = @transform_2, window_bounds = array<i64: 1, 2, 128, 512>}, {transform_indices = @transform_3, window_bounds = array<i64: 1, 1, 1024>}, {pipeline_mode = #tpu.pipeline_mode<synchronous>, transform_indices = @transform_4, window_bounds = array<i64: 128, 128>}, {pipeline_mode = #tpu.pipeline_mode<synchronous>, transform_indices = @transform_5, window_bounds = array<i64: 1, 128>}, {pipeline_mode = #tpu.pipeline_mode<synchronous>, transform_indices = @transform_6, window_bounds = array<i64: 8, 128>}]} {
    %c0_i32 = arith.constant 0 : i32
    %0 = arith.cmpi eq, %arg0, %c0_i32 : i32
    %1 = arith.extui %0 : i1 to i32
    %c0_i32_0 = arith.constant 0 : i32
    %2 = arith.cmpi ne, %1, %c0_i32_0 : i32
    scf.if %2 {
      %c0_237 = arith.constant 0 : index
      %c0_238 = arith.constant 0 : index
      %600 = vector.load %arg1[%c0_237, %c0_238] : memref<64x256xf32, #tpu.memory_space<vmem>>, vector<64x256xf32>
      %c0_239 = arith.constant 0 : index
      %c0_240 = arith.constant 0 : index
      %601 = vector.load %arg8[%c0_239, %c0_240] : memref<64x256xf32, #tpu.memory_space<vmem>>, vector<64x256xf32>
      tpu.vector_store %arg8[%c0_239, %c0_240], %600 {strides = array<i32>} : memref<64x256xf32, #tpu.memory_space<vmem>>, vector<64x256xf32>,
    } else {
    }
    %c0 = arith.constant 0 : index
    %c0_1 = arith.constant 0 : index
    %3 = vector.load %arg8[%c0, %c0_1] : memref<64x256xf32, #tpu.memory_space<vmem>>, vector<64x256xf32>
    %4 = arith.truncf %3 : vector<64x256xf32> to vector<64x256xbf16>
    %c0_2 = arith.constant 0 : index
    %c0_3 = arith.constant 0 : index
    %c0_4 = arith.constant 0 : index
    %5 = vector.load %arg2[%c0_2, %c0_3, %c0_4] : memref<1x256x1024xbf16, #tpu.memory_space<vmem>>, vector<1x256x1024xbf16>
    %6 = vector.shape_cast %5 : vector<1x256x1024xbf16> to vector<256x1024xbf16>
    %cst = arith.constant dense<0.000000e+00> : vector<64x1024xf32>
    %7 = tpu.matmul %4, %6, %cst {dimension_numbers = #tpu.dot_dimension_numbers<[1], [0], [0], [1], [0, 0, 1, 1], [], []>} : vector<64x256xbf16>, vector<256x1024xbf16>, vector<64x1024xf32> -> vector<64x1024xf32>
    %c0_5 = arith.constant 0 : index
    %c0_6 = arith.constant 0 : index
    %c0_7 = arith.constant 0 : index
    %8 = vector.load %arg4[%c0_5, %c0_6, %c0_7] : memref<1x1x1024xf32, #tpu.memory_space<vmem>>, vector<1x1x1024xf32>
    %9 = vector.shape_cast %8 : vector<1x1x1024xf32> to vector<1x1024xf32>
    %10 = vector.broadcast %9 : vector<1x1024xf32> to vector<64x1024xf32>
    %11 = arith.addf %7, %10 : vector<64x1024xf32>
    %c0_8 = arith.constant 0 : index
    %c0_9 = arith.constant 0 : index
    %12 = vector.load %arg9[%c0_8, %c0_9] : memref<64x1024xf32, #tpu.memory_space<vmem>>, vector<64x1024xf32>
    tpu.vector_store %arg9[%c0_8, %c0_9], %11 {strides = array<i32>} : memref<64x1024xf32, #tpu.memory_space<vmem>>, vector<64x1024xf32>,
    %c0_10 = arith.constant 0 : index
    %c0_11 = arith.constant 0 : index
    %c0_12 = arith.constant 0 : index
    %c0_13 = arith.constant 0 : index
    %13 = vector.load %arg3[%c0_10, %c0_11, %c0_12, %c0_13] : memref<1x2x128x512xbf16, #tpu.memory_space<vmem>>, vector<1x1x128x512xbf16>
    %14 = vector.shape_cast %13 : vector<1x1x128x512xbf16> to vector<128x512xbf16>
    %c0_14 = arith.constant 0 : index
    %c1 = arith.constant 1 : index
    %c0_15 = arith.constant 0 : index
    %c0_16 = arith.constant 0 : index
    %15 = vector.load %arg3[%c0_14, %c1, %c0_15, %c0_16] : memref<1x2x128x512xbf16, #tpu.memory_space<vmem>>, vector<1x1x128x512xbf16>
    %16 = vector.shape_cast %15 : vector<1x1x128x512xbf16> to vector<128x512xbf16>
    %cst_17 = arith.constant 0.000000e+00 : f32
    %17 = vector.broadcast %cst_17 : f32 to vector<8x128xf32>
    %cst_18 = arith.constant 0.000000e+00 : f32
    %18 = vector.broadcast %cst_18 : f32 to vector<8x128xf32>
    %cst_19 = arith.constant 0.000000e+00 : f32
    %19 = vector.broadcast %cst_19 : f32 to vector<8x128xf32>
    %cst_20 = arith.constant 0.000000e+00 : f32
    %20 = vector.broadcast %cst_20 : f32 to vector<8x128xf32>
    %c0_21 = arith.constant 0 : index
    %c0_22 = arith.constant 0 : index
    %21 = vector.load %arg9[%c0_21, %c0_22] : memref<64x1024xf32, #tpu.memory_space<vmem>>, vector<8x512xf32>
    %22 = arith.truncf %17 : vector<8x128xf32> to vector<8x128xbf16>
    %cst_23 = arith.constant dense<0.000000e+00> : vector<8x512xf32>
    %23 = tpu.matmul %22, %14, %cst_23 {dimension_numbers = #tpu.dot_dimension_numbers<[1], [0], [0], [1], [0, 0, 1, 1], [], []>} : vector<8x128xbf16>, vector<128x512xbf16>, vector<8x512xf32> -> vector<8x512xf32>
    %24 = arith.addf %21, %23 : vector<8x512xf32>
    %25 = vector.extract_strided_slice %24 {offsets = [0, 0], sizes = [8, 128], strides = [1, 1]} : vector<8x512xf32> to vector<8x128xf32>
    %cst_24 = arith.constant 5.000000e-01 : f32
    %26 = vector.broadcast %cst_24 : f32 to vector<8x128xf32>
    %27 = arith.mulf %26, %25 : vector<8x128xf32>
    %28 = math.tanh %27 : vector<8x128xf32>
    %cst_25 = arith.constant 5.000000e-01 : f32
    %29 = vector.broadcast %cst_25 : f32 to vector<8x128xf32>
    %30 = arith.mulf %29, %28 : vector<8x128xf32>
    %cst_26 = arith.constant 5.000000e-01 : f32
    %31 = vector.broadcast %cst_26 : f32 to vector<8x128xf32>
    %32 = arith.addf %30, %31 : vector<8x128xf32>
    %33 = vector.extract_strided_slice %24 {offsets = [0, 128], sizes = [8, 128], strides = [1, 1]} : vector<8x512xf32> to vector<8x128xf32>
    %cst_27 = arith.constant 5.000000e-01 : f32
    %34 = vector.broadcast %cst_27 : f32 to vector<8x128xf32>
    %35 = arith.mulf %34, %33 : vector<8x128xf32>
    %36 = math.tanh %35 : vector<8x128xf32>
    %cst_28 = arith.constant 5.000000e-01 : f32
    %37 = vector.broadcast %cst_28 : f32 to vector<8x128xf32>
    %38 = arith.mulf %37, %36 : vector<8x128xf32>
    %cst_29 = arith.constant 5.000000e-01 : f32
    %39 = vector.broadcast %cst_29 : f32 to vector<8x128xf32>
    %40 = arith.addf %38, %39 : vector<8x128xf32>
    %41 = vector.extract_strided_slice %24 {offsets = [0, 256], sizes = [8, 128], strides = [1, 1]} : vector<8x512xf32> to vector<8x128xf32>
    %42 = math.tanh %41 : vector<8x128xf32>
    %43 = vector.extract_strided_slice %24 {offsets = [0, 384], sizes = [8, 128], strides = [1, 1]} : vector<8x512xf32> to vector<8x128xf32>
    %cst_30 = arith.constant 5.000000e-01 : f32
    %44 = vector.broadcast %cst_30 : f32 to vector<8x128xf32>
    %45 = arith.mulf %44, %43 : vector<8x128xf32>
    %46 = math.tanh %45 : vector<8x128xf32>
    %cst_31 = arith.constant 5.000000e-01 : f32
    %47 = vector.broadcast %cst_31 : f32 to vector<8x128xf32>
    %48 = arith.mulf %47, %46 : vector<8x128xf32>
    %cst_32 = arith.constant 5.000000e-01 : f32
    %49 = vector.broadcast %cst_32 : f32 to vector<8x128xf32>
    %50 = arith.addf %48, %49 : vector<8x128xf32>
    %51 = arith.mulf %40, %18 : vector<8x128xf32>
    %52 = arith.mulf %32, %42 : vector<8x128xf32>
    %53 = arith.addf %51, %52 : vector<8x128xf32>
    %54 = math.tanh %53 : vector<8x128xf32>
    %55 = arith.mulf %50, %54 : vector<8x128xf32>
    %c0_33 = arith.constant 0 : index
    %c0_34 = arith.constant 0 : index
    %56 = vector.load %arg8[%c0_33, %c0_34] : memref<64x256xf32, #tpu.memory_space<vmem>>, vector<8x128xf32>
    tpu.vector_store %arg8[%c0_33, %c0_34], %55 {strides = array<i32>} : memref<64x256xf32, #tpu.memory_space<vmem>>, vector<8x128xf32>,
    %c56 = arith.constant 56 : index
    %c512 = arith.constant 512 : index
    %57 = vector.load %arg9[%c56, %c512] : memref<64x1024xf32, #tpu.memory_space<vmem>>, vector<8x512xf32>
    %58 = arith.truncf %19 : vector<8x128xf32> to vector<8x128xbf16>
    %cst_35 = arith.constant dense<0.000000e+00> : vector<8x512xf32>
    %59 = tpu.matmul %58, %16, %cst_35 {dimension_numbers = #tpu.dot_dimension_numbers<[1], [0], [0], [1], [0, 0, 1, 1], [], []>} : vector<8x128xbf16>, vector<128x512xbf16>, vector<8x512xf32> -> vector<8x512xf32>
    %60 = arith.addf %57, %59 : vector<8x512xf32>
    %61 = vector.extract_strided_slice %60 {offsets = [0, 0], sizes = [8, 128], strides = [1, 1]} : vector<8x512xf32> to vector<8x128xf32>
    %cst_36 = arith.constant 5.000000e-01 : f32
    %62 = vector.broadcast %cst_36 : f32 to vector<8x128xf32>
    %63 = arith.mulf %62, %61 : vector<8x128xf32>
    %64 = math.tanh %63 : vector<8x128xf32>
    %cst_37 = arith.constant 5.000000e-01 : f32
    %65 = vector.broadcast %cst_37 : f32 to vector<8x128xf32>
    %66 = arith.mulf %65, %64 : vector<8x128xf32>
    %cst_38 = arith.constant 5.000000e-01 : f32
    %67 = vector.broadcast %cst_38 : f32 to vector<8x128xf32>
    %68 = arith.addf %66, %67 : vector<8x128xf32>
    %69 = vector.extract_strided_slice %60 {offsets = [0, 128], sizes = [8, 128], strides = [1, 1]} : vector<8x512xf32> to vector<8x128xf32>
    %cst_39 = arith.constant 5.000000e-01 : f32
    %70 = vector.broadcast %cst_39 : f32 to vector<8x128xf32>
    %71 = arith.mulf %70, %69 : vector<8x128xf32>
    %72 = math.tanh %71 : vector<8x128xf32>
    %cst_40 = arith.constant 5.000000e-01 : f32
    %73 = vector.broadcast %cst_40 : f32 to vector<8x128xf32>
    %74 = arith.mulf %73, %72 : vector<8x128xf32>
    %cst_41 = arith.constant 5.000000e-01 : f32
    %75 = vector.broadcast %cst_41 : f32 to vector<8x128xf32>
    %76 = arith.addf %74, %75 : vector<8x128xf32>
    %77 = vector.extract_strided_slice %60 {offsets = [0, 256], sizes = [8, 128], strides = [1, 1]} : vector<8x512xf32> to vector<8x128xf32>
    %78 = math.tanh %77 : vector<8x128xf32>
    %79 = vector.extract_strided_slice %60 {offsets = [0, 384], sizes = [8, 128], strides = [1, 1]} : vector<8x512xf32> to vector<8x128xf32>
    %cst_42 = arith.constant 5.000000e-01 : f32
    %80 = vector.broadcast %cst_42 : f32 to vector<8x128xf32>
    %81 = arith.mulf %80, %79 : vector<8x128xf32>
    %82 = math.tanh %81 : vector<8x128xf32>
    %cst_43 = arith.constant 5.000000e-01 : f32
    %83 = vector.broadcast %cst_43 : f32 to vector<8x128xf32>
    %84 = arith.mulf %83, %82 : vector<8x128xf32>
    %cst_44 = arith.constant 5.000000e-01 : f32
    %85 = vector.broadcast %cst_44 : f32 to vector<8x128xf32>
    %86 = arith.addf %84, %85 : vector<8x128xf32>
    %87 = arith.mulf %76, %20 : vector<8x128xf32>
    %88 = arith.mulf %68, %78 : vector<8x128xf32>
    %89 = arith.addf %87, %88 : vector<8x128xf32>
    %90 = math.tanh %89 : vector<8x128xf32>
    %91 = arith.mulf %86, %90 : vector<8x128xf32>
    %c56_45 = arith.constant 56 : index
    %c128 = arith.constant 128 : index
    %92 = vector.load %arg8[%c56_45, %c128] : memref<64x256xf32, #tpu.memory_space<vmem>>, vector<8x128xf32>
    tpu.vector_store %arg8[%c56_45, %c128], %91 {strides = array<i32>} : memref<64x256xf32, #tpu.memory_space<vmem>>, vector<8x128xf32>,
    %c8 = arith.constant 8 : index
    %c0_46 = arith.constant 0 : index
    %93 = vector.load %arg9[%c8, %c0_46] : memref<64x1024xf32, #tpu.memory_space<vmem>>, vector<8x512xf32>
    %94 = arith.truncf %55 : vector<8x128xf32> to vector<8x128xbf16>
    %cst_47 = arith.constant dense<0.000000e+00> : vector<8x512xf32>
    %95 = tpu.matmul %94, %14, %cst_47 {dimension_numbers = #tpu.dot_dimension_numbers<[1], [0], [0], [1], [0, 0, 1, 1], [], []>} : vector<8x128xbf16>, vector<128x512xbf16>, vector<8x512xf32> -> vector<8x512xf32>
    %96 = arith.addf %93, %95 : vector<8x512xf32>
    %97 = vector.extract_strided_slice %96 {offsets = [0, 0], sizes = [8, 128], strides = [1, 1]} : vector<8x512xf32> to vector<8x128xf32>
    %cst_48 = arith.constant 5.000000e-01 : f32
    %98 = vector.broadcast %cst_48 : f32 to vector<8x128xf32>
    %99 = arith.mulf %98, %97 : vector<8x128xf32>
    %100 = math.tanh %99 : vector<8x128xf32>
    %cst_49 = arith.constant 5.000000e-01 : f32
    %101 = vector.broadcast %cst_49 : f32 to vector<8x128xf32>
    %102 = arith.mulf %101, %100 : vector<8x128xf32>
    %cst_50 = arith.constant 5.000000e-01 : f32
    %103 = vector.broadcast %cst_50 : f32 to vector<8x128xf32>
    %104 = arith.addf %102, %103 : vector<8x128xf32>
    %105 = vector.extract_strided_slice %96 {offsets = [0, 128], sizes = [8, 128], strides = [1, 1]} : vector<8x512xf32> to vector<8x128xf32>
    %cst_51 = arith.constant 5.000000e-01 : f32
    %106 = vector.broadcast %cst_51 : f32 to vector<8x128xf32>
    %107 = arith.mulf %106, %105 : vector<8x128xf32>
    %108 = math.tanh %107 : vector<8x128xf32>
    %cst_52 = arith.constant 5.000000e-01 : f32
    %109 = vector.broadcast %cst_52 : f32 to vector<8x128xf32>
    %110 = arith.mulf %109, %108 : vector<8x128xf32>
    %cst_53 = arith.constant 5.000000e-01 : f32
    %111 = vector.broadcast %cst_53 : f32 to vector<8x128xf32>
    %112 = arith.addf %110, %111 : vector<8x128xf32>
    %113 = vector.extract_strided_slice %96 {offsets = [0, 256], sizes = [8, 128], strides = [1, 1]} : vector<8x512xf32> to vector<8x128xf32>
    %114 = math.tanh %113 : vector<8x128xf32>
    %115 = vector.extract_strided_slice %96 {offsets = [0, 384], sizes = [8, 128], strides = [1, 1]} : vector<8x512xf32> to vector<8x128xf32>
    %cst_54 = arith.constant 5.000000e-01 : f32
    %116 = vector.broadcast %cst_54 : f32 to vector<8x128xf32>
    %117 = arith.mulf %116, %115 : vector<8x128xf32>
    %118 = math.tanh %117 : vector<8x128xf32>
    %cst_55 = arith.constant 5.000000e-01 : f32
    %119 = vector.broadcast %cst_55 : f32 to vector<8x128xf32>
    %120 = arith.mulf %119, %118 : vector<8x128xf32>
    %cst_56 = arith.constant 5.000000e-01 : f32
    %121 = vector.broadcast %cst_56 : f32 to vector<8x128xf32>
    %122 = arith.addf %120, %121 : vector<8x128xf32>
    %123 = arith.mulf %112, %53 : vector<8x128xf32>
    %124 = arith.mulf %104, %114 : vector<8x128xf32>
    %125 = arith.addf %123, %124 : vector<8x128xf32>
    %126 = math.tanh %125 : vector<8x128xf32>
    %127 = arith.mulf %122, %126 : vector<8x128xf32>
    %c8_57 = arith.constant 8 : index
    %c0_58 = arith.constant 0 : index
    %128 = vector.load %arg8[%c8_57, %c0_58] : memref<64x256xf32, #tpu.memory_space<vmem>>, vector<8x128xf32>
    tpu.vector_store %arg8[%c8_57, %c0_58], %127 {strides = array<i32>} : memref<64x256xf32, #tpu.memory_space<vmem>>, vector<8x128xf32>,
    %c48 = arith.constant 48 : index
    %c512_59 = arith.constant 512 : index
    %129 = vector.load %arg9[%c48, %c512_59] : memref<64x1024xf32, #tpu.memory_space<vmem>>, vector<8x512xf32>
    %130 = arith.truncf %91 : vector<8x128xf32> to vector<8x128xbf16>
    %cst_60 = arith.constant dense<0.000000e+00> : vector<8x512xf32>
    %131 = tpu.matmul %130, %16, %cst_60 {dimension_numbers = #tpu.dot_dimension_numbers<[1], [0], [0], [1], [0, 0, 1, 1], [], []>} : vector<8x128xbf16>, vector<128x512xbf16>, vector<8x512xf32> -> vector<8x512xf32>
    %132 = arith.addf %129, %131 : vector<8x512xf32>
    %133 = vector.extract_strided_slice %132 {offsets = [0, 0], sizes = [8, 128], strides = [1, 1]} : vector<8x512xf32> to vector<8x128xf32>
    %cst_61 = arith.constant 5.000000e-01 : f32
    %134 = vector.broadcast %cst_61 : f32 to vector<8x128xf32>
    %135 = arith.mulf %134, %133 : vector<8x128xf32>
    %136 = math.tanh %135 : vector<8x128xf32>
    %cst_62 = arith.constant 5.000000e-01 : f32
    %137 = vector.broadcast %cst_62 : f32 to vector<8x128xf32>
    %138 = arith.mulf %137, %136 : vector<8x128xf32>
    %cst_63 = arith.constant 5.000000e-01 : f32
    %139 = vector.broadcast %cst_63 : f32 to vector<8x128xf32>
    %140 = arith.addf %138, %139 : vector<8x128xf32>
    %141 = vector.extract_strided_slice %132 {offsets = [0, 128], sizes = [8, 128], strides = [1, 1]} : vector<8x512xf32> to vector<8x128xf32>
    %cst_64 = arith.constant 5.000000e-01 : f32
    %142 = vector.broadcast %cst_64 : f32 to vector<8x128xf32>
    %143 = arith.mulf %142, %141 : vector<8x128xf32>
    %144 = math.tanh %143 : vector<8x128xf32>
    %cst_65 = arith.constant 5.000000e-01 : f32
    %145 = vector.broadcast %cst_65 : f32 to vector<8x128xf32>
    %146 = arith.mulf %145, %144 : vector<8x128xf32>
    %cst_66 = arith.constant 5.000000e-01 : f32
    %147 = vector.broadcast %cst_66 : f32 to vector<8x128xf32>
    %148 = arith.addf %146, %147 : vector<8x128xf32>
    %149 = vector.extract_strided_slice %132 {offsets = [0, 256], sizes = [8, 128], strides = [1, 1]} : vector<8x512xf32> to vector<8x128xf32>
    %150 = math.tanh %149 : vector<8x128xf32>
    %151 = vector.extract_strided_slice %132 {offsets = [0, 384], sizes = [8, 128], strides = [1, 1]} : vector<8x512xf32> to vector<8x128xf32>
    %cst_67 = arith.constant 5.000000e-01 : f32
    %152 = vector.broadcast %cst_67 : f32 to vector<8x128xf32>
    %153 = arith.mulf %152, %151 : vector<8x128xf32>
    %154 = math.tanh %153 : vector<8x128xf32>
    %cst_68 = arith.constant 5.000000e-01 : f32
    %155 = vector.broadcast %cst_68 : f32 to vector<8x128xf32>
    %156 = arith.mulf %155, %154 : vector<8x128xf32>
    %cst_69 = arith.constant 5.000000e-01 : f32
    %157 = vector.broadcast %cst_69 : f32 to vector<8x128xf32>
    %158 = arith.addf %156, %157 : vector<8x128xf32>
    %159 = arith.mulf %148, %89 : vector<8x128xf32>
    %160 = arith.mulf %140, %150 : vector<8x128xf32>
    %161 = arith.addf %159, %160 : vector<8x128xf32>
    %162 = math.tanh %161 : vector<8x128xf32>
    %163 = arith.mulf %158, %162 : vector<8x128xf32>
    %c48_70 = arith.constant 48 : index
    %c128_71 = arith.constant 128 : index
    %164 = vector.load %arg8[%c48_70, %c128_71] : memref<64x256xf32, #tpu.memory_space<vmem>>, vector<8x128xf32>
    tpu.vector_store %arg8[%c48_70, %c128_71], %163 {strides = array<i32>} : memref<64x256xf32, #tpu.memory_space<vmem>>, vector<8x128xf32>,
    %c16 = arith.constant 16 : index
    %c0_72 = arith.constant 0 : index
    %165 = vector.load %arg9[%c16, %c0_72] : memref<64x1024xf32, #tpu.memory_space<vmem>>, vector<8x512xf32>
    %166 = arith.truncf %127 : vector<8x128xf32> to vector<8x128xbf16>
    %cst_73 = arith.constant dense<0.000000e+00> : vector<8x512xf32>
    %167 = tpu.matmul %166, %14, %cst_73 {dimension_numbers = #tpu.dot_dimension_numbers<[1], [0], [0], [1], [0, 0, 1, 1], [], []>} : vector<8x128xbf16>, vector<128x512xbf16>, vector<8x512xf32> -> vector<8x512xf32>
    %168 = arith.addf %165, %167 : vector<8x512xf32>
    %169 = vector.extract_strided_slice %168 {offsets = [0, 0], sizes = [8, 128], strides = [1, 1]} : vector<8x512xf32> to vector<8x128xf32>
    %cst_74 = arith.constant 5.000000e-01 : f32
    %170 = vector.broadcast %cst_74 : f32 to vector<8x128xf32>
    %171 = arith.mulf %170, %169 : vector<8x128xf32>
    %172 = math.tanh %171 : vector<8x128xf32>
    %cst_75 = arith.constant 5.000000e-01 : f32
    %173 = vector.broadcast %cst_75 : f32 to vector<8x128xf32>
    %174 = arith.mulf %173, %172 : vector<8x128xf32>
    %cst_76 = arith.constant 5.000000e-01 : f32
    %175 = vector.broadcast %cst_76 : f32 to vector<8x128xf32>
    %176 = arith.addf %174, %175 : vector<8x128xf32>
    %177 = vector.extract_strided_slice %168 {offsets = [0, 128], sizes = [8, 128], strides = [1, 1]} : vector<8x512xf32> to vector<8x128xf32>
    %cst_77 = arith.constant 5.000000e-01 : f32
    %178 = vector.broadcast %cst_77 : f32 to vector<8x128xf32>
    %179 = arith.mulf %178, %177 : vector<8x128xf32>
    %180 = math.tanh %179 : vector<8x128xf32>
    %cst_78 = arith.constant 5.000000e-01 : f32
    %181 = vector.broadcast %cst_78 : f32 to vector<8x128xf32>
    %182 = arith.mulf %181, %180 : vector<8x128xf32>
    %cst_79 = arith.constant 5.000000e-01 : f32
    %183 = vector.broadcast %cst_79 : f32 to vector<8x128xf32>
    %184 = arith.addf %182, %183 : vector<8x128xf32>
    %185 = vector.extract_strided_slice %168 {offsets = [0, 256], sizes = [8, 128], strides = [1, 1]} : vector<8x512xf32> to vector<8x128xf32>
    %186 = math.tanh %185 : vector<8x128xf32>
    %187 = vector.extract_strided_slice %168 {offsets = [0, 384], sizes = [8, 128], strides = [1, 1]} : vector<8x512xf32> to vector<8x128xf32>
    %cst_80 = arith.constant 5.000000e-01 : f32
    %188 = vector.broadcast %cst_80 : f32 to vector<8x128xf32>
    %189 = arith.mulf %188, %187 : vector<8x128xf32>
    %190 = math.tanh %189 : vector<8x128xf32>
    %cst_81 = arith.constant 5.000000e-01 : f32
    %191 = vector.broadcast %cst_81 : f32 to vector<8x128xf32>
    %192 = arith.mulf %191, %190 : vector<8x128xf32>
    %cst_82 = arith.constant 5.000000e-01 : f32
    %193 = vector.broadcast %cst_82 : f32 to vector<8x128xf32>
    %194 = arith.addf %192, %193 : vector<8x128xf32>
    %195 = arith.mulf %184, %125 : vector<8x128xf32>
    %196 = arith.mulf %176, %186 : vector<8x128xf32>
    %197 = arith.addf %195, %196 : vector<8x128xf32>
    %198 = math.tanh %197 : vector<8x128xf32>
    %199 = arith.mulf %194, %198 : vector<8x128xf32>
    %c16_83 = arith.constant 16 : index
    %c0_84 = arith.constant 0 : index
    %200 = vector.load %arg8[%c16_83, %c0_84] : memref<64x256xf32, #tpu.memory_space<vmem>>, vector<8x128xf32>
    tpu.vector_store %arg8[%c16_83, %c0_84], %199 {strides = array<i32>} : memref<64x256xf32, #tpu.memory_space<vmem>>, vector<8x128xf32>,
    %c40 = arith.constant 40 : index
    %c512_85 = arith.constant 512 : index
    %201 = vector.load %arg9[%c40, %c512_85] : memref<64x1024xf32, #tpu.memory_space<vmem>>, vector<8x512xf32>
    %202 = arith.truncf %163 : vector<8x128xf32> to vector<8x128xbf16>
    %cst_86 = arith.constant dense<0.000000e+00> : vector<8x512xf32>
    %203 = tpu.matmul %202, %16, %cst_86 {dimension_numbers = #tpu.dot_dimension_numbers<[1], [0], [0], [1], [0, 0, 1, 1], [], []>} : vector<8x128xbf16>, vector<128x512xbf16>, vector<8x512xf32> -> vector<8x512xf32>
    %204 = arith.addf %201, %203 : vector<8x512xf32>
    %205 = vector.extract_strided_slice %204 {offsets = [0, 0], sizes = [8, 128], strides = [1, 1]} : vector<8x512xf32> to vector<8x128xf32>
    %cst_87 = arith.constant 5.000000e-01 : f32
    %206 = vector.broadcast %cst_87 : f32 to vector<8x128xf32>
    %207 = arith.mulf %206, %205 : vector<8x128xf32>
    %208 = math.tanh %207 : vector<8x128xf32>
    %cst_88 = arith.constant 5.000000e-01 : f32
    %209 = vector.broadcast %cst_88 : f32 to vector<8x128xf32>
    %210 = arith.mulf %209, %208 : vector<8x128xf32>
    %cst_89 = arith.constant 5.000000e-01 : f32
    %211 = vector.broadcast %cst_89 : f32 to vector<8x128xf32>
    %212 = arith.addf %210, %211 : vector<8x128xf32>
    %213 = vector.extract_strided_slice %204 {offsets = [0, 128], sizes = [8, 128], strides = [1, 1]} : vector<8x512xf32> to vector<8x128xf32>
    %cst_90 = arith.constant 5.000000e-01 : f32
    %214 = vector.broadcast %cst_90 : f32 to vector<8x128xf32>
    %215 = arith.mulf %214, %213 : vector<8x128xf32>
    %216 = math.tanh %215 : vector<8x128xf32>
    %cst_91 = arith.constant 5.000000e-01 : f32
    %217 = vector.broadcast %cst_91 : f32 to vector<8x128xf32>
    %218 = arith.mulf %217, %216 : vector<8x128xf32>
    %cst_92 = arith.constant 5.000000e-01 : f32
    %219 = vector.broadcast %cst_92 : f32 to vector<8x128xf32>
    %220 = arith.addf %218, %219 : vector<8x128xf32>
    %221 = vector.extract_strided_slice %204 {offsets = [0, 256], sizes = [8, 128], strides = [1, 1]} : vector<8x512xf32> to vector<8x128xf32>
    %222 = math.tanh %221 : vector<8x128xf32>
    %223 = vector.extract_strided_slice %204 {offsets = [0, 384], sizes = [8, 128], strides = [1, 1]} : vector<8x512xf32> to vector<8x128xf32>
    %cst_93 = arith.constant 5.000000e-01 : f32
    %224 = vector.broadcast %cst_93 : f32 to vector<8x128xf32>
    %225 = arith.mulf %224, %223 : vector<8x128xf32>
    %226 = math.tanh %225 : vector<8x128xf32>
    %cst_94 = arith.constant 5.000000e-01 : f32
    %227 = vector.broadcast %cst_94 : f32 to vector<8x128xf32>
    %228 = arith.mulf %227, %226 : vector<8x128xf32>
    %cst_95 = arith.constant 5.000000e-01 : f32
    %229 = vector.broadcast %cst_95 : f32 to vector<8x128xf32>
    %230 = arith.addf %228, %229 : vector<8x128xf32>
    %231 = arith.mulf %220, %161 : vector<8x128xf32>
    %232 = arith.mulf %212, %222 : vector<8x128xf32>
    %233 = arith.addf %231, %232 : vector<8x128xf32>
    %234 = math.tanh %233 : vector<8x128xf32>
    %235 = arith.mulf %230, %234 : vector<8x128xf32>
    %c40_96 = arith.constant 40 : index
    %c128_97 = arith.constant 128 : index
    %236 = vector.load %arg8[%c40_96, %c128_97] : memref<64x256xf32, #tpu.memory_space<vmem>>, vector<8x128xf32>
    tpu.vector_store %arg8[%c40_96, %c128_97], %235 {strides = array<i32>} : memref<64x256xf32, #tpu.memory_space<vmem>>, vector<8x128xf32>,
    %c24 = arith.constant 24 : index
    %c0_98 = arith.constant 0 : index
    %237 = vector.load %arg9[%c24, %c0_98] : memref<64x1024xf32, #tpu.memory_space<vmem>>, vector<8x512xf32>
    %238 = arith.truncf %199 : vector<8x128xf32> to vector<8x128xbf16>
    %cst_99 = arith.constant dense<0.000000e+00> : vector<8x512xf32>
    %239 = tpu.matmul %238, %14, %cst_99 {dimension_numbers = #tpu.dot_dimension_numbers<[1], [0], [0], [1], [0, 0, 1, 1], [], []>} : vector<8x128xbf16>, vector<128x512xbf16>, vector<8x512xf32> -> vector<8x512xf32>
    %240 = arith.addf %237, %239 : vector<8x512xf32>
    %241 = vector.extract_strided_slice %240 {offsets = [0, 0], sizes = [8, 128], strides = [1, 1]} : vector<8x512xf32> to vector<8x128xf32>
    %cst_100 = arith.constant 5.000000e-01 : f32
    %242 = vector.broadcast %cst_100 : f32 to vector<8x128xf32>
    %243 = arith.mulf %242, %241 : vector<8x128xf32>
    %244 = math.tanh %243 : vector<8x128xf32>
    %cst_101 = arith.constant 5.000000e-01 : f32
    %245 = vector.broadcast %cst_101 : f32 to vector<8x128xf32>
    %246 = arith.mulf %245, %244 : vector<8x128xf32>
    %cst_102 = arith.constant 5.000000e-01 : f32
    %247 = vector.broadcast %cst_102 : f32 to vector<8x128xf32>
    %248 = arith.addf %246, %247 : vector<8x128xf32>
    %249 = vector.extract_strided_slice %240 {offsets = [0, 128], sizes = [8, 128], strides = [1, 1]} : vector<8x512xf32> to vector<8x128xf32>
    %cst_103 = arith.constant 5.000000e-01 : f32
    %250 = vector.broadcast %cst_103 : f32 to vector<8x128xf32>
    %251 = arith.mulf %250, %249 : vector<8x128xf32>
    %252 = math.tanh %251 : vector<8x128xf32>
    %cst_104 = arith.constant 5.000000e-01 : f32
    %253 = vector.broadcast %cst_104 : f32 to vector<8x128xf32>
    %254 = arith.mulf %253, %252 : vector<8x128xf32>
    %cst_105 = arith.constant 5.000000e-01 : f32
    %255 = vector.broadcast %cst_105 : f32 to vector<8x128xf32>
    %256 = arith.addf %254, %255 : vector<8x128xf32>
    %257 = vector.extract_strided_slice %240 {offsets = [0, 256], sizes = [8, 128], strides = [1, 1]} : vector<8x512xf32> to vector<8x128xf32>
    %258 = math.tanh %257 : vector<8x128xf32>
    %259 = vector.extract_strided_slice %240 {offsets = [0, 384], sizes = [8, 128], strides = [1, 1]} : vector<8x512xf32> to vector<8x128xf32>
    %cst_106 = arith.constant 5.000000e-01 : f32
    %260 = vector.broadcast %cst_106 : f32 to vector<8x128xf32>
    %261 = arith.mulf %260, %259 : vector<8x128xf32>
    %262 = math.tanh %261 : vector<8x128xf32>
    %cst_107 = arith.constant 5.000000e-01 : f32
    %263 = vector.broadcast %cst_107 : f32 to vector<8x128xf32>
    %264 = arith.mulf %263, %262 : vector<8x128xf32>
    %cst_108 = arith.constant 5.000000e-01 : f32
    %265 = vector.broadcast %cst_108 : f32 to vector<8x128xf32>
    %266 = arith.addf %264, %265 : vector<8x128xf32>
    %267 = arith.mulf %256, %197 : vector<8x128xf32>
    %268 = arith.mulf %248, %258 : vector<8x128xf32>
    %269 = arith.addf %267, %268 : vector<8x128xf32>
    %270 = math.tanh %269 : vector<8x128xf32>
    %271 = arith.mulf %266, %270 : vector<8x128xf32>
    %c24_109 = arith.constant 24 : index
    %c0_110 = arith.constant 0 : index
    %272 = vector.load %arg8[%c24_109, %c0_110] : memref<64x256xf32, #tpu.memory_space<vmem>>, vector<8x128xf32>
    tpu.vector_store %arg8[%c24_109, %c0_110], %271 {strides = array<i32>} : memref<64x256xf32, #tpu.memory_space<vmem>>, vector<8x128xf32>,
    %c32 = arith.constant 32 : index
    %c512_111 = arith.constant 512 : index
    %273 = vector.load %arg9[%c32, %c512_111] : memref<64x1024xf32, #tpu.memory_space<vmem>>, vector<8x512xf32>
    %274 = arith.truncf %235 : vector<8x128xf32> to vector<8x128xbf16>
    %cst_112 = arith.constant dense<0.000000e+00> : vector<8x512xf32>
    %275 = tpu.matmul %274, %16, %cst_112 {dimension_numbers = #tpu.dot_dimension_numbers<[1], [0], [0], [1], [0, 0, 1, 1], [], []>} : vector<8x128xbf16>, vector<128x512xbf16>, vector<8x512xf32> -> vector<8x512xf32>
    %276 = arith.addf %273, %275 : vector<8x512xf32>
    %277 = vector.extract_strided_slice %276 {offsets = [0, 0], sizes = [8, 128], strides = [1, 1]} : vector<8x512xf32> to vector<8x128xf32>
    %cst_113 = arith.constant 5.000000e-01 : f32
    %278 = vector.broadcast %cst_113 : f32 to vector<8x128xf32>
    %279 = arith.mulf %278, %277 : vector<8x128xf32>
    %280 = math.tanh %279 : vector<8x128xf32>
    %cst_114 = arith.constant 5.000000e-01 : f32
    %281 = vector.broadcast %cst_114 : f32 to vector<8x128xf32>
    %282 = arith.mulf %281, %280 : vector<8x128xf32>
    %cst_115 = arith.constant 5.000000e-01 : f32
    %283 = vector.broadcast %cst_115 : f32 to vector<8x128xf32>
    %284 = arith.addf %282, %283 : vector<8x128xf32>
    %285 = vector.extract_strided_slice %276 {offsets = [0, 128], sizes = [8, 128], strides = [1, 1]} : vector<8x512xf32> to vector<8x128xf32>
    %cst_116 = arith.constant 5.000000e-01 : f32
    %286 = vector.broadcast %cst_116 : f32 to vector<8x128xf32>
    %287 = arith.mulf %286, %285 : vector<8x128xf32>
    %288 = math.tanh %287 : vector<8x128xf32>
    %cst_117 = arith.constant 5.000000e-01 : f32
    %289 = vector.broadcast %cst_117 : f32 to vector<8x128xf32>
    %290 = arith.mulf %289, %288 : vector<8x128xf32>
    %cst_118 = arith.constant 5.000000e-01 : f32
    %291 = vector.broadcast %cst_118 : f32 to vector<8x128xf32>
    %292 = arith.addf %290, %291 : vector<8x128xf32>
    %293 = vector.extract_strided_slice %276 {offsets = [0, 256], sizes = [8, 128], strides = [1, 1]} : vector<8x512xf32> to vector<8x128xf32>
    %294 = math.tanh %293 : vector<8x128xf32>
    %295 = vector.extract_strided_slice %276 {offsets = [0, 384], sizes = [8, 128], strides = [1, 1]} : vector<8x512xf32> to vector<8x128xf32>
    %cst_119 = arith.constant 5.000000e-01 : f32
    %296 = vector.broadcast %cst_119 : f32 to vector<8x128xf32>
    %297 = arith.mulf %296, %295 : vector<8x128xf32>
    %298 = math.tanh %297 : vector<8x128xf32>
    %cst_120 = arith.constant 5.000000e-01 : f32
    %299 = vector.broadcast %cst_120 : f32 to vector<8x128xf32>
    %300 = arith.mulf %299, %298 : vector<8x128xf32>
    %cst_121 = arith.constant 5.000000e-01 : f32
    %301 = vector.broadcast %cst_121 : f32 to vector<8x128xf32>
    %302 = arith.addf %300, %301 : vector<8x128xf32>
    %303 = arith.mulf %292, %233 : vector<8x128xf32>
    %304 = arith.mulf %284, %294 : vector<8x128xf32>
    %305 = arith.addf %303, %304 : vector<8x128xf32>
    %306 = math.tanh %305 : vector<8x128xf32>
    %307 = arith.mulf %302, %306 : vector<8x128xf32>
    %c32_122 = arith.constant 32 : index
    %c128_123 = arith.constant 128 : index
    %308 = vector.load %arg8[%c32_122, %c128_123] : memref<64x256xf32, #tpu.memory_space<vmem>>, vector<8x128xf32>
    tpu.vector_store %arg8[%c32_122, %c128_123], %307 {strides = array<i32>} : memref<64x256xf32, #tpu.memory_space<vmem>>, vector<8x128xf32>,
    %c32_124 = arith.constant 32 : index
    %c0_125 = arith.constant 0 : index
    %309 = vector.load %arg9[%c32_124, %c0_125] : memref<64x1024xf32, #tpu.memory_space<vmem>>, vector<8x512xf32>
    %310 = arith.truncf %271 : vector<8x128xf32> to vector<8x128xbf16>
    %cst_126 = arith.constant dense<0.000000e+00> : vector<8x512xf32>
    %311 = tpu.matmul %310, %14, %cst_126 {dimension_numbers = #tpu.dot_dimension_numbers<[1], [0], [0], [1], [0, 0, 1, 1], [], []>} : vector<8x128xbf16>, vector<128x512xbf16>, vector<8x512xf32> -> vector<8x512xf32>
    %312 = arith.addf %309, %311 : vector<8x512xf32>
    %313 = vector.extract_strided_slice %312 {offsets = [0, 0], sizes = [8, 128], strides = [1, 1]} : vector<8x512xf32> to vector<8x128xf32>
    %cst_127 = arith.constant 5.000000e-01 : f32
    %314 = vector.broadcast %cst_127 : f32 to vector<8x128xf32>
    %315 = arith.mulf %314, %313 : vector<8x128xf32>
    %316 = math.tanh %315 : vector<8x128xf32>
    %cst_128 = arith.constant 5.000000e-01 : f32
    %317 = vector.broadcast %cst_128 : f32 to vector<8x128xf32>
    %318 = arith.mulf %317, %316 : vector<8x128xf32>
    %cst_129 = arith.constant 5.000000e-01 : f32
    %319 = vector.broadcast %cst_129 : f32 to vector<8x128xf32>
    %320 = arith.addf %318, %319 : vector<8x128xf32>
    %321 = vector.extract_strided_slice %312 {offsets = [0, 128], sizes = [8, 128], strides = [1, 1]} : vector<8x512xf32> to vector<8x128xf32>
    %cst_130 = arith.constant 5.000000e-01 : f32
    %322 = vector.broadcast %cst_130 : f32 to vector<8x128xf32>
    %323 = arith.mulf %322, %321 : vector<8x128xf32>
    %324 = math.tanh %323 : vector<8x128xf32>
    %cst_131 = arith.constant 5.000000e-01 : f32
    %325 = vector.broadcast %cst_131 : f32 to vector<8x128xf32>
    %326 = arith.mulf %325, %324 : vector<8x128xf32>
    %cst_132 = arith.constant 5.000000e-01 : f32
    %327 = vector.broadcast %cst_132 : f32 to vector<8x128xf32>
    %328 = arith.addf %326, %327 : vector<8x128xf32>
    %329 = vector.extract_strided_slice %312 {offsets = [0, 256], sizes = [8, 128], strides = [1, 1]} : vector<8x512xf32> to vector<8x128xf32>
    %330 = math.tanh %329 : vector<8x128xf32>
    %331 = vector.extract_strided_slice %312 {offsets = [0, 384], sizes = [8, 128], strides = [1, 1]} : vector<8x512xf32> to vector<8x128xf32>
    %cst_133 = arith.constant 5.000000e-01 : f32
    %332 = vector.broadcast %cst_133 : f32 to vector<8x128xf32>
    %333 = arith.mulf %332, %331 : vector<8x128xf32>
    %334 = math.tanh %333 : vector<8x128xf32>
    %cst_134 = arith.constant 5.000000e-01 : f32
    %335 = vector.broadcast %cst_134 : f32 to vector<8x128xf32>
    %336 = arith.mulf %335, %334 : vector<8x128xf32>
    %cst_135 = arith.constant 5.000000e-01 : f32
    %337 = vector.broadcast %cst_135 : f32 to vector<8x128xf32>
    %338 = arith.addf %336, %337 : vector<8x128xf32>
    %339 = arith.mulf %328, %269 : vector<8x128xf32>
    %340 = arith.mulf %320, %330 : vector<8x128xf32>
    %341 = arith.addf %339, %340 : vector<8x128xf32>
    %342 = math.tanh %341 : vector<8x128xf32>
    %343 = arith.mulf %338, %342 : vector<8x128xf32>
    %c32_136 = arith.constant 32 : index
    %c0_137 = arith.constant 0 : index
    %344 = vector.load %arg8[%c32_136, %c0_137] : memref<64x256xf32, #tpu.memory_space<vmem>>, vector<8x128xf32>
    tpu.vector_store %arg8[%c32_136, %c0_137], %343 {strides = array<i32>} : memref<64x256xf32, #tpu.memory_space<vmem>>, vector<8x128xf32>,
    %c24_138 = arith.constant 24 : index
    %c512_139 = arith.constant 512 : index
    %345 = vector.load %arg9[%c24_138, %c512_139] : memref<64x1024xf32, #tpu.memory_space<vmem>>, vector<8x512xf32>
    %346 = arith.truncf %307 : vector<8x128xf32> to vector<8x128xbf16>
    %cst_140 = arith.constant dense<0.000000e+00> : vector<8x512xf32>
    %347 = tpu.matmul %346, %16, %cst_140 {dimension_numbers = #tpu.dot_dimension_numbers<[1], [0], [0], [1], [0, 0, 1, 1], [], []>} : vector<8x128xbf16>, vector<128x512xbf16>, vector<8x512xf32> -> vector<8x512xf32>
    %348 = arith.addf %345, %347 : vector<8x512xf32>
    %349 = vector.extract_strided_slice %348 {offsets = [0, 0], sizes = [8, 128], strides = [1, 1]} : vector<8x512xf32> to vector<8x128xf32>
    %cst_141 = arith.constant 5.000000e-01 : f32
    %350 = vector.broadcast %cst_141 : f32 to vector<8x128xf32>
    %351 = arith.mulf %350, %349 : vector<8x128xf32>
    %352 = math.tanh %351 : vector<8x128xf32>
    %cst_142 = arith.constant 5.000000e-01 : f32
    %353 = vector.broadcast %cst_142 : f32 to vector<8x128xf32>
    %354 = arith.mulf %353, %352 : vector<8x128xf32>
    %cst_143 = arith.constant 5.000000e-01 : f32
    %355 = vector.broadcast %cst_143 : f32 to vector<8x128xf32>
    %356 = arith.addf %354, %355 : vector<8x128xf32>
    %357 = vector.extract_strided_slice %348 {offsets = [0, 128], sizes = [8, 128], strides = [1, 1]} : vector<8x512xf32> to vector<8x128xf32>
    %cst_144 = arith.constant 5.000000e-01 : f32
    %358 = vector.broadcast %cst_144 : f32 to vector<8x128xf32>
    %359 = arith.mulf %358, %357 : vector<8x128xf32>
    %360 = math.tanh %359 : vector<8x128xf32>
    %cst_145 = arith.constant 5.000000e-01 : f32
    %361 = vector.broadcast %cst_145 : f32 to vector<8x128xf32>
    %362 = arith.mulf %361, %360 : vector<8x128xf32>
    %cst_146 = arith.constant 5.000000e-01 : f32
    %363 = vector.broadcast %cst_146 : f32 to vector<8x128xf32>
    %364 = arith.addf %362, %363 : vector<8x128xf32>
    %365 = vector.extract_strided_slice %348 {offsets = [0, 256], sizes = [8, 128], strides = [1, 1]} : vector<8x512xf32> to vector<8x128xf32>
    %366 = math.tanh %365 : vector<8x128xf32>
    %367 = vector.extract_strided_slice %348 {offsets = [0, 384], sizes = [8, 128], strides = [1, 1]} : vector<8x512xf32> to vector<8x128xf32>
    %cst_147 = arith.constant 5.000000e-01 : f32
    %368 = vector.broadcast %cst_147 : f32 to vector<8x128xf32>
    %369 = arith.mulf %368, %367 : vector<8x128xf32>
    %370 = math.tanh %369 : vector<8x128xf32>
    %cst_148 = arith.constant 5.000000e-01 : f32
    %371 = vector.broadcast %cst_148 : f32 to vector<8x128xf32>
    %372 = arith.mulf %371, %370 : vector<8x128xf32>
    %cst_149 = arith.constant 5.000000e-01 : f32
    %373 = vector.broadcast %cst_149 : f32 to vector<8x128xf32>
    %374 = arith.addf %372, %373 : vector<8x128xf32>
    %375 = arith.mulf %364, %305 : vector<8x128xf32>
    %376 = arith.mulf %356, %366 : vector<8x128xf32>
    %377 = arith.addf %375, %376 : vector<8x128xf32>
    %378 = math.tanh %377 : vector<8x128xf32>
    %379 = arith.mulf %374, %378 : vector<8x128xf32>
    %c24_150 = arith.constant 24 : index
    %c128_151 = arith.constant 128 : index
    %380 = vector.load %arg8[%c24_150, %c128_151] : memref<64x256xf32, #tpu.memory_space<vmem>>, vector<8x128xf32>
    tpu.vector_store %arg8[%c24_150, %c128_151], %379 {strides = array<i32>} : memref<64x256xf32, #tpu.memory_space<vmem>>, vector<8x128xf32>,
    %c40_152 = arith.constant 40 : index
    %c0_153 = arith.constant 0 : index
    %381 = vector.load %arg9[%c40_152, %c0_153] : memref<64x1024xf32, #tpu.memory_space<vmem>>, vector<8x512xf32>
    %382 = arith.truncf %343 : vector<8x128xf32> to vector<8x128xbf16>
    %cst_154 = arith.constant dense<0.000000e+00> : vector<8x512xf32>
    %383 = tpu.matmul %382, %14, %cst_154 {dimension_numbers = #tpu.dot_dimension_numbers<[1], [0], [0], [1], [0, 0, 1, 1], [], []>} : vector<8x128xbf16>, vector<128x512xbf16>, vector<8x512xf32> -> vector<8x512xf32>
    %384 = arith.addf %381, %383 : vector<8x512xf32>
    %385 = vector.extract_strided_slice %384 {offsets = [0, 0], sizes = [8, 128], strides = [1, 1]} : vector<8x512xf32> to vector<8x128xf32>
    %cst_155 = arith.constant 5.000000e-01 : f32
    %386 = vector.broadcast %cst_155 : f32 to vector<8x128xf32>
    %387 = arith.mulf %386, %385 : vector<8x128xf32>
    %388 = math.tanh %387 : vector<8x128xf32>
    %cst_156 = arith.constant 5.000000e-01 : f32
    %389 = vector.broadcast %cst_156 : f32 to vector<8x128xf32>
    %390 = arith.mulf %389, %388 : vector<8x128xf32>
    %cst_157 = arith.constant 5.000000e-01 : f32
    %391 = vector.broadcast %cst_157 : f32 to vector<8x128xf32>
    %392 = arith.addf %390, %391 : vector<8x128xf32>
    %393 = vector.extract_strided_slice %384 {offsets = [0, 128], sizes = [8, 128], strides = [1, 1]} : vector<8x512xf32> to vector<8x128xf32>
    %cst_158 = arith.constant 5.000000e-01 : f32
    %394 = vector.broadcast %cst_158 : f32 to vector<8x128xf32>
    %395 = arith.mulf %394, %393 : vector<8x128xf32>
    %396 = math.tanh %395 : vector<8x128xf32>
    %cst_159 = arith.constant 5.000000e-01 : f32
    %397 = vector.broadcast %cst_159 : f32 to vector<8x128xf32>
    %398 = arith.mulf %397, %396 : vector<8x128xf32>
    %cst_160 = arith.constant 5.000000e-01 : f32
    %399 = vector.broadcast %cst_160 : f32 to vector<8x128xf32>
    %400 = arith.addf %398, %399 : vector<8x128xf32>
    %401 = vector.extract_strided_slice %384 {offsets = [0, 256], sizes = [8, 128], strides = [1, 1]} : vector<8x512xf32> to vector<8x128xf32>
    %402 = math.tanh %401 : vector<8x128xf32>
    %403 = vector.extract_strided_slice %384 {offsets = [0, 384], sizes = [8, 128], strides = [1, 1]} : vector<8x512xf32> to vector<8x128xf32>
    %cst_161 = arith.constant 5.000000e-01 : f32
    %404 = vector.broadcast %cst_161 : f32 to vector<8x128xf32>
    %405 = arith.mulf %404, %403 : vector<8x128xf32>
    %406 = math.tanh %405 : vector<8x128xf32>
    %cst_162 = arith.constant 5.000000e-01 : f32
    %407 = vector.broadcast %cst_162 : f32 to vector<8x128xf32>
    %408 = arith.mulf %407, %406 : vector<8x128xf32>
    %cst_163 = arith.constant 5.000000e-01 : f32
    %409 = vector.broadcast %cst_163 : f32 to vector<8x128xf32>
    %410 = arith.addf %408, %409 : vector<8x128xf32>
    %411 = arith.mulf %400, %341 : vector<8x128xf32>
    %412 = arith.mulf %392, %402 : vector<8x128xf32>
    %413 = arith.addf %411, %412 : vector<8x128xf32>
    %414 = math.tanh %413 : vector<8x128xf32>
    %415 = arith.mulf %410, %414 : vector<8x128xf32>
    %c40_164 = arith.constant 40 : index
    %c0_165 = arith.constant 0 : index
    %416 = vector.load %arg8[%c40_164, %c0_165] : memref<64x256xf32, #tpu.memory_space<vmem>>, vector<8x128xf32>
    tpu.vector_store %arg8[%c40_164, %c0_165], %415 {strides = array<i32>} : memref<64x256xf32, #tpu.memory_space<vmem>>, vector<8x128xf32>,
    %c16_166 = arith.constant 16 : index
    %c512_167 = arith.constant 512 : index
    %417 = vector.load %arg9[%c16_166, %c512_167] : memref<64x1024xf32, #tpu.memory_space<vmem>>, vector<8x512xf32>
    %418 = arith.truncf %379 : vector<8x128xf32> to vector<8x128xbf16>
    %cst_168 = arith.constant dense<0.000000e+00> : vector<8x512xf32>
    %419 = tpu.matmul %418, %16, %cst_168 {dimension_numbers = #tpu.dot_dimension_numbers<[1], [0], [0], [1], [0, 0, 1, 1], [], []>} : vector<8x128xbf16>, vector<128x512xbf16>, vector<8x512xf32> -> vector<8x512xf32>
    %420 = arith.addf %417, %419 : vector<8x512xf32>
    %421 = vector.extract_strided_slice %420 {offsets = [0, 0], sizes = [8, 128], strides = [1, 1]} : vector<8x512xf32> to vector<8x128xf32>
    %cst_169 = arith.constant 5.000000e-01 : f32
    %422 = vector.broadcast %cst_169 : f32 to vector<8x128xf32>
    %423 = arith.mulf %422, %421 : vector<8x128xf32>
    %424 = math.tanh %423 : vector<8x128xf32>
    %cst_170 = arith.constant 5.000000e-01 : f32
    %425 = vector.broadcast %cst_170 : f32 to vector<8x128xf32>
    %426 = arith.mulf %425, %424 : vector<8x128xf32>
    %cst_171 = arith.constant 5.000000e-01 : f32
    %427 = vector.broadcast %cst_171 : f32 to vector<8x128xf32>
    %428 = arith.addf %426, %427 : vector<8x128xf32>
    %429 = vector.extract_strided_slice %420 {offsets = [0, 128], sizes = [8, 128], strides = [1, 1]} : vector<8x512xf32> to vector<8x128xf32>
    %cst_172 = arith.constant 5.000000e-01 : f32
    %430 = vector.broadcast %cst_172 : f32 to vector<8x128xf32>
    %431 = arith.mulf %430, %429 : vector<8x128xf32>
    %432 = math.tanh %431 : vector<8x128xf32>
    %cst_173 = arith.constant 5.000000e-01 : f32
    %433 = vector.broadcast %cst_173 : f32 to vector<8x128xf32>
    %434 = arith.mulf %433, %432 : vector<8x128xf32>
    %cst_174 = arith.constant 5.000000e-01 : f32
    %435 = vector.broadcast %cst_174 : f32 to vector<8x128xf32>
    %436 = arith.addf %434, %435 : vector<8x128xf32>
    %437 = vector.extract_strided_slice %420 {offsets = [0, 256], sizes = [8, 128], strides = [1, 1]} : vector<8x512xf32> to vector<8x128xf32>
    %438 = math.tanh %437 : vector<8x128xf32>
    %439 = vector.extract_strided_slice %420 {offsets = [0, 384], sizes = [8, 128], strides = [1, 1]} : vector<8x512xf32> to vector<8x128xf32>
    %cst_175 = arith.constant 5.000000e-01 : f32
    %440 = vector.broadcast %cst_175 : f32 to vector<8x128xf32>
    %441 = arith.mulf %440, %439 : vector<8x128xf32>
    %442 = math.tanh %441 : vector<8x128xf32>
    %cst_176 = arith.constant 5.000000e-01 : f32
    %443 = vector.broadcast %cst_176 : f32 to vector<8x128xf32>
    %444 = arith.mulf %443, %442 : vector<8x128xf32>
    %cst_177 = arith.constant 5.000000e-01 : f32
    %445 = vector.broadcast %cst_177 : f32 to vector<8x128xf32>
    %446 = arith.addf %444, %445 : vector<8x128xf32>
    %447 = arith.mulf %436, %377 : vector<8x128xf32>
    %448 = arith.mulf %428, %438 : vector<8x128xf32>
    %449 = arith.addf %447, %448 : vector<8x128xf32>
    %450 = math.tanh %449 : vector<8x128xf32>
    %451 = arith.mulf %446, %450 : vector<8x128xf32>
    %c16_178 = arith.constant 16 : index
    %c128_179 = arith.constant 128 : index
    %452 = vector.load %arg8[%c16_178, %c128_179] : memref<64x256xf32, #tpu.memory_space<vmem>>, vector<8x128xf32>
    tpu.vector_store %arg8[%c16_178, %c128_179], %451 {strides = array<i32>} : memref<64x256xf32, #tpu.memory_space<vmem>>, vector<8x128xf32>,
    %c48_180 = arith.constant 48 : index
    %c0_181 = arith.constant 0 : index
    %453 = vector.load %arg9[%c48_180, %c0_181] : memref<64x1024xf32, #tpu.memory_space<vmem>>, vector<8x512xf32>
    %454 = arith.truncf %415 : vector<8x128xf32> to vector<8x128xbf16>
    %cst_182 = arith.constant dense<0.000000e+00> : vector<8x512xf32>
    %455 = tpu.matmul %454, %14, %cst_182 {dimension_numbers = #tpu.dot_dimension_numbers<[1], [0], [0], [1], [0, 0, 1, 1], [], []>} : vector<8x128xbf16>, vector<128x512xbf16>, vector<8x512xf32> -> vector<8x512xf32>
    %456 = arith.addf %453, %455 : vector<8x512xf32>
    %457 = vector.extract_strided_slice %456 {offsets = [0, 0], sizes = [8, 128], strides = [1, 1]} : vector<8x512xf32> to vector<8x128xf32>
    %cst_183 = arith.constant 5.000000e-01 : f32
    %458 = vector.broadcast %cst_183 : f32 to vector<8x128xf32>
    %459 = arith.mulf %458, %457 : vector<8x128xf32>
    %460 = math.tanh %459 : vector<8x128xf32>
    %cst_184 = arith.constant 5.000000e-01 : f32
    %461 = vector.broadcast %cst_184 : f32 to vector<8x128xf32>
    %462 = arith.mulf %461, %460 : vector<8x128xf32>
    %cst_185 = arith.constant 5.000000e-01 : f32
    %463 = vector.broadcast %cst_185 : f32 to vector<8x128xf32>
    %464 = arith.addf %462, %463 : vector<8x128xf32>
    %465 = vector.extract_strided_slice %456 {offsets = [0, 128], sizes = [8, 128], strides = [1, 1]} : vector<8x512xf32> to vector<8x128xf32>
    %cst_186 = arith.constant 5.000000e-01 : f32
    %466 = vector.broadcast %cst_186 : f32 to vector<8x128xf32>
    %467 = arith.mulf %466, %465 : vector<8x128xf32>
    %468 = math.tanh %467 : vector<8x128xf32>
    %cst_187 = arith.constant 5.000000e-01 : f32
    %469 = vector.broadcast %cst_187 : f32 to vector<8x128xf32>
    %470 = arith.mulf %469, %468 : vector<8x128xf32>
    %cst_188 = arith.constant 5.000000e-01 : f32
    %471 = vector.broadcast %cst_188 : f32 to vector<8x128xf32>
    %472 = arith.addf %470, %471 : vector<8x128xf32>
    %473 = vector.extract_strided_slice %456 {offsets = [0, 256], sizes = [8, 128], strides = [1, 1]} : vector<8x512xf32> to vector<8x128xf32>
    %474 = math.tanh %473 : vector<8x128xf32>
    %475 = vector.extract_strided_slice %456 {offsets = [0, 384], sizes = [8, 128], strides = [1, 1]} : vector<8x512xf32> to vector<8x128xf32>
    %cst_189 = arith.constant 5.000000e-01 : f32
    %476 = vector.broadcast %cst_189 : f32 to vector<8x128xf32>
    %477 = arith.mulf %476, %475 : vector<8x128xf32>
    %478 = math.tanh %477 : vector<8x128xf32>
    %cst_190 = arith.constant 5.000000e-01 : f32
    %479 = vector.broadcast %cst_190 : f32 to vector<8x128xf32>
    %480 = arith.mulf %479, %478 : vector<8x128xf32>
    %cst_191 = arith.constant 5.000000e-01 : f32
    %481 = vector.broadcast %cst_191 : f32 to vector<8x128xf32>
    %482 = arith.addf %480, %481 : vector<8x128xf32>
    %483 = arith.mulf %472, %413 : vector<8x128xf32>
    %484 = arith.mulf %464, %474 : vector<8x128xf32>
    %485 = arith.addf %483, %484 : vector<8x128xf32>
    %486 = math.tanh %485 : vector<8x128xf32>
    %487 = arith.mulf %482, %486 : vector<8x128xf32>
    %c48_192 = arith.constant 48 : index
    %c0_193 = arith.constant 0 : index
    %488 = vector.load %arg8[%c48_192, %c0_193] : memref<64x256xf32, #tpu.memory_space<vmem>>, vector<8x128xf32>
    tpu.vector_store %arg8[%c48_192, %c0_193], %487 {strides = array<i32>} : memref<64x256xf32, #tpu.memory_space<vmem>>, vector<8x128xf32>,
    %c8_194 = arith.constant 8 : index
    %c512_195 = arith.constant 512 : index
    %489 = vector.load %arg9[%c8_194, %c512_195] : memref<64x1024xf32, #tpu.memory_space<vmem>>, vector<8x512xf32>
    %490 = arith.truncf %451 : vector<8x128xf32> to vector<8x128xbf16>
    %cst_196 = arith.constant dense<0.000000e+00> : vector<8x512xf32>
    %491 = tpu.matmul %490, %16, %cst_196 {dimension_numbers = #tpu.dot_dimension_numbers<[1], [0], [0], [1], [0, 0, 1, 1], [], []>} : vector<8x128xbf16>, vector<128x512xbf16>, vector<8x512xf32> -> vector<8x512xf32>
    %492 = arith.addf %489, %491 : vector<8x512xf32>
    %493 = vector.extract_strided_slice %492 {offsets = [0, 0], sizes = [8, 128], strides = [1, 1]} : vector<8x512xf32> to vector<8x128xf32>
    %cst_197 = arith.constant 5.000000e-01 : f32
    %494 = vector.broadcast %cst_197 : f32 to vector<8x128xf32>
    %495 = arith.mulf %494, %493 : vector<8x128xf32>
    %496 = math.tanh %495 : vector<8x128xf32>
    %cst_198 = arith.constant 5.000000e-01 : f32
    %497 = vector.broadcast %cst_198 : f32 to vector<8x128xf32>
    %498 = arith.mulf %497, %496 : vector<8x128xf32>
    %cst_199 = arith.constant 5.000000e-01 : f32
    %499 = vector.broadcast %cst_199 : f32 to vector<8x128xf32>
    %500 = arith.addf %498, %499 : vector<8x128xf32>
    %501 = vector.extract_strided_slice %492 {offsets = [0, 128], sizes = [8, 128], strides = [1, 1]} : vector<8x512xf32> to vector<8x128xf32>
    %cst_200 = arith.constant 5.000000e-01 : f32
    %502 = vector.broadcast %cst_200 : f32 to vector<8x128xf32>
    %503 = arith.mulf %502, %501 : vector<8x128xf32>
    %504 = math.tanh %503 : vector<8x128xf32>
    %cst_201 = arith.constant 5.000000e-01 : f32
    %505 = vector.broadcast %cst_201 : f32 to vector<8x128xf32>
    %506 = arith.mulf %505, %504 : vector<8x128xf32>
    %cst_202 = arith.constant 5.000000e-01 : f32
    %507 = vector.broadcast %cst_202 : f32 to vector<8x128xf32>
    %508 = arith.addf %506, %507 : vector<8x128xf32>
    %509 = vector.extract_strided_slice %492 {offsets = [0, 256], sizes = [8, 128], strides = [1, 1]} : vector<8x512xf32> to vector<8x128xf32>
    %510 = math.tanh %509 : vector<8x128xf32>
    %511 = vector.extract_strided_slice %492 {offsets = [0, 384], sizes = [8, 128], strides = [1, 1]} : vector<8x512xf32> to vector<8x128xf32>
    %cst_203 = arith.constant 5.000000e-01 : f32
    %512 = vector.broadcast %cst_203 : f32 to vector<8x128xf32>
    %513 = arith.mulf %512, %511 : vector<8x128xf32>
    %514 = math.tanh %513 : vector<8x128xf32>
    %cst_204 = arith.constant 5.000000e-01 : f32
    %515 = vector.broadcast %cst_204 : f32 to vector<8x128xf32>
    %516 = arith.mulf %515, %514 : vector<8x128xf32>
    %cst_205 = arith.constant 5.000000e-01 : f32
    %517 = vector.broadcast %cst_205 : f32 to vector<8x128xf32>
    %518 = arith.addf %516, %517 : vector<8x128xf32>
    %519 = arith.mulf %508, %449 : vector<8x128xf32>
    %520 = arith.mulf %500, %510 : vector<8x128xf32>
    %521 = arith.addf %519, %520 : vector<8x128xf32>
    %522 = math.tanh %521 : vector<8x128xf32>
    %523 = arith.mulf %518, %522 : vector<8x128xf32>
    %c8_206 = arith.constant 8 : index
    %c128_207 = arith.constant 128 : index
    %524 = vector.load %arg8[%c8_206, %c128_207] : memref<64x256xf32, #tpu.memory_space<vmem>>, vector<8x128xf32>
    tpu.vector_store %arg8[%c8_206, %c128_207], %523 {strides = array<i32>} : memref<64x256xf32, #tpu.memory_space<vmem>>, vector<8x128xf32>,
    %c56_208 = arith.constant 56 : index
    %c0_209 = arith.constant 0 : index
    %525 = vector.load %arg9[%c56_208, %c0_209] : memref<64x1024xf32, #tpu.memory_space<vmem>>, vector<8x512xf32>
    %526 = arith.truncf %487 : vector<8x128xf32> to vector<8x128xbf16>
    %cst_210 = arith.constant dense<0.000000e+00> : vector<8x512xf32>
    %527 = tpu.matmul %526, %14, %cst_210 {dimension_numbers = #tpu.dot_dimension_numbers<[1], [0], [0], [1], [0, 0, 1, 1], [], []>} : vector<8x128xbf16>, vector<128x512xbf16>, vector<8x512xf32> -> vector<8x512xf32>
    %528 = arith.addf %525, %527 : vector<8x512xf32>
    %529 = vector.extract_strided_slice %528 {offsets = [0, 0], sizes = [8, 128], strides = [1, 1]} : vector<8x512xf32> to vector<8x128xf32>
    %cst_211 = arith.constant 5.000000e-01 : f32
    %530 = vector.broadcast %cst_211 : f32 to vector<8x128xf32>
    %531 = arith.mulf %530, %529 : vector<8x128xf32>
    %532 = math.tanh %531 : vector<8x128xf32>
    %cst_212 = arith.constant 5.000000e-01 : f32
    %533 = vector.broadcast %cst_212 : f32 to vector<8x128xf32>
    %534 = arith.mulf %533, %532 : vector<8x128xf32>
    %cst_213 = arith.constant 5.000000e-01 : f32
    %535 = vector.broadcast %cst_213 : f32 to vector<8x128xf32>
    %536 = arith.addf %534, %535 : vector<8x128xf32>
    %537 = vector.extract_strided_slice %528 {offsets = [0, 128], sizes = [8, 128], strides = [1, 1]} : vector<8x512xf32> to vector<8x128xf32>
    %cst_214 = arith.constant 5.000000e-01 : f32
    %538 = vector.broadcast %cst_214 : f32 to vector<8x128xf32>
    %539 = arith.mulf %538, %537 : vector<8x128xf32>
    %540 = math.tanh %539 : vector<8x128xf32>
    %cst_215 = arith.constant 5.000000e-01 : f32
    %541 = vector.broadcast %cst_215 : f32 to vector<8x128xf32>
    %542 = arith.mulf %541, %540 : vector<8x128xf32>
    %cst_216 = arith.constant 5.000000e-01 : f32
    %543 = vector.broadcast %cst_216 : f32 to vector<8x128xf32>
    %544 = arith.addf %542, %543 : vector<8x128xf32>
    %545 = vector.extract_strided_slice %528 {offsets = [0, 256], sizes = [8, 128], strides = [1, 1]} : vector<8x512xf32> to vector<8x128xf32>
    %546 = math.tanh %545 : vector<8x128xf32>
    %547 = vector.extract_strided_slice %528 {offsets = [0, 384], sizes = [8, 128], strides = [1, 1]} : vector<8x512xf32> to vector<8x128xf32>
    %cst_217 = arith.constant 5.000000e-01 : f32
    %548 = vector.broadcast %cst_217 : f32 to vector<8x128xf32>
    %549 = arith.mulf %548, %547 : vector<8x128xf32>
    %550 = math.tanh %549 : vector<8x128xf32>
    %cst_218 = arith.constant 5.000000e-01 : f32
    %551 = vector.broadcast %cst_218 : f32 to vector<8x128xf32>
    %552 = arith.mulf %551, %550 : vector<8x128xf32>
    %cst_219 = arith.constant 5.000000e-01 : f32
    %553 = vector.broadcast %cst_219 : f32 to vector<8x128xf32>
    %554 = arith.addf %552, %553 : vector<8x128xf32>
    %555 = arith.mulf %544, %485 : vector<8x128xf32>
    %556 = arith.mulf %536, %546 : vector<8x128xf32>
    %557 = arith.addf %555, %556 : vector<8x128xf32>
    %558 = math.tanh %557 : vector<8x128xf32>
    %559 = arith.mulf %554, %558 : vector<8x128xf32>
    %c56_220 = arith.constant 56 : index
    %c0_221 = arith.constant 0 : index
    %560 = vector.load %arg8[%c56_220, %c0_221] : memref<64x256xf32, #tpu.memory_space<vmem>>, vector<8x128xf32>
    tpu.vector_store %arg8[%c56_220, %c0_221], %559 {strides = array<i32>} : memref<64x256xf32, #tpu.memory_space<vmem>>, vector<8x128xf32>,
    %c0_222 = arith.constant 0 : index
    %c512_223 = arith.constant 512 : index
    %561 = vector.load %arg9[%c0_222, %c512_223] : memref<64x1024xf32, #tpu.memory_space<vmem>>, vector<8x512xf32>
    %562 = arith.truncf %523 : vector<8x128xf32> to vector<8x128xbf16>
    %cst_224 = arith.constant dense<0.000000e+00> : vector<8x512xf32>
    %563 = tpu.matmul %562, %16, %cst_224 {dimension_numbers = #tpu.dot_dimension_numbers<[1], [0], [0], [1], [0, 0, 1, 1], [], []>} : vector<8x128xbf16>, vector<128x512xbf16>, vector<8x512xf32> -> vector<8x512xf32>
    %564 = arith.addf %561, %563 : vector<8x512xf32>
    %565 = vector.extract_strided_slice %564 {offsets = [0, 0], sizes = [8, 128], strides = [1, 1]} : vector<8x512xf32> to vector<8x128xf32>
    %cst_225 = arith.constant 5.000000e-01 : f32
    %566 = vector.broadcast %cst_225 : f32 to vector<8x128xf32>
    %567 = arith.mulf %566, %565 : vector<8x128xf32>
    %568 = math.tanh %567 : vector<8x128xf32>
    %cst_226 = arith.constant 5.000000e-01 : f32
    %569 = vector.broadcast %cst_226 : f32 to vector<8x128xf32>
    %570 = arith.mulf %569, %568 : vector<8x128xf32>
    %cst_227 = arith.constant 5.000000e-01 : f32
    %571 = vector.broadcast %cst_227 : f32 to vector<8x128xf32>
    %572 = arith.addf %570, %571 : vector<8x128xf32>
    %573 = vector.extract_strided_slice %564 {offsets = [0, 128], sizes = [8, 128], strides = [1, 1]} : vector<8x512xf32> to vector<8x128xf32>
    %cst_228 = arith.constant 5.000000e-01 : f32
    %574 = vector.broadcast %cst_228 : f32 to vector<8x128xf32>
    %575 = arith.mulf %574, %573 : vector<8x128xf32>
    %576 = math.tanh %575 : vector<8x128xf32>
    %cst_229 = arith.constant 5.000000e-01 : f32
    %577 = vector.broadcast %cst_229 : f32 to vector<8x128xf32>
    %578 = arith.mulf %577, %576 : vector<8x128xf32>
    %cst_230 = arith.constant 5.000000e-01 : f32
    %579 = vector.broadcast %cst_230 : f32 to vector<8x128xf32>
    %580 = arith.addf %578, %579 : vector<8x128xf32>
    %581 = vector.extract_strided_slice %564 {offsets = [0, 256], sizes = [8, 128], strides = [1, 1]} : vector<8x512xf32> to vector<8x128xf32>
    %582 = math.tanh %581 : vector<8x128xf32>
    %583 = vector.extract_strided_slice %564 {offsets = [0, 384], sizes = [8, 128], strides = [1, 1]} : vector<8x512xf32> to vector<8x128xf32>
    %cst_231 = arith.constant 5.000000e-01 : f32
    %584 = vector.broadcast %cst_231 : f32 to vector<8x128xf32>
    %585 = arith.mulf %584, %583 : vector<8x128xf32>
    %586 = math.tanh %585 : vector<8x128xf32>
    %cst_232 = arith.constant 5.000000e-01 : f32
    %587 = vector.broadcast %cst_232 : f32 to vector<8x128xf32>
    %588 = arith.mulf %587, %586 : vector<8x128xf32>
    %cst_233 = arith.constant 5.000000e-01 : f32
    %589 = vector.broadcast %cst_233 : f32 to vector<8x128xf32>
    %590 = arith.addf %588, %589 : vector<8x128xf32>
    %591 = arith.mulf %580, %521 : vector<8x128xf32>
    %592 = arith.mulf %572, %582 : vector<8x128xf32>
    %593 = arith.addf %591, %592 : vector<8x128xf32>
    %594 = math.tanh %593 : vector<8x128xf32>
    %595 = arith.mulf %590, %594 : vector<8x128xf32>
    %c0_234 = arith.constant 0 : index
    %c128_235 = arith.constant 128 : index
    %596 = vector.load %arg8[%c0_234, %c128_235] : memref<64x256xf32, #tpu.memory_space<vmem>>, vector<8x128xf32>
    tpu.vector_store %arg8[%c0_234, %c128_235], %595 {strides = array<i32>} : memref<64x256xf32, #tpu.memory_space<vmem>>, vector<8x128xf32>,
    %c4_i32 = arith.constant 4 : i32
    %597 = arith.cmpi eq, %arg0, %c4_i32 : i32
    %598 = arith.extui %597 : i1 to i32
    %c0_i32_236 = arith.constant 0 : i32
    %599 = arith.cmpi ne, %598, %c0_i32_236 : i32
    scf.if %599 {
      %c56_237 = arith.constant 56 : index
      %c0_238 = arith.constant 0 : index
      %600 = vector.load %arg8[%c56_237, %c0_238] : memref<64x256xf32, #tpu.memory_space<vmem>>, vector<8x128xf32>
      %c56_239 = arith.constant 56 : index
      %c128_240 = arith.constant 128 : index
      %601 = vector.load %arg8[%c56_239, %c128_240] : memref<64x256xf32, #tpu.memory_space<vmem>>, vector<8x128xf32>
      %602 = arith.addf %600, %601 : vector<8x128xf32>
      %c0_241 = arith.constant 0 : index
      %c0_242 = arith.constant 0 : index
      %603 = vector.load %arg5[%c0_241, %c0_242] : memref<128x128xf32, #tpu.memory_space<vmem>>, vector<128x128xf32>
      %cst_243 = arith.constant dense<0.000000e+00> : vector<8x128xf32>
      %604 = tpu.matmul %602, %603, %cst_243 {dimension_numbers = #tpu.dot_dimension_numbers<[1], [0], [0], [1], [0, 0, 1, 1], [], []>} : vector<8x128xf32>, vector<128x128xf32>, vector<8x128xf32> -> vector<8x128xf32>
      %c0_244 = arith.constant 0 : index
      %c0_245 = arith.constant 0 : index
      %605 = vector.load %arg6[%c0_244, %c0_245] : memref<1x128xf32, #tpu.memory_space<vmem>>, vector<1x128xf32>
      %606 = vector.broadcast %605 : vector<1x128xf32> to vector<8x128xf32>
      %607 = arith.addf %604, %606 : vector<8x128xf32>
      %c0_246 = arith.constant 0 : index
      %c0_247 = arith.constant 0 : index
      %608 = vector.load %arg7[%c0_246, %c0_247] : memref<8x128xf32, #tpu.memory_space<vmem>>, vector<8x128xf32>
      tpu.vector_store %arg7[%c0_246, %c0_247], %607 {strides = array<i32>} : memref<8x128xf32, #tpu.memory_space<vmem>>, vector<8x128xf32>,
    } else {
    }
    return
  }
  func.func @transform_0(%arg0: i32) -> (i32, i32) {
    %c0_i32 = arith.constant 0 : i32
    %c0_i32_0 = arith.constant 0 : i32
    %c0_i32_1 = arith.constant 0 : i32
    return %c0_i32, %c0_i32_0 : i32, i32
  }
  func.func @transform_1(%arg0: i32) -> (i32, i32, i32) {
    %c0_i32 = arith.constant 0 : i32
    %c0_i32_0 = arith.constant 0 : i32
    %c0_i32_1 = arith.constant 0 : i32
    return %arg0, %c0_i32, %c0_i32_0 : i32, i32, i32
  }
  func.func @transform_2(%arg0: i32) -> (i32, i32, i32, i32) {
    %c0_i32 = arith.constant 0 : i32
    %c0_i32_0 = arith.constant 0 : i32
    %c0_i32_1 = arith.constant 0 : i32
    %c0_i32_2 = arith.constant 0 : i32
    return %arg0, %c0_i32, %c0_i32_0, %c0_i32_1 : i32, i32, i32, i32
  }
  func.func @transform_3(%arg0: i32) -> (i32, i32, i32) {
    %c0_i32 = arith.constant 0 : i32
    %c0_i32_0 = arith.constant 0 : i32
    %c0_i32_1 = arith.constant 0 : i32
    return %arg0, %c0_i32, %c0_i32_0 : i32, i32, i32
  }
  func.func @transform_4(%arg0: i32) -> (i32, i32) {
    %c0_i32 = arith.constant 0 : i32
    %c0_i32_0 = arith.constant 0 : i32
    %c0_i32_1 = arith.constant 0 : i32
    return %c0_i32, %c0_i32_0 : i32, i32
  }
  func.func @transform_5(%arg0: i32) -> (i32, i32) {
    %c0_i32 = arith.constant 0 : i32
    %c0_i32_0 = arith.constant 0 : i32
    %c0_i32_1 = arith.constant 0 : i32
    return %c0_i32, %c0_i32_0 : i32, i32
  }
  func.func @transform_6(%arg0: i32) -> (i32, i32) {
    %c0_i32 = arith.constant 0 : i32
    %c0_i32_0 = arith.constant 0 : i32
    %c0_i32_1 = arith.constant 0 : i32
    return %c0_i32, %c0_i32_0 : i32, i32
  }
}

</mosaic_0001>

<bundles_post_ra>
// kernel: birnn_classifier_forward.1
= control target key start
LH: loop header
LB: loop body
LE: loop exit
PB: predicated region body
PF: predicated region fallthrough
CT: control target
= control target key end

     0   :  { %s6638_s0 = inlined_call_operand.vmem [shape: f32[64,256], index: 0, kind: input, shape index: {}]   ;;  %s6639_s1 = inlined_call_operand.hbm [shape: bf16[5,256,1024], index: 1, kind: input, shape index: {}]   ;;  %s6640_s2 = inlined_call_operand.hbm [shape: bf16[5,2,128,512], index: 2, kind: input, shape index: {}]   ;;  %s6641_s3 = inlined_call_operand.hbm [shape: f32[5,1,1024], index: 3, kind: input, shape index: {}]   ;;  %s6642_s4 = inlined_call_operand.hbm [shape: f32[128,128], index: 4, kind: input, shape index: {}]   ;;  %s6643_s5 = inlined_call_operand.hbm [shape: f32[1,128], index: 5, kind: input, shape index: {}]   ;;  %s6644_s6 = inlined_call_operand.vmem [shape: f32[8,128], index: 6, kind: output, shape index: {}]  }
   0x1   :  { %6742 = sst [smem:[#allocation105_spill]] %s6639_s1 }
   0x2   :  { %6743 = sst [smem:[#allocation106_spill]] %s6640_s2 }
   0x3   :  { %6744 = sst [smem:[#allocation107_spill]] %s6642_s4 }
   0x4   :  { %11 = vsyncpa [#allocation5], 0 }
   0x5   :  { %13 = vsyncpa [#allocation5 + $0x1], 0 }
   0x6   :  { %14 = vsyncpa [#allocation7], 0 }
   0x7   :  { %16 = vsyncpa [#allocation7 + $0x1], 0 }
   0x8   :  { %17 = vsyncpa [#allocation10], 0  ;;  %s4927_s21 = smov 0   ;;  %s4929_s22 = smov 0  }
   0x9   :  { %s4931_s23 = smov 0   ;;  %s4933_s24 = smov 0  }
   0xa LB: > { %6745 = sst [smem:[#allocation15_spill]] %s4872_s23  ;;  %s4946_s25 = sadd.s32 4294967295, %s4876_s24   ;;  %s4876_s24 = sphi %s4933_s24, %s7023_s24   ;;  %s4872_s23 = sphi %s4931_s23, %s7020_s23   ;;  %s4868_s22 = sphi %s4929_s22, %s7022_s22   ;;  %s4864_s21 = sphi %s4927_s21, %s7021_s21  }
   0xb   : > { %s4949_s26 = sadd.s32 1, %s4876_s24   ;;  %s51_s28 = sadd.s32 1, %s4872_s23 }
   0xc   : > { %s48_s27 = ssub.s32 %s4876_s24, %s4949_s26  ;;  %p58_p1 = scmp.ne.s32.totalorder %s4872_s23, %s4868_s22 }
   0xd   : > { %p49_p0 = scmp.eq.s32.totalorder %s48_s27, 0  ;;  %p59_p2 = scmp.eq.s32.totalorder %s4876_s24, 0 }
   0xe   : > { %p64_p3 = scmp.ne.s32.totalorder %s4868_s22, %s4864_s21  ;;  %p6645_p5 = scmp.eq.s32.totalorder %s4946_s25, 0 }
   0xf   : > { %s4959_s29 = scalar_select %p49_p0, %s4872_s23, %s51_s28  }
  0x10   : > { %p4961_p4 = por %p59_p2, %p58_p1  ;;  %p3932_p6 = scmp.ge.s32.totalorder %s4876_s24, 1 }
  0x11   : > { %6746 = sst [smem:[#allocation16_spill]] %s4959_s29  ;;  %p190_p7 = scmp.lt.s32.totalorder %s4876_s24, 6 }
  0x12   : > { %p4970_p8 = por %p6645_p5, %p64_p3  ;;  %s4878_s9 = smov [#allocation9]  }
  0x13   : > { %p4975_p10 = pnand %p3932_p6, %p190_p7  ;;  %s205_s10 = sshll.u32 %s4878_s9, 4  ;;  %s206_s10 = int_to_ptr.vmem [resolvable:$true] %s205_s10 }
  0x14   : > { %s6748_s7 = scalar_select %p4970_p8, 1, 0 }
  0x15   : > { %s6749_s8 = scalar_select %p4975_p10, 1, 0 }
  0x16   : > { %p4249_p11 = pneg %p4975_p10  ;;  %p4268_p13 = scmp.lt.s32.totalorder %s4876_s24, 5 }
  0x17   : > { %s4989_s12 = sand.u32 1, %s4872_s23   ;;  %s251_s13 = sand.u32 1, %s4876_s24  }
  0x18   : > { %p4983_p12 = pnand %p4249_p11, %p6645_p5  ;;  %p4994_p0 = pnand %p4268_p13, %p4961_p4 }
  0x19   : > { %s4709_s15 = scalar_lea.vmem %s206_s10, 2048  ;;  %p4717_p7 = scmp.lt.s32.totalorder %s206_s10, %s206_s10 }
  0x1a   : > { %s6750_s11 = scalar_select %p4983_p12, 1, 0 }
  0x1b   : > { %p6647_p1 = pneg %p4983_p12  ;;  %p4710_p2 = scmp.ne.s32.totalorder %s206_s10, %s4709_s15 }
  0x1c   : > { %p4718_p11 = scmp.lt.s32.totalorder %s4709_s15, %s4709_s15 }
  0x1d   : > { %p4712_p3 = pnand %p4710_p2, %p6647_p1 }
  0x1e   : > { %p4719_p9 = por %p4718_p11, %p4717_p7 }
  0x1f   : > { %p4713_p6 = pneg %p4712_p3 }
  0x21   : > { %p4720_p5 = pnand %p4719_p9, %p4713_p6 }
  0x23   : > { %4723 = shalt.err (!%p4720_p5)
}
  0x24   : > { %s4879_s16 = smov 128   ;;  %s4880_s17 = smov 8  }
  0x25   : > { %s6752_s4 = sld [smem:[#allocation107_spill]]  ;;  %s3939_s20 = sshll.u32 %s4989_s12, 9 }
  0x26   : > { %s4181_s21 = sshll.u32 %s4876_s24, 13  ;;  %s6753_s2 = sld [smem:[#allocation106_spill]] }
  0x27   : > { %s255_s9 = scalar_lea.vmem [#allocation6], %s3939_s20  ;;  %s5017_s29 = scalar_lea.sflag [#allocation7], %s251_s13 }
  0x28   : > { %s262_s15 = sshll.u32 %s255_s9, 4  ;;  %p5023_p5 = pneg %p4994_p0  ;;  %s5015_s15 = int_to_ptr.vmem [resolvable:$true] %s262_s15 }
  0x2b   : > { %4252 = dma.hbm_to_vmem [thread:$0]  (!%p4983_p12), %s6752_s4, 2048, %s206_s10, [#allocation10], %s4879_s16, %s4879_s16, %s4880_s17  }
  0x2c   : > { %s5013_s30 = scalar_lea.hbm %s6753_s2, %s4181_s21  ;;  %s4729_s18 = scalar_lea.hbm %s6753_s2, 40960 }
  0x2d   : > { %s4724_s23 = scalar_lea.hbm %s5013_s30, 8192  ;;  %p4730_p2 = scmp.lt.s32.totalorder %s5013_s30, %s6753_s2 }
  0x2e   : > { %p4725_p4 = scmp.ne.s32.totalorder %s5013_s30, %s4724_s23  ;;  %p4731_p3 = scmp.lt.s32.totalorder %s4729_s18, %s4724_s23 }
  0x30   : > { %p4727_p9 = pnand %p5023_p5, %p4725_p4  ;;  %p4732_p6 = por %p4731_p3, %p4730_p2 }
  0x32   : > { %p4728_p13 = pneg %p4727_p9 }
  0x34   : > { %p4733_p7 = pnand %p4732_p6, %p4728_p13 }
  0x36   : > { %4736 = shalt.err (!%p4733_p7)
}
  0x37   : > { %s4737_s13 = scalar_lea.vmem %s5015_s15, 8192  ;;  %s4881_s21 = smov [#allocation6]  }
  0x38   : > { %p4738_p11 = scmp.ne.s32.totalorder %s5015_s15, %s4737_s13  ;;  %s4742_s27 = sshll.u32 %s4881_s21, 4  ;;  %s4743_s27 = int_to_ptr.vmem [resolvable:$false] %s4742_s27 }
  0x39   : > { %s4744_s28 = scalar_lea.vmem %s4743_s27, 16384  ;;  %p4745_p1 = scmp.lt.s32.totalorder %s5015_s15, %s4743_s27 }
  0x3a   : > { %p4740_p4 = pnand %p4738_p11, %p5023_p5  ;;  %p4746_p8 = scmp.lt.s32.totalorder %s4744_s28, %s4737_s13 }
  0x3c   : > { %p4741_p9 = pneg %p4740_p4  ;;  %p4747_p10 = por %p4746_p8, %p4745_p1 }
  0x3e   : > { %p4748_p12 = pnand %p4747_p10, %p4741_p9 }
  0x40   : > { %4751 = shalt.err (!%p4748_p12)
}
  0x41   : > { %s4882_s23 = smov 256   ;;  %s4883_s9 = smov 16  }
  0x42   : > { %4262 = dma.hbm_to_vmem [thread:$0]  (!%p4994_p0), %s5013_s30, 8192, %s5015_s15, %s5017_s29, %s4882_s23, %s4882_s23, %s4883_s9  }
  0x43   : > { %s4884_s16 = smov [#allocation11]   ;;  %s3936_s18 = sshll.u32 %s4989_s12, 10 }
  0x44   : > { %s219_s17 = sshll.u32 %s4884_s16, 4  ;;  %p6755_p2 = scmp.ne.s32.totalorder %s6750_s11, 0  ;;  %s220_s17 = int_to_ptr.vmem [resolvable:$true] %s219_s17 }
  0x45   : > { %s4763_s19 = scalar_lea.vmem %s220_s17, 16  ;;  %s4770_s20 = scalar_lea.vmem %s220_s17, 32 }
  0x46   : > { %p4764_p13 = scmp.ne.s32.totalorder %s220_s17, %s4763_s19  ;;  %p6756_p8 = pneg %p6755_p2 }
  0x47   : > { %p4771_p1 = scmp.lt.s32.totalorder %s220_s17, %s220_s17  ;;  %p4772_p3 = scmp.lt.s32.totalorder %s4770_s20, %s4763_s19 }
  0x48   : > { %p4766_p10 = pnand %p4764_p13, %p6756_p8 }
  0x49   : > { %p4773_p6 = por %p4772_p3, %p4771_p1 }
  0x4a   : > { %p4767_p12 = pneg %p4766_p10 }
  0x4c   : > { %p4774_p7 = pnand %p4773_p6, %p4767_p12 }
  0x4e   : > { %4777 = shalt.err (!%p4774_p7)
}
  0x4f   : > { %4255 = dma.hbm_to_vmem [thread:$0]  (!%p6755_p2), %s6643_s5, 16, %s220_s17, [#allocation10]  }
  0x50   : > { %s4180_s15 = sshll.u32 %s4876_s24, 14  ;;  %s234_s21 = scalar_lea.vmem [#allocation4], %s3936_s18 }
  0x51   : > { %s241_s27 = sshll.u32 %s234_s21, 4  ;;  %s6757_s1 = sld [smem:[#allocation105_spill]]  ;;  %s5061_s27 = int_to_ptr.vmem [resolvable:$true] %s241_s27 }
  0x52   : > { %s231_s11 = scalar_lea.sflag [#allocation5], %s4989_s12 }
  0x57   : > { %s5059_s9 = scalar_lea.hbm %s6757_s1, %s4180_s15  ;;  %s4783_s18 = scalar_lea.hbm %s6757_s1, 81920 }
  0x58   : > { %s4778_s16 = scalar_lea.hbm %s5059_s9, 16384  ;;  %p4784_p13 = scmp.lt.s32.totalorder %s5059_s9, %s6757_s1 }
  0x59   : > { %p4779_p11 = scmp.ne.s32.totalorder %s5059_s9, %s4778_s16  ;;  %p4785_p2 = scmp.lt.s32.totalorder %s4783_s18, %s4778_s16 }
  0x5b   : > { %p4781_p4 = pnand %p4779_p11, %p5023_p5  ;;  %p4786_p8 = por %p4785_p2, %p4784_p13 }
  0x5d   : > { %p4782_p9 = pneg %p4781_p4 }
  0x5f   : > { %p4787_p10 = pnand %p4786_p8, %p4782_p9 }
  0x61   : > { %4790 = shalt.err (!%p4787_p10)
}
  0x62   : > { %s4791_s30 = scalar_lea.vmem %s5061_s27, 16384  ;;  %s4885_s15 = smov [#allocation4]  }
  0x63   : > { %p4792_p12 = scmp.ne.s32.totalorder %s5061_s27, %s4791_s30  ;;  %s4796_s21 = sshll.u32 %s4885_s15, 4  ;;  %s4797_s21 = int_to_ptr.vmem [resolvable:$false] %s4796_s21 }
  0x64   : > { %s4798_s28 = scalar_lea.vmem %s4797_s21, 32768  ;;  %p4799_p6 = scmp.lt.s32.totalorder %s5061_s27, %s4797_s21 }
  0x65   : > { %p4794_p1 = pnand %p4792_p12, %p5023_p5  ;;  %p4800_p7 = scmp.lt.s32.totalorder %s4798_s28, %s4791_s30 }
  0x67   : > { %p4795_p3 = pneg %p4794_p1  ;;  %p4801_p11 = por %p4800_p7, %p4799_p6 }
  0x69   : > { %p4802_p4 = pnand %p4801_p11, %p4795_p3 }
  0x6b   : > { %4805 = shalt.err (!%p4802_p4)
}
  0x6c   : > { %s4886_s23 = smov 512   ;;  %s4887_s16 = smov 32  }
  0x6d   : > { %4259 = dma.hbm_to_vmem [thread:$0]  (!%p4994_p0), %s5059_s9, 16384, %s5061_s27, %s231_s11, %s4886_s23, %s4886_s23, %s4887_s16  }
  0x6e   : > { %s3942_s17 = sshll.u32 %s4989_s12, 3  ;;  %s4182_s19 = sshll.u32 %s4876_s24, 7 }
  0x6f   : > { %s282_s13 = scalar_lea.hbm %s6641_s3, %s4182_s19  ;;  %s276_s30 = scalar_lea.vmem [#allocation8], %s3942_s17 }
  0x70   : > { %s284_s15 = sshll.u32 %s276_s30, 4  ;;  %s4806_s21 = scalar_lea.hbm %s282_s13, 128  ;;  %s285_s15 = int_to_ptr.vmem [resolvable:$true] %s284_s15 }
  0x71   : > { %p4807_p9 = scmp.ne.s32.totalorder %s282_s13, %s4806_s21  ;;  %s4811_s2 = scalar_lea.hbm %s6641_s3, 640 }
  0x72   : > { %p4812_p8 = scmp.lt.s32.totalorder %s282_s13, %s6641_s3  ;;  %p4813_p10 = scmp.lt.s32.totalorder %s4811_s2, %s4806_s21 }
  0x73   : > { %p4809_p13 = pnand %p4807_p9, %p5023_p5 }
  0x74   : > { %p4814_p12 = por %p4813_p10, %p4812_p8 }
  0x75   : > { %p4810_p2 = pneg %p4809_p13 }
  0x77   : > { %p4815_p1 = pnand %p4814_p12, %p4810_p2 }
  0x79   : > { %4818 = shalt.err (!%p4815_p1)
}
  0x7a   : > { %s4819_s24 = scalar_lea.vmem %s285_s15, 128  ;;  %s4888_s12 = smov [#allocation8]  }
  0x7b   : > { %p4820_p3 = scmp.ne.s32.totalorder %s285_s15, %s4819_s24  ;;  %s4824_s9 = sshll.u32 %s4888_s12, 4  ;;  %s4825_s9 = int_to_ptr.vmem [resolvable:$false] %s4824_s9 }
  0x7c   : > { %s4826_s11 = scalar_lea.vmem %s4825_s9, 256  ;;  %p4827_p11 = scmp.lt.s32.totalorder %s285_s15, %s4825_s9 }
  0x7d   : > { %p4822_p6 = pnand %p4820_p3, %p5023_p5  ;;  %p4828_p4 = scmp.lt.s32.totalorder %s4826_s11, %s4819_s24 }
  0x7f   : > { %p4823_p7 = pneg %p4822_p6  ;;  %p4829_p9 = por %p4828_p4, %p4827_p11 }
  0x81   : > { %p4830_p13 = pnand %p4829_p9, %p4823_p7 }
  0x83   : > { %4833 = shalt.err (!%p4830_p13)
}
  0x84   : > { %4265 = dma.hbm_to_vmem [thread:$0]  (!%p4994_p0), %s282_s13, 128, %s285_s15, %s5017_s29  }
  0x85   : > { %p6758_p2 = scmp.ne.s32.totalorder %s6749_s8, 0 }
  0x87   : > { %293 = sbr.rel (%p6758_p2) target bundleno = 2502 (0x9c6), region = 44 }
  0x8c   : > { %s295_s1 = sand.u32 1, %s4868_s22   ;;  %p6759_p5 = scmp.ne.s32.totalorder %s6748_s7, 0 }
  0x8d   : > { %s3946_s2 = sshll.u32 %s295_s1, 10  ;;  %s296_s4 = scalar_lea.sflag [#allocation5], %s295_s1 }
  0x8e   : > { %s5107_s10 = scalar_lea.vmem [#allocation4], %s3946_s2 }
  0x8f   : > { %4851 = dma.done.wait (%p6759_p5), %s296_s4, 16384  }
  0x90   : > { %4853 = vsyncadd (%p6759_p5), %s296_s4, 4294950912  ;;  %s304_s14 = sand.u32 1, %s4946_s25   ;;  %s3947_s23 = sshll.u32 %s295_s1, 9 }
  0x91   : > { %s305_s29 = scalar_lea.sflag [#allocation7], %s304_s14  ;;  %s5114_s16 = scalar_lea.vmem [#allocation6], %s3947_s23 }
  0x92   : > { %4855 = dma.done.wait (%p6759_p5), %s305_s29, 8320  }
  0x93   : > { %4857 = vsyncadd (%p6759_p5), %s305_s29, 4294958976  ;;  %s3948_s8 = sshll.u32 %s295_s1, 3  ;;  %p6760_p0 = scmp.eq.s32.totalorder %s4946_s25, 0 }
  0x94   : > { %s5120_s17 = scalar_lea.vmem [#allocation8], %s3948_s8 }
  0x95   : > { %4859 = dma.done.wait (%p6760_p0), [#allocation10], 2064   ;;  %p6761_p8 = pmov %p6760_p0 }
  0x96   : > { %p6762_p10 = scmp.ne.s32.totalorder %s4946_s25, 0 }
  0x97   : > { %4861 = vsyncadd (%p6761_p8), [#allocation10], 4294965232 }
  0x98   : > { %363 = sbr.rel (%p6762_p10) target bundleno = 166 (0xa6), region = 68 }
  0x9d   : > { %v364_v0 = vld [vmem:[%s6638_s0] sm:$0xff]  ;;  %v365_v1 = vld [vmem:[%s6638_s0 + $0x8] sm:$0xff]  ;;  %v366_v2 = vld [vmem:[%s6638_s0 + $0x10] sm:$0xff] }
  0x9e   : > { %380 = vst [vmem:[#allocation2 + $0x30] sm:$0xff] %v364_v0  ;;  %381 = vst [vmem:[#allocation2] sm:$0xff] %v365_v1  ;;  %v367_v3 = vld [vmem:[%s6638_s0 + $0x18] sm:$0xff]  ;;  %v368_v4 = vld [vmem:[%s6638_s0 + $0x20] sm:$0xff] }
  0x9f   : > { %382 = vst [vmem:[#allocation2 + $0x58] sm:$0xff] %v366_v2  ;;  %v369_v5 = vld [vmem:[%s6638_s0 + $0x28] sm:$0xff]  ;;  %383 = vst [vmem:[#allocation2 + $0x18] sm:$0xff] %v367_v3  ;;  %v370_v6 = vld [vmem:[%s6638_s0 + $0x30] sm:$0xff] }
  0xa0   : > { %384 = vst [vmem:[#allocation2 + $0x50] sm:$0xff] %v368_v4  ;;  %385 = vst [vmem:[#allocation2 + $0x68] sm:$0xff] %v369_v5  ;;  %v371_v7 = vld [vmem:[%s6638_s0 + $0x38] sm:$0xff]  ;;  %v372_v8 = vld [vmem:[%s6638_s0 + $0x40] sm:$0xff] }
  0xa1   : > { %386 = vst [vmem:[#allocation2 + $0x8] sm:$0xff] %v370_v6  ;;  %387 = vst [vmem:[#allocation2 + $0x48] sm:$0xff] %v371_v7  ;;  %v373_v9 = vld [vmem:[%s6638_s0 + $0x48] sm:$0xff]  ;;  %v374_v10 = vld [vmem:[%s6638_s0 + $0x50] sm:$0xff] }
  0xa2   : > { %388 = vst [vmem:[#allocation2 + $0x40] sm:$0xff] %v372_v8  ;;  %v375_v11 = vld [vmem:[%s6638_s0 + $0x58] sm:$0xff]  ;;  %389 = vst [vmem:[#allocation2 + $0x20] sm:$0xff] %v373_v9  ;;  %v376_v12 = vld [vmem:[%s6638_s0 + $0x60] sm:$0xff] }
  0xa3   : > { %390 = vst [vmem:[#allocation2 + $0x10] sm:$0xff] %v374_v10  ;;  %391 = vst [vmem:[#allocation2 + $0x38] sm:$0xff] %v375_v11  ;;  %v377_v13 = vld [vmem:[%s6638_s0 + $0x68] sm:$0xff]  ;;  %v378_v14 = vld [vmem:[%s6638_s0 + $0x70] sm:$0xff] }
  0xa4   : > { %392 = vst [vmem:[#allocation2 + $0x60] sm:$0xff] %v376_v12  ;;  %393 = vst [vmem:[#allocation2 + $0x70] sm:$0xff] %v377_v13  ;;  %v379_v15 = vld [vmem:[%s6638_s0 + $0x78] sm:$0xff] }
  0xa5   : > { %394 = vst [vmem:[#allocation2 + $0x78] sm:$0xff] %v378_v14  ;;  %395 = vst [vmem:[#allocation2 + $0x28] sm:$0xff] %v379_v15 }
  0xa6 PF: > { %v476_v16 = vld [vmem:[%s5107_s10 + $0x1c0] sm:$0xff]  ;;  %v477_v18 = vld [vmem:[%s5107_s10 + $0x1c8] sm:$0xff]  ;;  %v399_v6 = vld [vmem:[#allocation2 + $0x18] sm:$0xff]  ;;  %p4176_p12 = scmp.ne.s32.totalorder %s4946_s25, 4 }
  0xa7   : > { %v480_v17 = vld [vmem:[%s5107_s10 + $0x1e0] sm:$0xff]  ;;  %v481_v20 = vld [vmem:[%s5107_s10 + $0x1e8] sm:$0xff] }
  0xa8   : > { %v4009_v19 = vcombine.high %v476_v16, %v480_v17  ;;  %v4008_v21 = vcombine.low %v476_v16, %v480_v17  ;;  %v468_v22 = vld [vmem:[%s5107_s10 + $0x180] sm:$0xff]  ;;  %v4011_v24 = vcombine.high %v477_v18, %v481_v20  ;;  %v4010_v25 = vcombine.low %v477_v18, %v481_v20  ;;  %v469_v27 = vld [vmem:[%s5107_s10 + $0x188] sm:$0xff] }
  0xa9   : > { %v472_v23 = vld [vmem:[%s5107_s10 + $0x1a0] sm:$0xff]  ;;  %v473_v28 = vld [vmem:[%s5107_s10 + $0x1a8] sm:$0xff] }
  0xaa   : > { %v4001_v26 = vcombine.high %v468_v22, %v472_v23  ;;  %v460_v29 = vld [vmem:[%s5107_s10 + $0x140] sm:$0xff]  ;;  %1230 = vmatprep.subr.bf16.mxu0 %v4009_v19  ;;  %v4003_v30 = vcombine.high %v469_v27, %v473_v28  ;;  %v461_v32 = vld [vmem:[%s5107_s10 + $0x148] sm:$0xff]  ;;  %1303 = vmatprep.subr.bf16.mxu1 %v4011_v24  ;;  %v4000_v34 = vcombine.low %v468_v22, %v472_v23 }
  0xab   : > { %v464_v31 = vld [vmem:[%s5107_s10 + $0x160] sm:$0xff]  ;;  %v465_v33 = vld [vmem:[%s5107_s10 + $0x168] sm:$0xff]  ;;  %1231 = vmatpush1.bf16.msra.mxu0 %v4008_v21  ;;  %1304 = vmatpush1.bf16.msra.mxu1 %v4010_v25  ;;  %v4002_v35 = vcombine.low %v469_v27, %v473_v28 }
  0xac   : > { %1232 = vmatprep.subr.bf16.mxu0 %v4001_v26  ;;  %v3993_v36 = vcombine.high %v460_v29, %v464_v31  ;;  %1305 = vmatprep.subr.bf16.mxu1 %v4003_v30  ;;  %v3995_v37 = vcombine.high %v461_v32, %v465_v33  ;;  %v452_v38 = vld [vmem:[%s5107_s10 + $0x100] sm:$0xff]  ;;  %v453_v40 = vld [vmem:[%s5107_s10 + $0x108] sm:$0xff]  ;;  %v3992_v42 = vcombine.low %v460_v29, %v464_v31 }
  0xad   : > { %v456_v39 = vld [vmem:[%s5107_s10 + $0x120] sm:$0xff]  ;;  %v457_v41 = vld [vmem:[%s5107_s10 + $0x128] sm:$0xff]  ;;  %v3994_v43 = vcombine.low %v461_v32, %v465_v33 }
  0xae   : > { %v3985_v44 = vcombine.high %v452_v38, %v456_v39  ;;  %v3987_v45 = vcombine.high %v453_v40, %v457_v41  ;;  %v444_v46 = vld [vmem:[%s5107_s10 + $0xc0] sm:$0xff]  ;;  %v445_v48 = vld [vmem:[%s5107_s10 + $0xc8] sm:$0xff]  ;;  %v3984_v50 = vcombine.low %v452_v38, %v456_v39  ;;  %v3986_v51 = vcombine.low %v453_v40, %v457_v41 }
  0xaf   : > { %1233 = vmatpush1.bf16.msra.mxu0 %v4000_v34  ;;  %1306 = vmatpush1.bf16.msra.mxu1 %v4002_v35  ;;  %v448_v47 = vld [vmem:[%s5107_s10 + $0xe0] sm:$0xff]  ;;  %v449_v49 = vld [vmem:[%s5107_s10 + $0xe8] sm:$0xff] }
  0xb0   : > { %1234 = vmatprep.subr.bf16.mxu0 %v3993_v36  ;;  %1307 = vmatprep.subr.bf16.mxu1 %v3995_v37  ;;  %v3977_v52 = vcombine.high %v444_v46, %v448_v47  ;;  %v3979_v53 = vcombine.high %v445_v48, %v449_v49  ;;  %v436_v54 = vld [vmem:[%s5107_s10 + $0x80] sm:$0xff]  ;;  %v437_v56 = vld [vmem:[%s5107_s10 + $0x88] sm:$0xff]  ;;  %v3976_v58 = vcombine.low %v444_v46, %v448_v47 }
  0xb1   : > { %v440_v55 = vld [vmem:[%s5107_s10 + $0xa0] sm:$0xff]  ;;  %v441_v57 = vld [vmem:[%s5107_s10 + $0xa8] sm:$0xff]  ;;  %v3978_v59 = vcombine.low %v445_v48, %v449_v49 }
  0xb2   : > { %v3969_v60 = vcombine.high %v436_v54, %v440_v55  ;;  %v3971_v61 = vcombine.high %v437_v56, %v441_v57  ;;  %v428_v62 = vld [vmem:[%s5107_s10 + $0x40] sm:$0xff]  ;;  %v429_v0 = vld [vmem:[%s5107_s10 + $0x48] sm:$0xff]  ;;  %v3968_v2 = vcombine.low %v436_v54, %v440_v55  ;;  %v3970_v3 = vcombine.low %v437_v56, %v441_v57 }
  0xb3   : > { %1235 = vmatpush1.bf16.msra.mxu0 %v3992_v42  ;;  %1308 = vmatpush1.bf16.msra.mxu1 %v3994_v43  ;;  %v432_v63 = vld [vmem:[%s5107_s10 + $0x60] sm:$0xff]  ;;  %v433_v1 = vld [vmem:[%s5107_s10 + $0x68] sm:$0xff] }
  0xb4   : > { %1236 = vmatprep.subr.bf16.mxu0 %v3985_v44  ;;  %1309 = vmatprep.subr.bf16.mxu1 %v3987_v45  ;;  %v3961_v4 = vcombine.high %v428_v62, %v432_v63  ;;  %v397_v5 = vld [vmem:[#allocation2] sm:$0xff]  ;;  %v3963_v7 = vcombine.high %v429_v0, %v433_v1  ;;  %v421_v11 = vld [vmem:[%s5107_s10 + $0x8] sm:$0xff]  ;;  %v3960_v13 = vcombine.low %v428_v62, %v432_v63 }
  0xb5   : > { %v420_v8 = vld [vmem:[%s5107_s10] sm:$0xff]  ;;  %v5206_v10 = vpack.c.bf16 %v399_v6, %v397_v5  ;;  %v425_v12 = vld [vmem:[%s5107_s10 + $0x28] sm:$0xff]  ;;  %v3962_v14 = vcombine.low %v429_v0, %v433_v1 }
  0xb6   : > { %v424_v9 = vld [vmem:[%s5107_s10 + $0x20] sm:$0xff]  ;;  %v3955_v16 = vcombine.high %v421_v11, %v425_v12  ;;  %v541_v19 = vld [vmem:[%s5107_s10 + $0x3c8] sm:$0xff]  ;;  %v3954_v22 = vcombine.low %v421_v11, %v425_v12 }
  0xb7   : > { %1237 = vmatpush1.bf16.msra.mxu0 %v3984_v50  ;;  %1310 = vmatpush1.bf16.msra.mxu1 %v3986_v51  ;;  %v3953_v15 = vcombine.high %v420_v8, %v424_v9  ;;  %v540_v17 = vld [vmem:[%s5107_s10 + $0x3c0] sm:$0xff]  ;;  %v545_v20 = vld [vmem:[%s5107_s10 + $0x3e8] sm:$0xff]  ;;  %v3952_v21 = vcombine.low %v420_v8, %v424_v9 }
  0xb8   : > { %1238 = vmatprep.subr.bf16.mxu0 %v3977_v52  ;;  %1311 = vmatprep.subr.bf16.mxu1 %v3979_v53  ;;  %v544_v18 = vld [vmem:[%s5107_s10 + $0x3e0] sm:$0xff]  ;;  %v4075_v24 = vcombine.high %v541_v19, %v545_v20  ;;  %v533_v27 = vld [vmem:[%s5107_s10 + $0x388] sm:$0xff]  ;;  %v4074_v30 = vcombine.low %v541_v19, %v545_v20  ;;  %v396_v19 = vld [vmem:[#allocation2 + $0x30] sm:$0xff] }
  0xb9   : > { %1262 = vmatprep.mubr.bf16.mxu0 %v5206_v10  ;;  %1335 = vmatprep.mubr.bf16.mxu1 %v5206_v10  ;;  %v4073_v23 = vcombine.high %v540_v17, %v544_v18  ;;  %v532_v25 = vld [vmem:[%s5107_s10 + $0x380] sm:$0xff]  ;;  %v537_v28 = vld [vmem:[%s5107_s10 + $0x3a8] sm:$0xff]  ;;  %v4072_v29 = vcombine.low %v540_v17, %v544_v18  ;;  %v478_v17 = vld [vmem:[%s5107_s10 + $0x1d0] sm:$0xff] }
  0xba   : > { %v536_v26 = vld [vmem:[%s5107_s10 + $0x3a0] sm:$0xff]  ;;  %v4067_v32 = vcombine.high %v533_v27, %v537_v28  ;;  %v525_v35 = vld [vmem:[%s5107_s10 + $0x348] sm:$0xff]  ;;  %v4066_v38 = vcombine.low %v533_v27, %v537_v28  ;;  %v482_v20 = vld [vmem:[%s5107_s10 + $0x1f0] sm:$0xff] }
  0xbb   : > { %1239 = vmatpush1.bf16.msra.mxu0 %v3976_v58  ;;  %1312 = vmatpush1.bf16.msra.mxu1 %v3978_v59  ;;  %v4065_v31 = vcombine.high %v532_v25, %v536_v26  ;;  %v524_v33 = vld [vmem:[%s5107_s10 + $0x340] sm:$0xff]  ;;  %v529_v36 = vld [vmem:[%s5107_s10 + $0x368] sm:$0xff]  ;;  %v4064_v37 = vcombine.low %v532_v25, %v536_v26  ;;  %v470_v25 = vld [vmem:[%s5107_s10 + $0x190] sm:$0xff]  ;;  %v4013_v27 = vcombine.high %v478_v17, %v482_v20 }
  0xbc   : > { %1240 = vmatprep.subr.bf16.mxu0 %v3969_v60  ;;  %1313 = vmatprep.subr.bf16.mxu1 %v3971_v61  ;;  %v528_v34 = vld [vmem:[%s5107_s10 + $0x360] sm:$0xff]  ;;  %v4059_v40 = vcombine.high %v525_v35, %v529_v36  ;;  %v517_v43 = vld [vmem:[%s5107_s10 + $0x308] sm:$0xff]  ;;  %v4058_v46 = vcombine.low %v525_v35, %v529_v36  ;;  %v474_v28 = vld [vmem:[%s5107_s10 + $0x1b0] sm:$0xff]  ;;  %v4012_v35 = vcombine.low %v478_v17, %v482_v20 }
  0xbd   : > { %v4057_v39 = vcombine.high %v524_v33, %v528_v34  ;;  %v516_v41 = vld [vmem:[%s5107_s10 + $0x300] sm:$0xff]  ;;  %v521_v44 = vld [vmem:[%s5107_s10 + $0x328] sm:$0xff]  ;;  %v4056_v45 = vcombine.low %v524_v33, %v528_v34 }
  0xbe   : > { %v520_v42 = vld [vmem:[%s5107_s10 + $0x320] sm:$0xff]  ;;  %v4051_v48 = vcombine.high %v517_v43, %v521_v44  ;;  %v509_v51 = vld [vmem:[%s5107_s10 + $0x2c8] sm:$0xff]  ;;  %v4050_v54 = vcombine.low %v517_v43, %v521_v44  ;;  %v467_v43 = vld [vmem:[%s5107_s10 + $0x178] sm:$0xff]  ;;  %v4004_v44 = vcombine.low %v470_v25, %v474_v28 }
  0xbf   : > { %1241 = vmatpush1.bf16.msra.mxu0 %v3968_v2  ;;  %1314 = vmatpush1.bf16.msra.mxu1 %v3970_v3  ;;  %v4049_v47 = vcombine.high %v516_v41, %v520_v42  ;;  %v508_v49 = vld [vmem:[%s5107_s10 + $0x2c0] sm:$0xff]  ;;  %v513_v52 = vld [vmem:[%s5107_s10 + $0x2e8] sm:$0xff]  ;;  %v4048_v53 = vcombine.low %v516_v41, %v520_v42  ;;  %v463_v41 = vld [vmem:[%s5107_s10 + $0x158] sm:$0xff] }
  0xc0   : > { %1242 = vmatprep.subr.bf16.mxu0 %v3961_v4  ;;  %1315 = vmatprep.subr.bf16.mxu1 %v3963_v7  ;;  %v512_v50 = vld [vmem:[%s5107_s10 + $0x2e0] sm:$0xff]  ;;  %v4043_v56 = vcombine.high %v509_v51, %v513_v52  ;;  %v501_v59 = vld [vmem:[%s5107_s10 + $0x288] sm:$0xff]  ;;  %v4042_v62 = vcombine.low %v509_v51, %v513_v52  ;;  %v3999_v51 = vcombine.high %v463_v41, %v467_v43  ;;  %v455_v52 = vld [vmem:[%s5107_s10 + $0x118] sm:$0xff] }
  0xc1   : > { %v4041_v55 = vcombine.high %v508_v49, %v512_v50  ;;  %v500_v57 = vld [vmem:[%s5107_s10 + $0x280] sm:$0xff]  ;;  %v505_v60 = vld [vmem:[%s5107_s10 + $0x2a8] sm:$0xff]  ;;  %v4040_v61 = vcombine.low %v508_v49, %v512_v50  ;;  %v458_v50 = vld [vmem:[%s5107_s10 + $0x130] sm:$0xff] }
  0xc2   : > { %v504_v58 = vld [vmem:[%s5107_s10 + $0x2a0] sm:$0xff]  ;;  %v4035_v1 = vcombine.high %v501_v59, %v505_v60  ;;  %v493_v3 = vld [vmem:[%s5107_s10 + $0x248] sm:$0xff]  ;;  %v4034_v6 = vcombine.low %v501_v59, %v505_v60  ;;  %v446_v60 = vld [vmem:[%s5107_s10 + $0xd0] sm:$0xff] }
  0xc3   : > { %1243 = vmatpush1.bf16.msra.mxu0 %v3960_v13  ;;  %1316 = vmatpush1.bf16.msra.mxu1 %v3962_v14  ;;  %v4033_v63 = vcombine.high %v500_v57, %v504_v58  ;;  %v492_v0 = vld [vmem:[%s5107_s10 + $0x240] sm:$0xff]  ;;  %v497_v4 = vld [vmem:[%s5107_s10 + $0x268] sm:$0xff]  ;;  %v4032_v5 = vcombine.low %v500_v57, %v504_v58  ;;  %v3998_v58 = vcombine.low %v463_v41, %v467_v43  ;;  %v542_v41 = vld [vmem:[%s5107_s10 + $0x3d0] sm:$0xff] }
  0xc4   : > { %1244 = vmatprep.subr.bf16.mxu0 %v3953_v15  ;;  %1317 = vmatprep.subr.bf16.mxu1 %v3955_v16  ;;  %v496_v2 = vld [vmem:[%s5107_s10 + $0x260] sm:$0xff]  ;;  %v4027_v9 = vcombine.high %v493_v3, %v497_v4  ;;  %v485_v12 = vld [vmem:[%s5107_s10 + $0x208] sm:$0xff]  ;;  %v4026_v15 = vcombine.low %v493_v3, %v497_v4  ;;  %v438_v3 = vld [vmem:[%s5107_s10 + $0x90] sm:$0xff] }
  0xc5   : > { %v4025_v7 = vcombine.high %v492_v0, %v496_v2  ;;  %v484_v8 = vld [vmem:[%s5107_s10 + $0x200] sm:$0xff]  ;;  %v489_v13 = vld [vmem:[%s5107_s10 + $0x228] sm:$0xff]  ;;  %v4024_v14 = vcombine.low %v492_v0, %v496_v2  ;;  %v546_v43 = vld [vmem:[%s5107_s10 + $0x3f0] sm:$0xff] }
  0xc6   : > { %v488_v11 = vld [vmem:[%s5107_s10 + $0x220] sm:$0xff]  ;;  %v4019_v18 = vcombine.high %v485_v12, %v489_v13  ;;  %v4018_v26 = vcombine.low %v485_v12, %v489_v13  ;;  %v401_v33 = vld [vmem:[#allocation2 + $0x68] sm:$0xff]  ;;  %v443_v12 = vld [vmem:[%s5107_s10 + $0xb8] sm:$0xff] }
  0xc7   : > { %1245 = vmatpush1.bf16.msra.mxu0 %v3952_v21  ;;  %1318 = vmatpush1.bf16.msra.mxu1 %v3954_v22  ;;  %v4017_v16 = vcombine.high %v484_v8, %v488_v11  ;;  %v479_v21 = vld [vmem:[%s5107_s10 + $0x1d8] sm:$0xff]  ;;  %v403_v34 = vld [vmem:[#allocation2 + $0x48] sm:$0xff]  ;;  %v404_v4 = vld [vmem:[#allocation2 + $0x40] sm:$0xff] }
  0xc8   : > { %1246 = vmatprep.subr.bf16.mxu0 %v4073_v23  ;;  %1319 = vmatprep.subr.bf16.mxu1 %v4075_v24  ;;  %v483_v22 = vld [vmem:[%s5107_s10 + $0x1f8] sm:$0xff]  ;;  %v4016_v23 = vcombine.low %v484_v8, %v488_v11  ;;  %v5257_v42 = vpack.c.bf16 %v403_v34, %v401_v33  ;;  %v442_v8 = vld [vmem:[%s5107_s10 + $0xb0] sm:$0xff] }
  0xc9   : > { %v398_v24 = vld [vmem:[#allocation2 + $0x58] sm:$0xff]  ;;  %v4014_v36 = vcombine.low %v479_v21, %v483_v22  ;;  %v426_v33 = vld [vmem:[%s5107_s10 + $0x30] sm:$0xff] }
  0xca   : > { %v439_v11 = vld [vmem:[%s5107_s10 + $0x98] sm:$0xff] }
  0xcb   : > { %1247 = vmatpush2.bf16.msra.mxu0 %v4072_v29  ;;  %1320 = vmatpush2.bf16.msra.mxu1 %v4074_v30  ;;  %v4015_v29 = vcombine.high %v479_v21, %v483_v22  ;;  %v471_v30 = vld [vmem:[%s5107_s10 + $0x198] sm:$0xff]  ;;  %v3975_v20 = vcombine.high %v439_v11, %v443_v12  ;;  %v434_v21 = vld [vmem:[%s5107_s10 + $0x70] sm:$0xff] }
  0xcc   : > { %1248 = vmatprep.subr.bf16.mxu0 %v4065_v31  ;;  %1321 = vmatprep.subr.bf16.mxu1 %v4067_v32  ;;  %v5251_v31 = vpack.c.bf16 %v398_v24, %v396_v19  ;;  %v475_v32 = vld [vmem:[%s5107_s10 + $0x1b8] sm:$0xff]  ;;  %v430_v19 = vld [vmem:[%s5107_s10 + $0x50] sm:$0xff] }
  0xcd   : > { %v431_v22 = vld [vmem:[%s5107_s10 + $0x58] sm:$0xff] }
  0xce   : > { %v435_v24 = vld [vmem:[%s5107_s10 + $0x78] sm:$0xff] }
  0xcf   : > { %1249 = vmatpush2.bf16.msra.mxu0 %v4064_v37  ;;  %1322 = vmatpush2.bf16.msra.mxu1 %v4066_v38  ;;  %v4005_v37 = vcombine.high %v470_v25, %v474_v28  ;;  %v462_v38 = vld [vmem:[%s5107_s10 + $0x150] sm:$0xff]  ;;  %v3972_v25 = vcombine.low %v438_v3, %v442_v8  ;;  %v3974_v28 = vcombine.low %v439_v11, %v443_v12  ;;  %v423_v34 = vld [vmem:[%s5107_s10 + $0x18] sm:$0xff] }
  0xd0   : > { %1250 = vmatprep.subr.bf16.mxu0 %v4057_v39  ;;  %1323 = vmatprep.subr.bf16.mxu1 %v4059_v40  ;;  %v4007_v39 = vcombine.high %v471_v30, %v475_v32  ;;  %v466_v40 = vld [vmem:[%s5107_s10 + $0x170] sm:$0xff] }
  0xd1   : > { %v3997_v49 = vcombine.high %v462_v38, %v466_v40  ;;  %v3996_v57 = vcombine.low %v462_v38, %v466_v40  ;;  %v3966_v38 = vcombine.low %v431_v22, %v435_v24  ;;  %v510_v12 = vld [vmem:[%s5107_s10 + $0x2d0] sm:$0xff] }
  0xd3   : > { %1251 = vmatpush2.bf16.msra.mxu0 %v4056_v45  ;;  %1324 = vmatpush2.bf16.msra.mxu1 %v4058_v46  ;;  %v454_v45 = vld [vmem:[%s5107_s10 + $0x110] sm:$0xff] }
  0xd4   : > { %1252 = vmatprep.subr.bf16.mxu0 %v4049_v47  ;;  %1325 = vmatprep.subr.bf16.mxu1 %v4051_v48  ;;  %v400_v46 = vld [vmem:[#allocation2 + $0x50] sm:$0xff]  ;;  %v402_v47 = vld [vmem:[#allocation2 + $0x8] sm:$0xff]  ;;  %v4006_v48 = vcombine.low %v471_v30, %v475_v32  ;;  %v3989_v59 = vcombine.high %v454_v45, %v458_v50  ;;  %v3988_v2 = vcombine.low %v454_v45, %v458_v50  ;;  %v547_v45 = vld [vmem:[%s5107_s10 + $0x3f8] sm:$0xff] }
  0xd5   : > { %v422_v30 = vld [vmem:[%s5107_s10 + $0x10] sm:$0xff]  ;;  %v3967_v32 = vcombine.high %v431_v22, %v435_v24  ;;  %v503_v24 = vld [vmem:[%s5107_s10 + $0x298] sm:$0xff] }
  0xd6   : > { %v534_v50 = vld [vmem:[%s5107_s10 + $0x390] sm:$0xff] }
  0xd7   : > { %1253 = vmatpush2.bf16.msra.mxu0 %v4048_v53  ;;  %1326 = vmatpush2.bf16.msra.mxu1 %v4050_v54  ;;  %v459_v53 = vld [vmem:[%s5107_s10 + $0x138] sm:$0xff]  ;;  %v5267_v54 = vpack.c.bf16 %v402_v47, %v400_v46  ;;  %v3956_v46 = vcombine.low %v422_v30, %v426_v33  ;;  %v506_v22 = vld [vmem:[%s5107_s10 + $0x2b0] sm:$0xff] }
  0xd8   : > { %1254 = vmatprep.subr.bf16.mxu0 %v4041_v55  ;;  %1327 = vmatprep.subr.bf16.mxu1 %v4043_v56  ;;  %v405_v55 = vld [vmem:[#allocation2 + $0x20] sm:$0xff]  ;;  %v407_v56 = vld [vmem:[#allocation2 + $0x38] sm:$0xff] }
  0xd9   : > { %v5273_v0 = vpack.c.bf16 %v407_v56, %v405_v55  ;;  %v4076_v55 = vcombine.low %v542_v41, %v546_v43 }
  0xdb   : > { %1255 = vmatpush2.bf16.msra.mxu0 %v4040_v61  ;;  %1328 = vmatpush2.bf16.msra.mxu1 %v4042_v62  ;;  %v3991_v61 = vcombine.high %v455_v52, %v459_v53  ;;  %v450_v62 = vld [vmem:[%s5107_s10 + $0xf0] sm:$0xff] }
  0xdc   : > { %1256 = vmatprep.subr.bf16.mxu0 %v4033_v63  ;;  %1329 = vmatprep.subr.bf16.mxu1 %v4035_v1  ;;  %v447_v63 = vld [vmem:[%s5107_s10 + $0xd8] sm:$0xff] }
  0xdd   : > { %v451_v1 = vld [vmem:[%s5107_s10 + $0xf8] sm:$0xff] }
  0xde   : > { %v3982_v17 = vcombine.low %v447_v63, %v451_v1 }
  0xdf   : > { %1257 = vmatpush2.bf16.msra.mxu0 %v4032_v5  ;;  %1330 = vmatpush2.bf16.msra.mxu1 %v4034_v6  ;;  %v406_v5 = vld [vmem:[#allocation2 + $0x10] sm:$0xff]  ;;  %v3990_v6 = vcombine.low %v455_v52, %v459_v53  ;;  %v535_v52 = vld [vmem:[%s5107_s10 + $0x398] sm:$0xff] }
  0xe0   : > { %1258 = vmatprep.subr.bf16.mxu0 %v4025_v7  ;;  %1331 = vmatprep.subr.bf16.mxu1 %v4027_v9  ;;  %v3981_v7 = vcombine.high %v446_v60, %v450_v62  ;;  %v3983_v9 = vcombine.high %v447_v63, %v451_v1  ;;  %v5283_v13 = vpack.c.bf16 %v406_v5, %v404_v4  ;;  %v539_v53 = vld [vmem:[%s5107_s10 + $0x3b8] sm:$0xff]  ;;  %v522_v4 = vld [vmem:[%s5107_s10 + $0x330] sm:$0xff] }
  0xe1   : > { %v519_v5 = vld [vmem:[%s5107_s10 + $0x318] sm:$0xff] }
  0xe3   : > { %1259 = vmatpush2.bf16.msra.mxu0 %v4024_v14  ;;  %1332 = vmatpush2.bf16.msra.mxu1 %v4026_v15  ;;  %v409_v14 = vld [vmem:[#allocation2 + $0x70] sm:$0xff]  ;;  %v411_v15 = vld [vmem:[#allocation2 + $0x28] sm:$0xff] }
  0xe4   : > { %1260 = vmatprep.subr.bf16.mxu0 %v4017_v16  ;;  %1333 = vmatprep.subr.bf16.mxu1 %v4019_v18  ;;  %v3980_v16 = vcombine.low %v446_v60, %v450_v62  ;;  %v3973_v18 = vcombine.high %v438_v3, %v442_v8  ;;  %v530_v60 = vld [vmem:[%s5107_s10 + $0x370] sm:$0xff]  ;;  %v531_v62 = vld [vmem:[%s5107_s10 + $0x378] sm:$0xff] }
  0xe5   : > { %v518_v3 = vld [vmem:[%s5107_s10 + $0x310] sm:$0xff] }
  0xe7   : > { %1261 = vmatpush2.bf16.msra.mxu0 %v4016_v23  ;;  %1334 = vmatpush2.bf16.msra.mxu1 %v4018_v26  ;;  %v5289_v23 = vpack.c.bf16 %v411_v15, %v409_v14  ;;  %v408_v26 = vld [vmem:[#allocation2 + $0x60] sm:$0xff]  ;;  %v514_v14 = vld [vmem:[%s5107_s10 + $0x2f0] sm:$0xff]  ;;  %v511_v15 = vld [vmem:[%s5107_s10 + $0x2d8] sm:$0xff] }
  0xe8   : > { %1376 = vmatprep.subr.bf16.mxu0 %v4013_v27  ;;  %1449 = vmatprep.subr.bf16.mxu1 %v4015_v29  ;;  %v410_v27 = vld [vmem:[#allocation2 + $0x78] sm:$0xff]  ;;  %v3965_v29 = vcombine.high %v430_v19, %v434_v21 }
  0xea   : > { %1263 = vmatmul.mubr.bf16.vlgmr.msra.gmra.mxu0 %v5251_v31  ;;  %1336 = vmatmul.mubr.bf16.vlgmr.msra.gmra.mxu1 %v5251_v31 }
  0xeb   : > { %1377 = vmatpush1.bf16.msra.mxu0 %v4012_v35  ;;  %1450 = vmatpush1.bf16.msra.mxu1 %v4014_v36  ;;  %v427_v35 = vld [vmem:[%s5107_s10 + $0x38] sm:$0xff]  ;;  %v5299_v36 = vpack.c.bf16 %v410_v27, %v408_v26  ;;  %v4044_v26 = vcombine.low %v510_v12, %v514_v14 }
  0xec   : > { %1378 = vmatprep.subr.bf16.mxu0 %v4005_v37  ;;  %1451 = vmatprep.subr.bf16.mxu1 %v4007_v39  ;;  %v3964_v37 = vcombine.low %v430_v19, %v434_v21  ;;  %v3957_v39 = vcombine.high %v422_v30, %v426_v33  ;;  %v3959_v40 = vcombine.high %v423_v34, %v427_v35  ;;  %v502_v21 = vld [vmem:[%s5107_s10 + $0x290] sm:$0xff]  ;;  %v495_v33 = vld [vmem:[%s5107_s10 + $0x258] sm:$0xff] }
  0xed   : > { %1272 = vmatprep.mubr.bf16.mxu0 %v5257_v42  ;;  %1345 = vmatprep.mubr.bf16.mxu1 %v5257_v42  ;;  %v3958_v47 = vcombine.low %v423_v34, %v427_v35  ;;  %v4045_v19 = vcombine.high %v510_v12, %v514_v14  ;;  %v494_v30 = vld [vmem:[%s5107_s10 + $0x250] sm:$0xff]  ;;  %v499_v34 = vld [vmem:[%s5107_s10 + $0x278] sm:$0xff]  ;;  %v4036_v35 = vcombine.low %v502_v21, %v506_v22 }
  0xee   : > { %v5460_v12 = vld [vmem:[%s5114_s16 + $0x4] ss:$16 sps:$4 sm:$0xff]   ;;  %v5464_v14 = vld [vmem:[%s5114_s16 + $0xc] ss:$16 sps:$4 sm:$0xff]  }
  0xef   : > { %1379 = vmatpush1.bf16.msra.mxu0 %v4004_v44  ;;  %1452 = vmatpush1.bf16.msra.mxu1 %v4006_v48  ;;  %v543_v44 = vld [vmem:[%s5107_s10 + $0x3d8] sm:$0xff]  ;;  %v4077_v48 = vcombine.high %v542_v41, %v546_v43  ;;  %v490_v41 = vld [vmem:[%s5107_s10 + $0x230] sm:$0xff]  ;;  %6788 = vst [vmem:[#allocation42_spill] sm:$0xff] %v5460_v12  ;;  %6789 = vst [vmem:[#allocation43_spill] sm:$0xff] %v5464_v14 }
  0xf0   : > { %1380 = vmatprep.subr.bf16.mxu0 %v3997_v49  ;;  %1453 = vmatprep.subr.bf16.mxu1 %v3999_v51  ;;  %v4079_v49 = vcombine.high %v543_v44, %v547_v45  ;;  %v538_v51 = vld [vmem:[%s5107_s10 + $0x3b0] sm:$0xff]  ;;  %v4078_v56 = vcombine.low %v543_v44, %v547_v45  ;;  %v487_v43 = vld [vmem:[%s5107_s10 + $0x218] sm:$0xff] }
  0xf1   : > { %v4068_v63 = vcombine.low %v534_v50, %v538_v51  ;;  %v491_v44 = vld [vmem:[%s5107_s10 + $0x238] sm:$0xff] }
  0xf2   : > { %1273 = vmatmul.mubr.bf16.gmra.mxu0 %v5267_v54  ;;  %1346 = vmatmul.mubr.bf16.gmra.mxu1 %v5267_v54 }
  0xf3   : > { %1381 = vmatpush1.bf16.msra.mxu0 %v3996_v57  ;;  %1454 = vmatpush1.bf16.msra.mxu1 %v3998_v58  ;;  %v4069_v57 = vcombine.high %v534_v50, %v538_v51  ;;  %v4071_v58 = vcombine.high %v535_v52, %v539_v53  ;;  %v4022_v50 = vcombine.low %v487_v43, %v491_v44  ;;  %v5339_v51 = vld [vmem:[%s5114_s16 + $0xe4] ss:$16 sps:$4 sm:$0xff]  }
  0xf4   : > { %1382 = vmatprep.subr.bf16.mxu0 %v3989_v59  ;;  %1455 = vmatprep.subr.bf16.mxu1 %v3991_v61  ;;  %v526_v59 = vld [vmem:[%s5107_s10 + $0x350] sm:$0xff]  ;;  %v527_v61 = vld [vmem:[%s5107_s10 + $0x358] sm:$0xff] }
  0xf5   : > { %1282 = vmatprep.mubr.bf16.mxu0 %v5273_v0  ;;  %1355 = vmatprep.mubr.bf16.mxu1 %v5273_v0  ;;  %v4061_v1 = vcombine.high %v526_v59, %v530_v60  ;;  %v4062_v8 = vcombine.low %v527_v61, %v531_v62 }
  0xf7   : > { %1383 = vmatpush1.bf16.msra.mxu0 %v3988_v2  ;;  %1456 = vmatpush1.bf16.msra.mxu1 %v3990_v6  ;;  %v4063_v2 = vcombine.high %v527_v61, %v531_v62  ;;  %v523_v6 = vld [vmem:[%s5107_s10 + $0x338] sm:$0xff]  ;;  %v5380_v61 = vld [vmem:[%s5114_s16 + $0xa0] ss:$16 sps:$4 sm:$0xff]  }
  0xf8   : > { %1384 = vmatprep.subr.bf16.mxu0 %v3981_v7  ;;  %1457 = vmatprep.subr.bf16.mxu1 %v3983_v9  ;;  %v4060_v7 = vcombine.low %v526_v59, %v530_v60  ;;  %v4053_v9 = vcombine.high %v518_v3, %v522_v4  ;;  %v4055_v11 = vcombine.high %v519_v5, %v523_v6  ;;  %v5367_v59 = vld [vmem:[%s5114_s16 + $0xc8] ss:$16 sps:$4 sm:$0xff]   ;;  %v5370_v60 = vld [vmem:[%s5114_s16 + $0xa4] ss:$16 sps:$4 sm:$0xff]  }
  0xf9   : > { %6767 = vst [vmem:[#allocation21_spill] sm:$0xff] %v5367_v59  ;;  %6768 = vst [vmem:[#allocation22_spill] sm:$0xff] %v5370_v60  ;;  %v5385_v62 = vld [vmem:[%s5114_s16 + $0xa8] ss:$16 sps:$4 sm:$0xff]  }
  0xfa   : > { %1283 = vmatmul.mubr.bf16.gmra.mxu0 %v5283_v13  ;;  %1356 = vmatmul.mubr.bf16.gmra.mxu1 %v5283_v13  ;;  %6770 = vst [vmem:[#allocation24_spill] sm:$0xff] %v5380_v61  ;;  %6771 = vst [vmem:[#allocation25_spill] sm:$0xff] %v5385_v62 }
  0xfb   : > { %1385 = vmatpush1.bf16.msra.mxu0 %v3980_v16  ;;  %1458 = vmatpush1.bf16.msra.mxu1 %v3982_v17  ;;  %v515_v16 = vld [vmem:[%s5107_s10 + $0x2f8] sm:$0xff]  ;;  %v4052_v17 = vcombine.low %v518_v3, %v522_v4  ;;  %v5416_v3 = vld [vmem:[%s5114_s16 + $0x60] ss:$16 sps:$4 sm:$0xff]  }
  0xfc   : > { %1386 = vmatprep.subr.bf16.mxu0 %v3973_v18  ;;  %1459 = vmatprep.subr.bf16.mxu1 %v3975_v20  ;;  %v4054_v18 = vcombine.low %v519_v5, %v523_v6  ;;  %v4047_v20 = vcombine.high %v511_v15, %v515_v16  ;;  %v4046_v27 = vcombine.low %v511_v15, %v515_v16  ;;  %v5421_v4 = vld [vmem:[%s5114_s16 + $0x68] ss:$16 sps:$4 sm:$0xff]   ;;  %v5424_v5 = vld [vmem:[%s5114_s16 + $0x44] ss:$16 sps:$4 sm:$0xff]   ;;  %v5428_v6 = vld [vmem:[%s5114_s16 + $0x4c] ss:$16 sps:$4 sm:$0xff]  }
  0xfd   : > { %1292 = vmatprep.mubr.bf16.mxu0 %v5289_v23  ;;  %1365 = vmatprep.mubr.bf16.mxu1 %v5289_v23  ;;  %6778 = vst [vmem:[#allocation32_spill] sm:$0xff] %v5416_v3  ;;  %6779 = vst [vmem:[#allocation33_spill] sm:$0xff] %v5421_v4  ;;  %v5475_v15 = vld [vmem:[%s5114_s16 + $0x8] ss:$16 sps:$4 sm:$0xff]   ;;  %v5478_v16 = vld [vmem:[%s5114_s16 + $0x1e4] ss:$16 sps:$4 sm:$0xff]  }
  0xfe   : > { %6780 = vst [vmem:[#allocation34_spill] sm:$0xff] %v5424_v5  ;;  %6781 = vst [vmem:[#allocation35_spill] sm:$0xff] %v5428_v6 }
  0xff   : > { %1387 = vmatpush1.bf16.msra.mxu0 %v3972_v25  ;;  %1460 = vmatpush1.bf16.msra.mxu1 %v3974_v28  ;;  %v507_v25 = vld [vmem:[%s5107_s10 + $0x2b8] sm:$0xff]  ;;  %v4037_v28 = vcombine.high %v502_v21, %v506_v22  ;;  %6791 = vst [vmem:[#allocation45_spill] sm:$0xff] %v5475_v15  ;;  %6792 = vst [vmem:[#allocation46_spill] sm:$0xff] %v5478_v16  ;;  %v5506_v22 = vld [vmem:[%s5114_s16 + $0x1c0] ss:$16 sps:$4 sm:$0xff]  }
 0x100   : > { %1388 = vmatprep.subr.bf16.mxu0 %v3965_v29  ;;  %1461 = vmatprep.subr.bf16.mxu1 %v3967_v32  ;;  %v4039_v29 = vcombine.high %v503_v24, %v507_v25  ;;  %v498_v32 = vld [vmem:[%s5107_s10 + $0x270] sm:$0xff]  ;;  %v5500_v21 = vld [vmem:[%s5114_s16 + $0x1cc] ss:$16 sps:$4 sm:$0xff]  }
 0x101   : > { %v4028_v45 = vcombine.low %v494_v30, %v498_v32 }
 0x102   : > { %1293 = vmatmul.mubr.bf16.gmra.mxu0 %v5299_v36  ;;  %1366 = vmatmul.mubr.bf16.gmra.mxu1 %v5299_v36 }
 0x103   : > { %1389 = vmatpush1.bf16.msra.mxu0 %v3964_v37  ;;  %1462 = vmatpush1.bf16.msra.mxu1 %v3966_v38  ;;  %v4038_v37 = vcombine.low %v503_v24, %v507_v25  ;;  %v4029_v38 = vcombine.high %v494_v30, %v498_v32  ;;  %v5511_v24 = vld [vmem:[%s5114_s16 + $0x1c8] ss:$16 sps:$4 sm:$0xff]   ;;  %v5514_v25 = vld [vmem:[%s5114_s16 + $0x1a4] ss:$16 sps:$4 sm:$0xff]   ;;  %v5536_v30 = vld [vmem:[%s5114_s16 + $0x18c] ss:$16 sps:$4 sm:$0xff]  }
 0x104   : > { %1390 = vmatprep.subr.bf16.mxu0 %v3957_v39  ;;  %1463 = vmatprep.subr.bf16.mxu1 %v3959_v40  ;;  %v4031_v39 = vcombine.high %v495_v33, %v499_v34  ;;  %v486_v40 = vld [vmem:[%s5107_s10 + $0x210] sm:$0xff] }
 0x105   : > { %1408 = vmatprep.mubr.bf16.mxu0 %v5206_v10  ;;  %1481 = vmatprep.mubr.bf16.mxu1 %v5206_v10  ;;  %v4070_v10 = vcombine.low %v535_v52, %v539_v53  ;;  %v5342_v52 = vld [vmem:[%s5114_s16 + $0xec] ss:$16 sps:$4 sm:$0xff]   ;;  %v5345_v53 = vld [vmem:[%s5114_s16 + $0xe0] ss:$16 sps:$4 sm:$0xff]  }
 0x106   : > { %v5540_v32 = vld [vmem:[%s5114_s16 + $0x180] ss:$16 sps:$4 sm:$0xff]  }
 0x107   : > { %1391 = vmatpush1.bf16.msra.mxu0 %v3956_v46  ;;  %1464 = vmatpush1.bf16.msra.mxu1 %v3958_v47  ;;  %v4030_v46 = vcombine.low %v495_v33, %v499_v34  ;;  %v4021_v47 = vcombine.high %v486_v40, %v490_v41  ;;  %v5545_v33 = vld [vmem:[%s5114_s16 + $0x188] ss:$16 sps:$4 sm:$0xff]   ;;  %v5548_v34 = vld [vmem:[%s5114_s16 + $0x164] ss:$16 sps:$4 sm:$0xff]  }
 0x108   : > { %1392 = vmatprep.subr.bf16.mxu0 %v4077_v48  ;;  %1465 = vmatprep.subr.bf16.mxu1 %v4079_v49  ;;  %v4023_v48 = vcombine.high %v487_v43, %v491_v44  ;;  %v4020_v49 = vcombine.low %v486_v40, %v490_v41  ;;  %v5568_v40 = vld [vmem:[%s5114_s16 + $0x14c] ss:$16 sps:$4 sm:$0xff]   ;;  %v5572_v41 = vld [vmem:[%s5114_s16 + $0x140] ss:$16 sps:$4 sm:$0xff]   ;;  %v5577_v43 = vld [vmem:[%s5114_s16 + $0x148] ss:$16 sps:$4 sm:$0xff]  }
 0x109   : > { %v5580_v44 = vld [vmem:[%s5114_s16 + $0x124] ss:$16 sps:$4 sm:$0xff]  }
 0x10b   : > { %1393 = vmatpush2.bf16.msra.mxu0 %v4076_v55  ;;  %1466 = vmatpush2.bf16.msra.mxu1 %v4078_v56  ;;  %v5349_v55 = vld [vmem:[%s5114_s16 + $0xe8] ss:$16 sps:$4 sm:$0xff]   ;;  %v5352_v56 = vld [vmem:[%s5114_s16 + $0xc4] ss:$16 sps:$4 sm:$0xff]  }
 0x10c   : > { %1394 = vmatprep.subr.bf16.mxu0 %v4069_v57  ;;  %1467 = vmatprep.subr.bf16.mxu1 %v4071_v58  ;;  %6763 = vst [vmem:[#allocation17_spill] sm:$0xff] %v5349_v55  ;;  %6764 = vst [vmem:[#allocation18_spill] sm:$0xff] %v5352_v56  ;;  %v5356_v57 = vld [vmem:[%s5114_s16 + $0xcc] ss:$16 sps:$4 sm:$0xff]   ;;  %v5362_v58 = vld [vmem:[%s5114_s16 + $0xc0] ss:$16 sps:$4 sm:$0xff]  }
 0x10d   : > { %6765 = vst [vmem:[#allocation19_spill] sm:$0xff] %v5356_v57  ;;  %6766 = vst [vmem:[#allocation20_spill] sm:$0xff] %v5362_v58 }
 0x10f   : > { %1395 = vmatpush2.bf16.msra.mxu0 %v4068_v63  ;;  %1468 = vmatpush2.bf16.msra.mxu1 %v4070_v10  ;;  %v5388_v63 = vld [vmem:[%s5114_s16 + $0x84] ss:$16 sps:$4 sm:$0xff]   ;;  %v5392_v10 = vld [vmem:[%s5114_s16 + $0x8c] ss:$16 sps:$4 sm:$0xff]  }
 0x110   : > { %1396 = vmatprep.subr.bf16.mxu0 %v4061_v1  ;;  %1469 = vmatprep.subr.bf16.mxu1 %v4063_v2  ;;  %6772 = vst [vmem:[#allocation26_spill] sm:$0xff] %v5388_v63  ;;  %6773 = vst [vmem:[#allocation27_spill] sm:$0xff] %v5392_v10  ;;  %v5403_v1 = vld [vmem:[%s5114_s16 + $0x88] ss:$16 sps:$4 sm:$0xff]   ;;  %v5406_v2 = vld [vmem:[%s5114_s16 + $0x64] ss:$16 sps:$4 sm:$0xff]  }
 0x111   : > { %6775 = vst [vmem:[#allocation29_spill] sm:$0xff] %v5403_v1  ;;  %6776 = vst [vmem:[#allocation30_spill] sm:$0xff] %v5406_v2 }
 0x113   : > { %1397 = vmatpush2.bf16.msra.mxu0 %v4060_v7  ;;  %1470 = vmatpush2.bf16.msra.mxu1 %v4062_v8  ;;  %v5439_v7 = vld [vmem:[%s5114_s16 + $0x48] ss:$16 sps:$4 sm:$0xff]   ;;  %v5442_v8 = vld [vmem:[%s5114_s16 + $0x24] ss:$16 sps:$4 sm:$0xff]  }
 0x114   : > { %1398 = vmatprep.subr.bf16.mxu0 %v4053_v9  ;;  %1471 = vmatprep.subr.bf16.mxu1 %v4055_v11  ;;  %6783 = vst [vmem:[#allocation37_spill] sm:$0xff] %v5439_v7  ;;  %6784 = vst [vmem:[#allocation38_spill] sm:$0xff] %v5442_v8  ;;  %v5452_v9 = vld [vmem:[%s5114_s16 + $0x20] ss:$16 sps:$4 sm:$0xff]   ;;  %v5457_v11 = vld [vmem:[%s5114_s16 + $0x28] ss:$16 sps:$4 sm:$0xff]  }
 0x115   : > { %6786 = vst [vmem:[#allocation40_spill] sm:$0xff] %v5452_v9  ;;  %6787 = vst [vmem:[#allocation41_spill] sm:$0xff] %v5457_v11 }
 0x117   : > { %1399 = vmatpush2.bf16.msra.mxu0 %v4052_v17  ;;  %1472 = vmatpush2.bf16.msra.mxu1 %v4054_v18  ;;  %v6652_v17 = vmov 0   ;;  %v5488_v18 = vld [vmem:[%s5114_s16 + $0x1e0] ss:$16 sps:$4 sm:$0xff]  }
 0x118   : > { %1400 = vmatprep.subr.bf16.mxu0 %v4045_v19  ;;  %1473 = vmatprep.subr.bf16.mxu1 %v4047_v20  ;;  %v5493_v19 = vld [vmem:[%s5114_s16 + $0x1e8] ss:$16 sps:$4 sm:$0xff]   ;;  %v5496_v20 = vld [vmem:[%s5114_s16 + $0x1c4] ss:$16 sps:$4 sm:$0xff]  }
 0x11b   : > { %1401 = vmatpush2.bf16.msra.mxu0 %v4044_v26  ;;  %1474 = vmatpush2.bf16.msra.mxu1 %v4046_v27  ;;  %v5518_v26 = vld [vmem:[%s5114_s16 + $0x1ac] ss:$16 sps:$4 sm:$0xff]   ;;  %v5524_v27 = vld [vmem:[%s5114_s16 + $0x1a0] ss:$16 sps:$4 sm:$0xff]  }
 0x11c   : > { %1402 = vmatprep.subr.bf16.mxu0 %v4037_v28  ;;  %1475 = vmatprep.subr.bf16.mxu1 %v4039_v29  ;;  %v5529_v28 = vld [vmem:[%s5114_s16 + $0x1a8] ss:$16 sps:$4 sm:$0xff]   ;;  %v5532_v29 = vld [vmem:[%s5114_s16 + $0x184] ss:$16 sps:$4 sm:$0xff]  }
 0x11f   : > { %1403 = vmatpush2.bf16.msra.mxu0 %v4036_v35  ;;  %1476 = vmatpush2.bf16.msra.mxu1 %v4038_v37  ;;  %v5552_v35 = vld [vmem:[%s5114_s16 + $0x16c] ss:$16 sps:$4 sm:$0xff]   ;;  %v5556_v37 = vld [vmem:[%s5114_s16 + $0x160] ss:$16 sps:$4 sm:$0xff]  }
 0x120   : > { %1404 = vmatprep.subr.bf16.mxu0 %v4029_v38  ;;  %1477 = vmatprep.subr.bf16.mxu1 %v4031_v39  ;;  %v5561_v38 = vld [vmem:[%s5114_s16 + $0x168] ss:$16 sps:$4 sm:$0xff]   ;;  %v5564_v39 = vld [vmem:[%s5114_s16 + $0x144] ss:$16 sps:$4 sm:$0xff]  }
 0x123   : > { %1405 = vmatpush2.bf16.msra.mxu0 %v4028_v45  ;;  %1478 = vmatpush2.bf16.msra.mxu1 %v4030_v46  ;;  %v5584_v45 = vld [vmem:[%s5114_s16 + $0x12c] ss:$16 sps:$4 sm:$0xff]   ;;  %v5588_v46 = vld [vmem:[%s5114_s16 + $0x120] ss:$16 sps:$4 sm:$0xff]  }
 0x124   : > { %1406 = vmatprep.subr.bf16.mxu0 %v4021_v47  ;;  %1479 = vmatprep.subr.bf16.mxu1 %v4023_v48  ;;  %6794 = vst [vmem:[#allocation48_spill] sm:$0xff] %v5584_v45  ;;  %v5593_v47 = vld [vmem:[%s5114_s16 + $0x128] ss:$16 sps:$4 sm:$0xff]   ;;  %v5596_v48 = vld [vmem:[%s5114_s16 + $0x104] ss:$16 sps:$4 sm:$0xff]  }
 0x127   : > { %1407 = vmatpush2.bf16.msra.mxu0 %v4020_v49  ;;  %1480 = vmatpush2.bf16.msra.mxu1 %v4022_v50  ;;  %v5600_v49 = vld [vmem:[%s5114_s16 + $0x10c] ss:$16 sps:$4 sm:$0xff]   ;;  %v5604_v50 = vld [vmem:[%s5114_s16 + $0x100] ss:$16 sps:$4 sm:$0xff]  }
 0x128   : > { %1815 = vmatprep.subr.bf16.mxu0 %v5339_v51  ;;  %1856 = vmatprep.subr.bf16.mxu1 %v5342_v52 }
 0x12a   : > { %1409 = vmatmul.mubr.bf16.vlgmr.msra.gmra.mxu0 %v5251_v31  ;;  %1482 = vmatmul.mubr.bf16.vlgmr.msra.gmra.mxu1 %v5251_v31  ;;  %v5375_v31 = vld [vmem:[%s5114_s16 + $0xac] ss:$16 sps:$4 sm:$0xff]  }
 0x12b   : > { %1816 = vmatpush1.bf16.msra.mxu0 %v5345_v53  ;;  %1857 = vmatpush1.bf16.msra.mxu1 %v5349_v55  ;;  %6769 = vst [vmem:[#allocation23_spill] sm:$0xff] %v5375_v31 }
 0x12c   : > { %1817 = vmatprep.subr.bf16.mxu0 %v5352_v56  ;;  %1858 = vmatprep.subr.bf16.mxu1 %v5356_v57 }
 0x12d   : > { %1418 = vmatprep.mubr.bf16.mxu0 %v5257_v42  ;;  %1491 = vmatprep.mubr.bf16.mxu1 %v5257_v42  ;;  %v5398_v42 = vld [vmem:[%s5114_s16 + $0x80] ss:$16 sps:$4 sm:$0xff]  }
 0x12e   : > { %6774 = vst [vmem:[#allocation28_spill] sm:$0xff] %v5398_v42 }
 0x12f   : > { %1818 = vmatpush1.bf16.msra.mxu0 %v5362_v58  ;;  %1859 = vmatpush1.bf16.msra.mxu1 %v5367_v59 }
 0x130   : > { %1819 = vmatprep.subr.bf16.mxu0 %v5370_v60  ;;  %1860 = vmatprep.subr.bf16.mxu1 %v5375_v31 }
 0x132   : > { %1419 = vmatmul.mubr.bf16.gmra.mxu0 %v5267_v54  ;;  %1492 = vmatmul.mubr.bf16.gmra.mxu1 %v5267_v54  ;;  %v5411_v54 = vld [vmem:[%s5114_s16 + $0x6c] ss:$16 sps:$4 sm:$0xff]  }
 0x133   : > { %1820 = vmatpush1.bf16.msra.mxu0 %v5380_v61  ;;  %1861 = vmatpush1.bf16.msra.mxu1 %v5385_v62  ;;  %6777 = vst [vmem:[#allocation31_spill] sm:$0xff] %v5411_v54 }
 0x134   : > { %1821 = vmatprep.subr.bf16.mxu0 %v5388_v63  ;;  %1862 = vmatprep.subr.bf16.mxu1 %v5392_v10 }
 0x135   : > { %1428 = vmatprep.mubr.bf16.mxu0 %v5273_v0  ;;  %1501 = vmatprep.mubr.bf16.mxu1 %v5273_v0  ;;  %v5434_v0 = vld [vmem:[%s5114_s16 + $0x40] ss:$16 sps:$4 sm:$0xff]  }
 0x136   : > { %6782 = vst [vmem:[#allocation36_spill] sm:$0xff] %v5434_v0 }
 0x137   : > { %1822 = vmatpush1.bf16.msra.mxu0 %v5398_v42  ;;  %1863 = vmatpush1.bf16.msra.mxu1 %v5403_v1 }
 0x138   : > { %1823 = vmatprep.subr.bf16.mxu0 %v5406_v2  ;;  %1864 = vmatprep.subr.bf16.mxu1 %v5411_v54 }
 0x13a   : > { %1429 = vmatmul.mubr.bf16.gmra.mxu0 %v5283_v13  ;;  %1502 = vmatmul.mubr.bf16.gmra.mxu1 %v5283_v13  ;;  %v5447_v13 = vld [vmem:[%s5114_s16 + $0x2c] ss:$16 sps:$4 sm:$0xff]  }
 0x13b   : > { %1824 = vmatpush1.bf16.msra.mxu0 %v5416_v3  ;;  %1865 = vmatpush1.bf16.msra.mxu1 %v5421_v4  ;;  %6785 = vst [vmem:[#allocation39_spill] sm:$0xff] %v5447_v13 }
 0x13c   : > { %1825 = vmatprep.subr.bf16.mxu0 %v5424_v5  ;;  %1866 = vmatprep.subr.bf16.mxu1 %v5428_v6 }
 0x13d   : > { %1438 = vmatprep.mubr.bf16.mxu0 %v5289_v23  ;;  %1511 = vmatprep.mubr.bf16.mxu1 %v5289_v23  ;;  %v5470_v23 = vld [vmem:[%s5114_s16] ss:$16 sps:$4 sm:$0xff]  }
 0x13e   : > { %6790 = vst [vmem:[#allocation44_spill] sm:$0xff] %v5470_v23 }
 0x13f   : > { %1826 = vmatpush1.bf16.msra.mxu0 %v5434_v0  ;;  %1867 = vmatpush1.bf16.msra.mxu1 %v5439_v7 }
 0x140   : > { %1827 = vmatprep.subr.bf16.mxu0 %v5442_v8  ;;  %1868 = vmatprep.subr.bf16.mxu1 %v5447_v13 }
 0x142   : > { %1439 = vmatmul.mubr.bf16.gmra.mxu0 %v5299_v36  ;;  %1512 = vmatmul.mubr.bf16.gmra.mxu1 %v5299_v36  ;;  %v5483_v36 = vld [vmem:[%s5114_s16 + $0x1ec] ss:$16 sps:$4 sm:$0xff]  }
 0x143   : > { %1828 = vmatpush1.bf16.msra.mxu0 %v5452_v9  ;;  %1869 = vmatpush1.bf16.msra.mxu1 %v5457_v11  ;;  %6793 = vst [vmem:[#allocation47_spill] sm:$0xff] %v5483_v36 }
 0x144   : > { %1829 = vmatprep.subr.bf16.mxu0 %v5460_v12  ;;  %1870 = vmatprep.subr.bf16.mxu1 %v5464_v14 }
 0x145   : > { %1847 = vmatprep.mubr.bf16.mxu0 %v6652_v17  ;;  %1888 = vmatprep.mubr.bf16.mxu1 %v6652_v17 }
 0x147   : > { %1830 = vmatpush1.bf16.msra.mxu0 %v5470_v23  ;;  %1871 = vmatpush1.bf16.msra.mxu1 %v5475_v15 }
 0x148   : > { %2084 = vmatprep.subr.bf16.mxu0 %v5478_v16  ;;  %2125 = vmatprep.subr.bf16.mxu1 %v5483_v36 }
 0x14a   : > { %1848 = vmatmul.mubr.bf16.vlgmr.msra.gmra.mxu0 %v6652_v17  ;;  %1889 = vmatmul.mubr.bf16.vlgmr.msra.gmra.mxu1 %v6652_v17 }
 0x14b   : > { %2085 = vmatpush1.bf16.msra.mxu0 %v5488_v18  ;;  %2126 = vmatpush1.bf16.msra.mxu1 %v5493_v19 }
 0x14c   : > { %2086 = vmatprep.subr.bf16.mxu0 %v5496_v20  ;;  %2127 = vmatprep.subr.bf16.mxu1 %v5500_v21 }
 0x14d   : > { %2116 = vmatprep.mubr.bf16.mxu0 %v6652_v17  ;;  %2157 = vmatprep.mubr.bf16.mxu1 %v6652_v17  ;;  %v5609_v17 = vld [vmem:[%s5114_s16 + $0x108] ss:$16 sps:$4 sm:$0xff]  }
 0x14f   : > { %2087 = vmatpush1.bf16.msra.mxu0 %v5506_v22  ;;  %2128 = vmatpush1.bf16.msra.mxu1 %v5511_v24 }
 0x150   : > { %2088 = vmatprep.subr.bf16.mxu0 %v5514_v25  ;;  %2129 = vmatprep.subr.bf16.mxu1 %v5518_v26 }
 0x153   : > { %2089 = vmatpush1.bf16.msra.mxu0 %v5524_v27  ;;  %2130 = vmatpush1.bf16.msra.mxu1 %v5529_v28 }
 0x154   : > { %2090 = vmatprep.subr.bf16.mxu0 %v5532_v29  ;;  %2131 = vmatprep.subr.bf16.mxu1 %v5536_v30 }
 0x157   : > { %2091 = vmatpush1.bf16.msra.mxu0 %v5540_v32  ;;  %2132 = vmatpush1.bf16.msra.mxu1 %v5545_v33 }
 0x158   : > { %2092 = vmatprep.subr.bf16.mxu0 %v5548_v34  ;;  %2133 = vmatprep.subr.bf16.mxu1 %v5552_v35 }
 0x15b   : > { %2093 = vmatpush1.bf16.msra.mxu0 %v5556_v37  ;;  %2134 = vmatpush1.bf16.msra.mxu1 %v5561_v38 }
 0x15c   : > { %2094 = vmatprep.subr.bf16.mxu0 %v5564_v39  ;;  %2135 = vmatprep.subr.bf16.mxu1 %v5568_v40 }
 0x15f   : > { %2095 = vmatpush1.bf16.msra.mxu0 %v5572_v41  ;;  %2136 = vmatpush1.bf16.msra.mxu1 %v5577_v43 }
 0x160   : > { %2096 = vmatprep.subr.bf16.mxu0 %v5580_v44  ;;  %2137 = vmatprep.subr.bf16.mxu1 %v5584_v45  ;;  %v6795_v45 = vmov 0  }
 0x163   : > { %2097 = vmatpush1.bf16.msra.mxu0 %v5588_v46  ;;  %2138 = vmatpush1.bf16.msra.mxu1 %v5593_v47 }
 0x164   : > { %2098 = vmatprep.subr.bf16.mxu0 %v5596_v48  ;;  %2139 = vmatprep.subr.bf16.mxu1 %v5600_v49 }
 0x167   : > { %2099 = vmatpush1.bf16.msra.mxu0 %v5604_v50  ;;  %2140 = vmatpush1.bf16.msra.mxu1 %v5609_v17 }
 0x168   : > { %2194 = vmatprep.subr.bf16.mxu0 %v5339_v51  ;;  %2235 = vmatprep.subr.bf16.mxu1 %v5342_v52 }
 0x16a   : > { %2117 = vmatmul.mubr.bf16.vlgmr.msra.gmra.mxu0 %v6795_v45  ;;  %2158 = vmatmul.mubr.bf16.vlgmr.msra.gmra.mxu1 %v6795_v45 }
 0x16b   : > { %2195 = vmatpush1.bf16.msra.mxu0 %v5345_v53  ;;  %2236 = vmatpush1.bf16.msra.mxu1 %v5349_v55 }
 0x16c   : > { %2196 = vmatprep.subr.bf16.mxu0 %v5352_v56  ;;  %2237 = vmatprep.subr.bf16.mxu1 %v5356_v57 }
 0x16d   : > { %2226 = vmatprep.mubr.bf16.mxu0 %v6795_v45  ;;  %2267 = vmatprep.mubr.bf16.mxu1 %v6795_v45 }
 0x16f   : > { %2197 = vmatpush1.bf16.msra.mxu0 %v5362_v58  ;;  %2238 = vmatpush1.bf16.msra.mxu1 %v5367_v59 }
 0x170   : > { %2198 = vmatprep.subr.bf16.mxu0 %v5370_v60  ;;  %2239 = vmatprep.subr.bf16.mxu1 %v5375_v31 }
 0x173   : > { %2199 = vmatpush1.bf16.msra.mxu0 %v5380_v61  ;;  %2240 = vmatpush1.bf16.msra.mxu1 %v5385_v62 }
 0x174   : > { %2200 = vmatprep.subr.bf16.mxu0 %v5388_v63  ;;  %2241 = vmatprep.subr.bf16.mxu1 %v5392_v10 }
 0x177   : > { %2201 = vmatpush1.bf16.msra.mxu0 %v5398_v42  ;;  %2242 = vmatpush1.bf16.msra.mxu1 %v5403_v1 }
 0x178   : > { %2202 = vmatprep.subr.bf16.mxu0 %v5406_v2  ;;  %2243 = vmatprep.subr.bf16.mxu1 %v5411_v54 }
 0x17b   : > { %2203 = vmatpush1.bf16.msra.mxu0 %v5416_v3  ;;  %2244 = vmatpush1.bf16.msra.mxu1 %v5421_v4 }
 0x17c   : > { %2204 = vmatprep.subr.bf16.mxu0 %v5424_v5  ;;  %2245 = vmatprep.subr.bf16.mxu1 %v5428_v6 }
 0x17f   : > { %2205 = vmatpush1.bf16.msra.mxu0 %v5434_v0  ;;  %2246 = vmatpush1.bf16.msra.mxu1 %v5439_v7  ;;  %v550_v7 = vlaneseq }
 0x180   : > { %2206 = vmatprep.subr.bf16.mxu0 %v5442_v8  ;;  %2247 = vmatprep.subr.bf16.mxu1 %v5447_v13 }
 0x181   : > { %v5652_v8 = vshrl.u32 %v550_v7, 7 }
 0x183   : > { %2207 = vmatpush1.bf16.msra.mxu0 %v5452_v9  ;;  %2248 = vmatpush1.bf16.msra.mxu1 %v5457_v11  ;;  %v560_v13 = vsub.s32 2, %v5652_v8  ;;  %v552_v9 = vsub.s32 0, %v5652_v8  ;;  %v5657_v11 = vld [vmem:[%s5120_s17] sm:$0xff] }
 0x184   : > { %2208 = vmatprep.subr.bf16.mxu0 %v5460_v12  ;;  %2249 = vmatprep.subr.bf16.mxu1 %v5464_v14  ;;  %v564_v14 = vsub.s32 3, %v5652_v8 }
 0x185   : > { %v5671_v7 = vrot.slane %v5657_v11, %v552_v9 }
 0x186   : > { %v5676_v5 = vrot.slane %v5657_v11, %v564_v14 }
 0x187   : > { %2209 = vmatpush1.bf16.msra.mxu0 %v5470_v23  ;;  %2250 = vmatpush1.bf16.msra.mxu1 %v5475_v15  ;;  %v556_v23 = vsub.s32 1, %v5652_v8 }
 0x188   : > { %2304 = vmatprep.subr.bf16.mxu0 %v5478_v16  ;;  %2345 = vmatprep.subr.bf16.mxu1 %v5483_v36  ;;  %v5668_v36 = vrot.slane %v5657_v11, %v560_v13 }
 0x189   : > { %v5679_v4 = vrot.slane %v5657_v11, %v556_v23 }
 0x1aa   : > { %v5659_v12 = vpop.f32.mrf.mxu0  ;;  %v5663_v15 = vpop.f32.mrf.mxu1 }
 0x1ac   : > { %v5665_v16 = vpop.f32.mrf.mxu0  ;;  %v5673_v0 = vpop.f32.mrf.mxu1 }
 0x1ae   : > { %v1268_v6 = vpop.f32.mrf.mxu0  ;;  %v1341_v54 = vpop.f32.mrf.mxu1 }
 0x1af   : > { %v5682_v3 = vadd.f32 %v1268_v6, %v5671_v7  ;;  %v5685_v13 = vadd.f32 %v1341_v54, %v5668_v36 }
 0x1b0   : > { %v1270_v2 = vpop.f32.mrf.mxu0  ;;  %v1343_v1 = vpop.f32.mrf.mxu1 }
 0x1b1   : > { %6796 = vst [vmem:[#allocation49_spill] sm:$0xff] %v5682_v3  ;;  %6797 = vst [vmem:[#allocation50_spill] sm:$0xff] %v5685_v13  ;;  %v5688_v9 = vadd.f32 %v1270_v2, %v5679_v4  ;;  %v5691_v42 = vadd.f32 %v1343_v1, %v5676_v5 }
 0x1b2   : > { %v1274_v14 = vpop.f32.mrf.mxu0  ;;  %v1347_v23 = vpop.f32.mrf.mxu1 }
 0x1b3   : > { %6798 = vst [vmem:[#allocation51_spill] sm:$0xff] %v5688_v9  ;;  %6799 = vst [vmem:[#allocation52_spill] sm:$0xff] %v5691_v42  ;;  %v5694_v10 = vadd.f32 %v1274_v14, %v5671_v7  ;;  %v5697_v6 = vadd.f32 %v1347_v23, %v5668_v36 }
 0x1b4   : > { %v1276_v63 = vpop.f32.mrf.mxu0  ;;  %v1349_v54 = vpop.f32.mrf.mxu1 }
 0x1b5   : > { %6800 = vst [vmem:[#allocation53_spill] sm:$0xff] %v5694_v10  ;;  %6801 = vst [vmem:[#allocation54_spill] sm:$0xff] %v5697_v6  ;;  %v5700_v3 = vadd.f32 %v1276_v63, %v5679_v4  ;;  %v5703_v2 = vadd.f32 %v1349_v54, %v5676_v5 }
 0x1b6   : > { %v1278_v13 = vpop.f32.mrf.mxu0  ;;  %v1351_v42 = vpop.f32.mrf.mxu1 }
 0x1b7   : > { %6802 = vst [vmem:[#allocation55_spill] sm:$0xff] %v5700_v3  ;;  %6803 = vst [vmem:[#allocation56_spill] sm:$0xff] %v5703_v2  ;;  %v5706_v1 = vadd.f32 %v1278_v13, %v5671_v7  ;;  %v5709_v14 = vadd.f32 %v1351_v42, %v5668_v36 }
 0x1b8   : > { %v1280_v9 = vpop.f32.mrf.mxu0  ;;  %v1353_v23 = vpop.f32.mrf.mxu1 }
 0x1b9   : > { %6804 = vst [vmem:[#allocation57_spill] sm:$0xff] %v5706_v1  ;;  %6805 = vst [vmem:[#allocation58_spill] sm:$0xff] %v5709_v14  ;;  %v5712_v10 = vadd.f32 %v1280_v9, %v5679_v4  ;;  %v5715_v63 = vadd.f32 %v1353_v23, %v5676_v5 }
 0x1ba   : > { %v1284_v6 = vpop.f32.mrf.mxu0  ;;  %v1357_v54 = vpop.f32.mrf.mxu1 }
 0x1bb   : > { %6806 = vst [vmem:[#allocation59_spill] sm:$0xff] %v5712_v10  ;;  %6807 = vst [vmem:[#allocation60_spill] sm:$0xff] %v5715_v63  ;;  %v5718_v3 = vadd.f32 %v1284_v6, %v5671_v7  ;;  %v5721_v13 = vadd.f32 %v1357_v54, %v5668_v36 }
 0x1bc   : > { %v1286_v2 = vpop.f32.mrf.mxu0  ;;  %v1359_v42 = vpop.f32.mrf.mxu1 }
 0x1bd   : > { %6808 = vst [vmem:[#allocation61_spill] sm:$0xff] %v5718_v3  ;;  %6809 = vst [vmem:[#allocation62_spill] sm:$0xff] %v5721_v13  ;;  %v5724_v1 = vadd.f32 %v1286_v2, %v5679_v4  ;;  %v5727_v9 = vadd.f32 %v1359_v42, %v5676_v5 }
 0x1be   : > { %v1288_v14 = vpop.f32.mrf.mxu0  ;;  %v1361_v23 = vpop.f32.mrf.mxu1 }
 0x1bf   : > { %6810 = vst [vmem:[#allocation63_spill] sm:$0xff] %v5724_v1  ;;  %6811 = vst [vmem:[#allocation64_spill] sm:$0xff] %v5727_v9  ;;  %v5730_v10 = vadd.f32 %v1288_v14, %v5671_v7  ;;  %v5733_v6 = vadd.f32 %v1361_v23, %v5668_v36 }
 0x1c0   : > { %v1290_v63 = vpop.f32.mrf.mxu0  ;;  %v1363_v54 = vpop.f32.mrf.mxu1 }
 0x1c1   : > { %6812 = vst [vmem:[#allocation65_spill] sm:$0xff] %v5730_v10  ;;  %6813 = vst [vmem:[#allocation66_spill] sm:$0xff] %v5733_v6  ;;  %v5736_v3 = vadd.f32 %v1290_v63, %v5679_v4  ;;  %v5739_v2 = vadd.f32 %v1363_v54, %v5676_v5 }
 0x1c2   : > { %v1294_v13 = vpop.f32.mrf.mxu0  ;;  %v1367_v42 = vpop.f32.mrf.mxu1 }
 0x1c3   : > { %6814 = vst [vmem:[#allocation67_spill] sm:$0xff] %v5736_v3  ;;  %6815 = vst [vmem:[#allocation68_spill] sm:$0xff] %v5739_v2  ;;  %v5742_v1 = vadd.f32 %v1294_v13, %v5671_v7  ;;  %v5745_v14 = vadd.f32 %v1367_v42, %v5668_v36 }
 0x1c4   : > { %v1296_v9 = vpop.f32.mrf.mxu0  ;;  %v1369_v23 = vpop.f32.mrf.mxu1 }
 0x1c5   : > { %6816 = vst [vmem:[#allocation69_spill] sm:$0xff] %v5742_v1  ;;  %6817 = vst [vmem:[#allocation70_spill] sm:$0xff] %v5745_v14  ;;  %v5748_v10 = vadd.f32 %v1296_v9, %v5679_v4  ;;  %v5751_v63 = vadd.f32 %v1369_v23, %v5676_v5  ;;  %v568_v14 = vsub.s32 4, %v5652_v8  ;;  %v576_v23 = vsub.s32 6, %v5652_v8 }
 0x1c6   : > { %v1298_v6 = vpop.f32.mrf.mxu0  ;;  %v1371_v54 = vpop.f32.mrf.mxu1 }
 0x1c7   : > { %6818 = vst [vmem:[#allocation71_spill] sm:$0xff] %v5748_v10  ;;  %6819 = vst [vmem:[#allocation72_spill] sm:$0xff] %v5751_v63  ;;  %v5754_v3 = vadd.f32 %v1298_v6, %v5671_v7  ;;  %v5757_v13 = vadd.f32 %v1371_v54, %v5668_v36  ;;  %v572_v63 = vsub.s32 5, %v5652_v8  ;;  %v580_v6 = vsub.s32 7, %v5652_v8 }
 0x1c8   : > { %v1300_v2 = vpop.f32.mrf.mxu0  ;;  %v1373_v42 = vpop.f32.mrf.mxu1  ;;  %v5773_v54 = vrot.slane %v5657_v11, %v576_v23 }
 0x1c9   : > { %6820 = vst [vmem:[#allocation73_spill] sm:$0xff] %v5754_v3  ;;  %6821 = vst [vmem:[#allocation74_spill] sm:$0xff] %v5757_v13  ;;  %v5760_v1 = vadd.f32 %v1300_v2, %v5679_v4  ;;  %v5763_v9 = vadd.f32 %v1373_v42, %v5676_v5  ;;  %v5770_v3 = vrot.slane %v5657_v11, %v568_v14 }
 0x1ca   : > { %v5776_v2 = vrot.slane %v5657_v11, %v572_v63  ;;  %v5779_v42 = vrot.slane %v5657_v11, %v580_v6 }
 0x1cb   : > { %6822 = vst [vmem:[#allocation75_spill] sm:$0xff] %v5760_v1  ;;  %6823 = vst [vmem:[#allocation76_spill] sm:$0xff] %v5763_v9 }
 0x1ea   : > { %v1410_v13 = vpop.f32.mrf.mxu0  ;;  %v1483_v1 = vpop.f32.mrf.mxu1 }
 0x1eb   : > { %v5782_v9 = vadd.f32 %v1410_v13, %v5770_v3  ;;  %v5785_v10 = vadd.f32 %v1483_v1, %v5773_v54 }
 0x1ec   : > { %v1412_v8 = vpop.f32.mrf.mxu0  ;;  %v1485_v23 = vpop.f32.mrf.mxu1 }
 0x1ed   : > { %6824 = vst [vmem:[#allocation77_spill] sm:$0xff] %v5782_v9  ;;  %6825 = vst [vmem:[#allocation78_spill] sm:$0xff] %v5785_v10  ;;  %v5788_v14 = vadd.f32 %v1412_v8, %v5776_v2  ;;  %v5791_v62 = vadd.f32 %v1485_v23, %v5779_v42 }
 0x1ee   : > { %v1414_v63 = vpop.f32.mrf.mxu0  ;;  %v1487_v11 = vpop.f32.mrf.mxu1 }
 0x1ef   : > { %6826 = vst [vmem:[#allocation79_spill] sm:$0xff] %v5788_v14  ;;  %6827 = vst [vmem:[#allocation80_spill] sm:$0xff] %v5791_v62  ;;  %v5794_v61 = vadd.f32 %v1414_v63, %v5770_v3  ;;  %v5797_v13 = vadd.f32 %v1487_v11, %v5773_v54 }
 0x1f0   : > { %v1416_v6 = vpop.f32.mrf.mxu0  ;;  %v1489_v10 = vpop.f32.mrf.mxu1 }
 0x1f1   : > { %6828 = vst [vmem:[#allocation81_spill] sm:$0xff] %v5794_v61  ;;  %6829 = vst [vmem:[#allocation82_spill] sm:$0xff] %v5797_v13  ;;  %v5800_v1 = vadd.f32 %v1416_v6, %v5776_v2  ;;  %v5803_v8 = vadd.f32 %v1489_v10, %v5779_v42 }
 0x1f2   : > { %v1420_v14 = vpop.f32.mrf.mxu0  ;;  %v1493_v62 = vpop.f32.mrf.mxu1 }
 0x1f3   : > { %6830 = vst [vmem:[#allocation83_spill] sm:$0xff] %v5800_v1  ;;  %6831 = vst [vmem:[#allocation84_spill] sm:$0xff] %v5803_v8  ;;  %v5806_v23 = vadd.f32 %v1420_v14, %v5770_v3  ;;  %v5809_v63 = vadd.f32 %v1493_v62, %v5773_v54 }
 0x1f4   : > { %v1422_v9 = vpop.f32.mrf.mxu0  ;;  %v1495_v13 = vpop.f32.mrf.mxu1 }
 0x1f5   : > { %6832 = vst [vmem:[#allocation85_spill] sm:$0xff] %v5806_v23  ;;  %6833 = vst [vmem:[#allocation86_spill] sm:$0xff] %v5809_v63  ;;  %v5812_v11 = vadd.f32 %v1422_v9, %v5776_v2  ;;  %v5815_v6 = vadd.f32 %v1495_v13, %v5779_v42 }
 0x1f6   : > { %v1424_v1 = vpop.f32.mrf.mxu0  ;;  %v1497_v8 = vpop.f32.mrf.mxu1 }
 0x1f7   : > { %6834 = vst [vmem:[#allocation87_spill] sm:$0xff] %v5812_v11  ;;  %6835 = vst [vmem:[#allocation88_spill] sm:$0xff] %v5815_v6  ;;  %v5818_v10 = vadd.f32 %v1424_v1, %v5770_v3  ;;  %v5821_v14 = vadd.f32 %v1497_v8, %v5773_v54 }
 0x1f8   : > { %v1426_v61 = vpop.f32.mrf.mxu0  ;;  %v1499_v63 = vpop.f32.mrf.mxu1 }
 0x1f9   : > { %6836 = vst [vmem:[#allocation89_spill] sm:$0xff] %v5818_v10  ;;  %6837 = vst [vmem:[#allocation90_spill] sm:$0xff] %v5821_v14  ;;  %v5824_v62 = vadd.f32 %v1426_v61, %v5776_v2  ;;  %v5827_v9 = vadd.f32 %v1499_v63, %v5779_v42 }
 0x1fa   : > { %v1430_v11 = vpop.f32.mrf.mxu0  ;;  %v1503_v6 = vpop.f32.mrf.mxu1 }
 0x1fb   : > { %6838 = vst [vmem:[#allocation91_spill] sm:$0xff] %v5824_v62  ;;  %6839 = vst [vmem:[#allocation92_spill] sm:$0xff] %v5827_v9  ;;  %v5830_v13 = vadd.f32 %v1430_v11, %v5770_v3  ;;  %v5833_v1 = vadd.f32 %v1503_v6, %v5773_v54 }
 0x1fc   : > { %v1432_v23 = vpop.f32.mrf.mxu0  ;;  %v1505_v14 = vpop.f32.mrf.mxu1 }
 0x1fd   : > { %6840 = vst [vmem:[#allocation93_spill] sm:$0xff] %v5830_v13  ;;  %6841 = vst [vmem:[#allocation94_spill] sm:$0xff] %v5833_v1  ;;  %v5836_v8 = vadd.f32 %v1432_v23, %v5776_v2  ;;  %v5839_v61 = vadd.f32 %v1505_v14, %v5779_v42 }
 0x1fe   : > { %v1434_v62 = vpop.f32.mrf.mxu0  ;;  %v1507_v9 = vpop.f32.mrf.mxu1 }
 0x1ff   : > { %6842 = vst [vmem:[#allocation95_spill] sm:$0xff] %v5836_v8  ;;  %6843 = vst [vmem:[#allocation96_spill] sm:$0xff] %v5839_v61  ;;  %v5842_v63 = vadd.f32 %v1434_v62, %v5770_v3  ;;  %v5845_v11 = vadd.f32 %v1507_v9, %v5773_v54 }
 0x200   : > { %v1436_v10 = vpop.f32.mrf.mxu0  ;;  %v1509_v1 = vpop.f32.mrf.mxu1 }
 0x201   : > { %6844 = vst [vmem:[#allocation97_spill] sm:$0xff] %v5842_v63  ;;  %6845 = vst [vmem:[#allocation98_spill] sm:$0xff] %v5845_v11  ;;  %v5848_v6 = vadd.f32 %v1436_v10, %v5776_v2  ;;  %v5851_v23 = vadd.f32 %v1509_v1, %v5779_v42 }
 0x202   : > { %v1440_v8 = vpop.f32.mrf.mxu0  ;;  %v1513_v61 = vpop.f32.mrf.mxu1 }
 0x203   : > { %6846 = vst [vmem:[#allocation99_spill] sm:$0xff] %v5848_v6  ;;  %6847 = vst [vmem:[#allocation100_spill] sm:$0xff] %v5851_v23  ;;  %v5854_v14 = vadd.f32 %v1440_v8, %v5770_v3  ;;  %v5857_v62 = vadd.f32 %v1513_v61, %v5773_v54  ;;  %v1265_v23 = vadd.f32 %v5659_v12, %v5671_v7 }
 0x204   : > { %v1442_v13 = vpop.f32.mrf.mxu0  ;;  %v1515_v11 = vpop.f32.mrf.mxu1  ;;  %v1267_v61 = vadd.f32 %v5665_v16, %v5679_v4  ;;  %v1340_v4 = vadd.f32 %v5673_v0, %v5676_v5 }
 0x205   : > { %6848 = vst [vmem:[#allocation101_spill] sm:$0xff] %v5854_v14  ;;  %6849 = vst [vmem:[#allocation102_spill] sm:$0xff] %v5857_v62  ;;  %v5860_v9 = vadd.f32 %v1442_v13, %v5776_v2  ;;  %v5863_v10 = vadd.f32 %v1515_v11, %v5779_v42  ;;  %v1338_v13 = vadd.f32 %v5663_v15, %v5668_v36 }
 0x206   : > { %v1444_v6 = vpop.f32.mrf.mxu0  ;;  %v1517_v63 = vpop.f32.mrf.mxu1 }
 0x207   : > { %6850 = vst [vmem:[#allocation103_spill] sm:$0xff] %v5860_v9  ;;  %6851 = vst [vmem:[#allocation104_spill] sm:$0xff] %v5863_v10 }
 0x208   : > { %v1446_v1 = vpop.f32.mrf.mxu0  ;;  %v1519_v8 = vpop.f32.mrf.mxu1 }
 0x209   : > { %v1447_v5 = vadd.f32 %v1446_v1, %v5776_v2  ;;  %v1520_v1 = vadd.f32 %v1519_v8, %v5779_v42 }
 0x20a   : > { %v1849_v14 = vpop.f32.mrf.mxu0  ;;  %v1890_v31 = vpop.f32.mrf.mxu1 }
 0x20b   : > { %v1897_v62 = vadd.f32 %v1849_v14, %v1265_v23  ;;  %v1899_v58 = vadd.f32 %v1890_v31, %v1338_v13 }
 0x20c   : > { %v1851_v60 = vpop.f32.mrf.mxu0  ;;  %v1892_v10 = vpop.f32.mrf.mxu1 }
 0x20d   : > { %v1901_v9 = vmul.f32 0.5, %v1897_v62  ;;  %v1898_v11 = vadd.f32 %v1851_v60, %v1267_v61  ;;  %v1900_v16 = vadd.f32 %v1892_v10, %v1340_v4  ;;  %v1518_v4 = vadd.f32 %v1517_v63, %v5773_v54 }
 0x20e   : > { %v1853_v59 = vpop.f32.mrf.mxu0  ;;  %v1894_v56 = vpop.f32.mrf.mxu1 }
 0x20f   : > { %4410 = vtanh.f32 %v1901_v9  ;;  %v1905_v57 = vmul.f32 0.5, %v1898_v11  ;;  %v1910_v23 = vmul.f32 0.5, %v1900_v16 }
 0x210   : > { %v1854_v12 = vpop.f32.mrf.mxu0  ;;  %v1895_v7 = vpop.f32.mrf.mxu1 }
 0x211   : > { %4412 = vtanh.f32 %v1905_v57  ;;  %v1445_v57 = vadd.f32 %v1444_v6, %v5770_v3 }
 0x212   : > { %4414 = vtanh.f32 %v1899_v58 }
 0x213   : > { %4416 = vtanh.f32 %v1910_v23 }
 0x21c   : > { %v4411_v14 = vpop.eup %4410 }
 0x21d   : > { %v1903_v55 = vmul.f32 0.5, %v4411_v14 }
 0x21e   : > { %v4413_v15 = vpop.eup %4412 }
 0x21f   : > { %v1904_v36 = vadd.f32 0.5, %v1903_v55  ;;  %v1907_v60 = vmul.f32 0.5, %v4413_v15  ;;  %v4415_v59 = vpop.eup %4414 }
 0x220   : > { %v4417_v61 = vpop.eup %4416 }
 0x221   : > { %v1908_v62 = vadd.f32 0.5, %v1907_v60  ;;  %v1915_v31 = vmul.f32 %v4415_v59, %v1904_v36  ;;  %v1912_v16 = vmul.f32 0.5, %v4417_v61 }
 0x223   : > { %v1914_v9 = vmul.f32 0.0, %v1908_v62  ;;  %v1913_v6 = vadd.f32 0.5, %v1912_v16  ;;  %v6853_v16 = vld [vmem:[#allocation17_spill] sm:$0xff] }
 0x225   : > { %v5873_v56 = vadd.f32 %v1915_v31, %v1914_v9 }
 0x227   : > { %4418 = vtanh.f32 %v5873_v56 }
 0x22a   : > { %v2118_v58 = vpop.f32.mrf.mxu0  ;;  %v2159_v10 = vpop.f32.mrf.mxu1 }
 0x22b   : > { %v2166_v0 = vadd.f32 %v2118_v58, %v1445_v57  ;;  %v2168_v36 = vadd.f32 %v2159_v10, %v1518_v4 }
 0x22c   : > { %v2120_v13 = vpop.f32.mrf.mxu0  ;;  %v2161_v12 = vpop.f32.mrf.mxu1 }
 0x22d   : > { %v2170_v55 = vmul.f32 0.5, %v2166_v0  ;;  %v2167_v11 = vadd.f32 %v2120_v13, %v1447_v5  ;;  %v2169_v59 = vadd.f32 %v2161_v12, %v1520_v1  ;;  %v6864_v1 = vld [vmem:[#allocation28_spill] sm:$0xff] }
 0x22e   : > { %v2122_v7 = vpop.f32.mrf.mxu0  ;;  %v2163_v14 = vpop.f32.mrf.mxu1 }
 0x22f   : > { %4420 = vtanh.f32 %v2170_v55  ;;  %v2174_v23 = vmul.f32 0.5, %v2167_v11  ;;  %v2179_v54 = vmul.f32 0.5, %v2169_v59  ;;  %v6852_v55 = vld [vmem:[#allocation48_spill] sm:$0xff]  ;;  %v6855_v14 = vld [vmem:[#allocation19_spill] sm:$0xff]  ;;  %v6866_v59 = vld [vmem:[#allocation30_spill] sm:$0xff] }
 0x230   : > { %v2123_v15 = vpop.f32.mrf.mxu0  ;;  %v2164_v3 = vpop.f32.mrf.mxu1 }
 0x231   : > { %4422 = vtanh.f32 %v2174_v23  ;;  %v6854_v23 = vld [vmem:[#allocation18_spill] sm:$0xff]  ;;  %v6856_v15 = vld [vmem:[#allocation20_spill] sm:$0xff] }
 0x232   : > { %4424 = vtanh.f32 %v2168_v36  ;;  %v6857_v36 = vld [vmem:[#allocation21_spill] sm:$0xff]  ;;  %v6860_v3 = vld [vmem:[#allocation24_spill] sm:$0xff] }
 0x233   : > { %4426 = vtanh.f32 %v2179_v54  ;;  %v6868_v54 = vld [vmem:[#allocation32_spill] sm:$0xff] }
 0x234   : > { %v4419_v2 = vpop.eup %4418 }
 0x235   : > { %v1918_v60 = vmul.f32 %v4419_v2, %v1913_v6  ;;  %v6862_v6 = vld [vmem:[#allocation26_spill] sm:$0xff]  ;;  %v6863_v2 = vld [vmem:[#allocation27_spill] sm:$0xff] }
 0x237   : > { %1919 = vst [vmem:[#allocation2 + $0x30] sm:$0xff] %v1918_v60  ;;  %v2193_v62 = vpack.c.bf16 %v1918_v60, %v1918_v60  ;;  %v6865_v60 = vld [vmem:[#allocation29_spill] sm:$0xff] }
 0x239   : > { %2227 = vmatmul.mubr.bf16.vlgmr.msra.gmra.mxu0 %v2193_v62  ;;  %2268 = vmatmul.mubr.bf16.vlgmr.msra.gmra.mxu1 %v2193_v62  ;;  %v6867_v62 = vld [vmem:[#allocation31_spill] sm:$0xff] }
 0x23a   : > { %2305 = vmatpush1.bf16.msra.mxu0 %v5488_v18  ;;  %2346 = vmatpush1.bf16.msra.mxu1 %v5493_v19 }
 0x23b   : > { %2306 = vmatprep.subr.bf16.mxu0 %v5496_v20  ;;  %2347 = vmatprep.subr.bf16.mxu1 %v5500_v21 }
 0x23c   : > { %v4421_v63 = vpop.eup %4420  ;;  %2336 = vmatprep.mubr.bf16.mxu0 %v6795_v45  ;;  %2377 = vmatprep.mubr.bf16.mxu1 %v6795_v45 }
 0x23d   : > { %v2172_v42 = vmul.f32 0.5, %v4421_v63  ;;  %v6869_v63 = vld [vmem:[#allocation33_spill] sm:$0xff] }
 0x23e   : > { %v4423_v8 = vpop.eup %4422  ;;  %2307 = vmatpush1.bf16.msra.mxu0 %v5506_v22  ;;  %2348 = vmatpush1.bf16.msra.mxu1 %v5511_v24 }
 0x23f   : > { %v2173_v31 = vadd.f32 0.5, %v2172_v42  ;;  %v2176_v9 = vmul.f32 0.5, %v4423_v8  ;;  %2308 = vmatprep.subr.bf16.mxu0 %v5514_v25  ;;  %2349 = vmatprep.subr.bf16.mxu1 %v5518_v26  ;;  %v4425_v58 = vpop.eup %4424  ;;  %v6870_v42 = vld [vmem:[#allocation34_spill] sm:$0xff]  ;;  %v6871_v8 = vld [vmem:[#allocation35_spill] sm:$0xff] }
 0x240   : > { %v4427_v61 = vpop.eup %4426 }
 0x241   : > { %v2177_v57 = vadd.f32 0.5, %v2176_v9  ;;  %v2184_v0 = vmul.f32 %v4425_v58, %v2173_v31  ;;  %v2181_v13 = vmul.f32 0.5, %v4427_v61  ;;  %v6872_v31 = vld [vmem:[#allocation36_spill] sm:$0xff]  ;;  %v6873_v9 = vld [vmem:[#allocation37_spill] sm:$0xff]  ;;  %v6875_v58 = vld [vmem:[#allocation39_spill] sm:$0xff] }
 0x242   : > { %2309 = vmatpush1.bf16.msra.mxu0 %v5524_v27  ;;  %2350 = vmatpush1.bf16.msra.mxu1 %v5529_v28  ;;  %v6878_v61 = vld [vmem:[#allocation42_spill] sm:$0xff] }
 0x243   : > { %v2183_v5 = vmul.f32 0.0, %v2177_v57  ;;  %2310 = vmatprep.subr.bf16.mxu0 %v5532_v29  ;;  %2351 = vmatprep.subr.bf16.mxu1 %v5536_v30  ;;  %v2182_v11 = vadd.f32 0.5, %v2181_v13  ;;  %v6874_v57 = vld [vmem:[#allocation38_spill] sm:$0xff]  ;;  %v6879_v13 = vld [vmem:[#allocation43_spill] sm:$0xff] }
 0x245   : > { %v5894_v10 = vadd.f32 %v2184_v0, %v2183_v5  ;;  %v6876_v5 = vld [vmem:[#allocation40_spill] sm:$0xff]  ;;  %v6877_v0 = vld [vmem:[#allocation41_spill] sm:$0xff] }
 0x246   : > { %2311 = vmatpush1.bf16.msra.mxu0 %v5540_v32  ;;  %2352 = vmatpush1.bf16.msra.mxu1 %v5545_v33 }
 0x247   : > { %4428 = vtanh.f32 %v5894_v10  ;;  %2312 = vmatprep.subr.bf16.mxu0 %v5548_v34  ;;  %2353 = vmatprep.subr.bf16.mxu1 %v5552_v35 }
 0x24a   : > { %2313 = vmatpush1.bf16.msra.mxu0 %v5556_v37  ;;  %2354 = vmatpush1.bf16.msra.mxu1 %v5561_v38 }
 0x24b   : > { %2314 = vmatprep.subr.bf16.mxu0 %v5564_v39  ;;  %2355 = vmatprep.subr.bf16.mxu1 %v5568_v40 }
 0x24e   : > { %2315 = vmatpush1.bf16.msra.mxu0 %v5572_v41  ;;  %2356 = vmatpush1.bf16.msra.mxu1 %v5577_v43 }
 0x24f   : > { %2316 = vmatprep.subr.bf16.mxu0 %v5580_v44  ;;  %2357 = vmatprep.subr.bf16.mxu1 %v6852_v55 }
 0x252   : > { %2317 = vmatpush1.bf16.msra.mxu0 %v5588_v46  ;;  %2358 = vmatpush1.bf16.msra.mxu1 %v5593_v47 }
 0x253   : > { %2318 = vmatprep.subr.bf16.mxu0 %v5596_v48  ;;  %2359 = vmatprep.subr.bf16.mxu1 %v5600_v49 }
 0x254   : > { %v4429_v12 = vpop.eup %4428 }
 0x255   : > { %v2187_v7 = vmul.f32 %v4429_v12, %v2182_v11  ;;  %v6880_v11 = vld [vmem:[#allocation44_spill] sm:$0xff]  ;;  %v6881_v12 = vld [vmem:[#allocation45_spill] sm:$0xff] }
 0x256   : > { %2319 = vmatpush1.bf16.msra.mxu0 %v5604_v50  ;;  %2360 = vmatpush1.bf16.msra.mxu1 %v5609_v17 }
 0x257   : > { %2188 = vst [vmem:[#allocation2 + $0x28] sm:$0xff] %v2187_v7  ;;  %v2303_v4 = vpack.c.bf16 %v2187_v7, %v2187_v7  ;;  %2414 = vmatprep.subr.bf16.mxu0 %v5339_v51  ;;  %2455 = vmatprep.subr.bf16.mxu1 %v5342_v52  ;;  %v6858_v51 = vld [vmem:[#allocation22_spill] sm:$0xff]  ;;  %v6859_v52 = vld [vmem:[#allocation23_spill] sm:$0xff] }
 0x258   : > { %v6882_v7 = vld [vmem:[#allocation46_spill] sm:$0xff] }
 0x259   : > { %2337 = vmatmul.mubr.bf16.vlgmr.msra.gmra.mxu0 %v2303_v4  ;;  %2378 = vmatmul.mubr.bf16.vlgmr.msra.gmra.mxu1 %v2303_v4  ;;  %v6883_v4 = vld [vmem:[#allocation47_spill] sm:$0xff] }
 0x25a   : > { %2415 = vmatpush1.bf16.msra.mxu0 %v5345_v53  ;;  %2456 = vmatpush1.bf16.msra.mxu1 %v6853_v16  ;;  %v6861_v53 = vld [vmem:[#allocation25_spill] sm:$0xff] }
 0x25b   : > { %2416 = vmatprep.subr.bf16.mxu0 %v6854_v23  ;;  %2457 = vmatprep.subr.bf16.mxu1 %v6855_v14  ;;  %v6884_v14 = vld [vmem:[#allocation49_spill] sm:$0xff] }
 0x25c   : > { %2446 = vmatprep.mubr.bf16.mxu0 %v6795_v45  ;;  %2487 = vmatprep.mubr.bf16.mxu1 %v6795_v45 }
 0x25e   : > { %2417 = vmatpush1.bf16.msra.mxu0 %v6856_v15  ;;  %2458 = vmatpush1.bf16.msra.mxu1 %v6857_v36 }
 0x25f   : > { %2418 = vmatprep.subr.bf16.mxu0 %v6858_v51  ;;  %2459 = vmatprep.subr.bf16.mxu1 %v6859_v52 }
 0x262   : > { %2419 = vmatpush1.bf16.msra.mxu0 %v6860_v3  ;;  %2460 = vmatpush1.bf16.msra.mxu1 %v6861_v53  ;;  %v6885_v3 = vld [vmem:[#allocation51_spill] sm:$0xff] }
 0x263   : > { %2420 = vmatprep.subr.bf16.mxu0 %v6862_v6  ;;  %2461 = vmatprep.subr.bf16.mxu1 %v6863_v2 }
 0x266   : > { %2421 = vmatpush1.bf16.msra.mxu0 %v6864_v1  ;;  %2462 = vmatpush1.bf16.msra.mxu1 %v6865_v60  ;;  %v6886_v1 = vld [vmem:[#allocation50_spill] sm:$0xff] }
 0x267   : > { %2422 = vmatprep.subr.bf16.mxu0 %v6866_v59  ;;  %2463 = vmatprep.subr.bf16.mxu1 %v6867_v62 }
 0x26a   : > { %2423 = vmatpush1.bf16.msra.mxu0 %v6868_v54  ;;  %2464 = vmatpush1.bf16.msra.mxu1 %v6869_v63  ;;  %v6887_v63 = vld [vmem:[#allocation52_spill] sm:$0xff] }
 0x26b   : > { %2424 = vmatprep.subr.bf16.mxu0 %v6870_v42  ;;  %2465 = vmatprep.subr.bf16.mxu1 %v6871_v8 }
 0x26e   : > { %2425 = vmatpush1.bf16.msra.mxu0 %v6872_v31  ;;  %2466 = vmatpush1.bf16.msra.mxu1 %v6873_v9 }
 0x26f   : > { %2426 = vmatprep.subr.bf16.mxu0 %v6874_v57  ;;  %2467 = vmatprep.subr.bf16.mxu1 %v6875_v58 }
 0x272   : > { %2427 = vmatpush1.bf16.msra.mxu0 %v6876_v5  ;;  %2468 = vmatpush1.bf16.msra.mxu1 %v6877_v0 }
 0x273   : > { %2428 = vmatprep.subr.bf16.mxu0 %v6878_v61  ;;  %2469 = vmatprep.subr.bf16.mxu1 %v6879_v13 }
 0x276   : > { %2429 = vmatpush1.bf16.msra.mxu0 %v6880_v11  ;;  %2470 = vmatpush1.bf16.msra.mxu1 %v6881_v12 }
 0x277   : > { %2524 = vmatprep.subr.bf16.mxu0 %v6882_v7  ;;  %2565 = vmatprep.subr.bf16.mxu1 %v6883_v4 }
 0x2f9   : > { %v2228_v16 = vpop.f32.mrf.mxu0  ;;  %v2269_v23 = vpop.f32.mrf.mxu1 }
 0x2fa   : > { %v2276_v15 = vadd.f32 %v2228_v16, %v6884_v14  ;;  %v2278_v60 = vadd.f32 %v2269_v23, %v6886_v1  ;;  %v6888_v16 = vld [vmem:[#allocation101_spill] sm:$0xff]  ;;  %v6890_v1 = vld [vmem:[#allocation102_spill] sm:$0xff] }
 0x2fb   : > { %v2230_v36 = vpop.f32.mrf.mxu0  ;;  %v2271_v51 = vpop.f32.mrf.mxu1 }
 0x2fc   : > { %v2280_v52 = vmul.f32 0.5, %v2276_v15  ;;  %v2277_v53 = vadd.f32 %v2230_v36, %v6885_v3  ;;  %v2279_v42 = vadd.f32 %v2271_v51, %v6887_v63 }
 0x2fd   : > { %v2232_v6 = vpop.f32.mrf.mxu0  ;;  %v2273_v2 = vpop.f32.mrf.mxu1 }
 0x2fe   : > { %4430 = vtanh.f32 %v2280_v52  ;;  %v2284_v59 = vmul.f32 0.5, %v2277_v53  ;;  %v2289_v8 = vmul.f32 0.5, %v2279_v42  ;;  %v6889_v52 = vld [vmem:[#allocation103_spill] sm:$0xff] }
 0x2ff   : > { %v2233_v62 = vpop.f32.mrf.mxu0  ;;  %v2274_v54 = vpop.f32.mrf.mxu1 }
 0x300   : > { %4432 = vtanh.f32 %v2284_v59 }
 0x301   : > { %4434 = vtanh.f32 %v2278_v60 }
 0x302   : > { %4436 = vtanh.f32 %v2289_v8  ;;  %v6891_v8 = vld [vmem:[#allocation104_spill] sm:$0xff] }
 0x30b   : > { %v4431_v31 = vpop.eup %4430 }
 0x30c   : > { %v2282_v9 = vmul.f32 0.5, %v4431_v31 }
 0x30d   : > { %v4433_v57 = vpop.eup %4432 }
 0x30e   : > { %v2283_v58 = vadd.f32 0.5, %v2282_v9  ;;  %v2286_v5 = vmul.f32 0.5, %v4433_v57  ;;  %v4435_v0 = vpop.eup %4434 }
 0x30f   : > { %v4437_v14 = vpop.eup %4436 }
 0x310   : > { %v2287_v61 = vadd.f32 0.5, %v2286_v5  ;;  %v2294_v13 = vmul.f32 %v4435_v0, %v2283_v58  ;;  %v2291_v2 = vmul.f32 0.5, %v4437_v14  ;;  %v6102_v14 = vld [vmem:[%s5114_s16 + $0x2c] ss:$16 sps:$4 sm:$0xff]  }
 0x311   : > { %6907 = vst [vmem:[#allocation31_spill] sm:$0xff] %v6102_v14 }
 0x312   : > { %v2293_v11 = vmul.f32 %v2287_v61, %v5873_v56  ;;  %v2292_v54 = vadd.f32 0.5, %v2291_v2  ;;  %v6134_v2 = vld [vmem:[%s5114_s16 + $0x1ec] ss:$16 sps:$4 sm:$0xff]  }
 0x313   : > { %6915 = vst [vmem:[#allocation39_spill] sm:$0xff] %v6134_v2 }
 0x314   : > { %v5956_v12 = vadd.f32 %v2294_v13, %v2293_v11  ;;  %v6082_v11 = vld [vmem:[%s5114_s16 + $0x44] ss:$16 sps:$4 sm:$0xff]  }
 0x315   : > { %6902 = vst [vmem:[#allocation26_spill] sm:$0xff] %v6082_v11 }
 0x316   : > { %4438 = vtanh.f32 %v5956_v12 }
 0x319   : > { %v2338_v7 = vpop.f32.mrf.mxu0  ;;  %v2379_v4 = vpop.f32.mrf.mxu1 }
 0x31a   : > { %v2386_v23 = vadd.f32 %v2338_v7, %v6888_v16  ;;  %v2388_v56 = vadd.f32 %v2379_v4, %v6890_v1  ;;  %v6086_v7 = vld [vmem:[%s5114_s16 + $0x4c] ss:$16 sps:$4 sm:$0xff]   ;;  %v6090_v4 = vld [vmem:[%s5114_s16 + $0x40] ss:$16 sps:$4 sm:$0xff]   ;;  %v6094_v16 = vld [vmem:[%s5114_s16 + $0x48] ss:$16 sps:$4 sm:$0xff]  }
 0x31b   : > { %v2340_v15 = vpop.f32.mrf.mxu0  ;;  %v2381_v36 = vpop.f32.mrf.mxu1  ;;  %6903 = vst [vmem:[#allocation27_spill] sm:$0xff] %v6086_v7  ;;  %6904 = vst [vmem:[#allocation28_spill] sm:$0xff] %v6090_v4 }
 0x31c   : > { %v2390_v51 = vmul.f32 0.5, %v2386_v23  ;;  %v2387_v3 = vadd.f32 %v2340_v15, %v6889_v52  ;;  %v2389_v31 = vadd.f32 %v2381_v36, %v6891_v8  ;;  %6905 = vst [vmem:[#allocation29_spill] sm:$0xff] %v6094_v16  ;;  %v6098_v23 = vld [vmem:[%s5114_s16 + $0x24] ss:$16 sps:$4 sm:$0xff]   ;;  %v6106_v15 = vld [vmem:[%s5114_s16 + $0x20] ss:$16 sps:$4 sm:$0xff]  }
 0x31d   : > { %v2342_v53 = vpop.f32.mrf.mxu0  ;;  %v2383_v6 = vpop.f32.mrf.mxu1  ;;  %6906 = vst [vmem:[#allocation30_spill] sm:$0xff] %v6098_v23  ;;  %6908 = vst [vmem:[#allocation32_spill] sm:$0xff] %v6106_v15  ;;  %v6110_v36 = vld [vmem:[%s5114_s16 + $0x28] ss:$16 sps:$4 sm:$0xff]   ;;  %v6118_v52 = vld [vmem:[%s5114_s16 + $0xc] ss:$16 sps:$4 sm:$0xff]  }
 0x31e   : > { %4440 = vtanh.f32 %v2390_v51  ;;  %v2394_v60 = vmul.f32 0.5, %v2387_v3  ;;  %v2399_v57 = vmul.f32 0.5, %v2389_v31  ;;  %6909 = vst [vmem:[#allocation33_spill] sm:$0xff] %v6110_v36  ;;  %v6114_v51 = vld [vmem:[%s5114_s16 + $0x4] ss:$16 sps:$4 sm:$0xff]   ;;  %6911 = vst [vmem:[#allocation35_spill] sm:$0xff] %v6118_v52 }
 0x31f   : > { %v2343_v59 = vpop.f32.mrf.mxu0  ;;  %v2384_v62 = vpop.f32.mrf.mxu1  ;;  %6910 = vst [vmem:[#allocation34_spill] sm:$0xff] %v6114_v51  ;;  %v6122_v3 = vld [vmem:[%s5114_s16] ss:$16 sps:$4 sm:$0xff]   ;;  %v6126_v53 = vld [vmem:[%s5114_s16 + $0x8] ss:$16 sps:$4 sm:$0xff]  }
 0x320   : > { %4442 = vtanh.f32 %v2394_v60  ;;  %6912 = vst [vmem:[#allocation36_spill] sm:$0xff] %v6122_v3  ;;  %6913 = vst [vmem:[#allocation37_spill] sm:$0xff] %v6126_v53  ;;  %v6130_v6 = vld [vmem:[%s5114_s16 + $0x1e4] ss:$16 sps:$4 sm:$0xff]  }
 0x321   : > { %4444 = vtanh.f32 %v2388_v56  ;;  %6914 = vst [vmem:[#allocation38_spill] sm:$0xff] %v6130_v6  ;;  %v6916_v60 = vld [vmem:[#allocation53_spill] sm:$0xff] }
 0x322   : > { %4446 = vtanh.f32 %v2399_v57  ;;  %v6918_v57 = vld [vmem:[#allocation54_spill] sm:$0xff] }
 0x323   : > { %v4439_v63 = vpop.eup %4438 }
 0x324   : > { %v2297_v42 = vmul.f32 %v4439_v63, %v2292_v54 }
 0x326   : > { %2298 = vst [vmem:[#allocation2 + $0x58] sm:$0xff] %v2297_v42  ;;  %v2413_v9 = vpack.c.bf16 %v2297_v42, %v2297_v42  ;;  %v6917_v42 = vld [vmem:[#allocation55_spill] sm:$0xff] }
 0x328   : > { %2447 = vmatmul.mubr.bf16.vlgmr.msra.gmra.mxu0 %v2413_v9  ;;  %2488 = vmatmul.mubr.bf16.vlgmr.msra.gmra.mxu1 %v2413_v9 }
 0x329   : > { %2525 = vmatpush1.bf16.msra.mxu0 %v5488_v18  ;;  %2566 = vmatpush1.bf16.msra.mxu1 %v5493_v19 }
 0x32a   : > { %2526 = vmatprep.subr.bf16.mxu0 %v5496_v20  ;;  %2567 = vmatprep.subr.bf16.mxu1 %v5500_v21 }
 0x32b   : > { %v4441_v58 = vpop.eup %4440  ;;  %2556 = vmatprep.mubr.bf16.mxu0 %v6795_v45  ;;  %2597 = vmatprep.mubr.bf16.mxu1 %v6795_v45 }
 0x32c   : > { %v2392_v5 = vmul.f32 0.5, %v4441_v58 }
 0x32d   : > { %v4443_v0 = vpop.eup %4442  ;;  %2527 = vmatpush1.bf16.msra.mxu0 %v5506_v22  ;;  %2568 = vmatpush1.bf16.msra.mxu1 %v5511_v24 }
 0x32e   : > { %v2393_v61 = vadd.f32 0.5, %v2392_v5  ;;  %v2396_v18 = vmul.f32 0.5, %v4443_v0  ;;  %2528 = vmatprep.subr.bf16.mxu0 %v5514_v25  ;;  %2569 = vmatprep.subr.bf16.mxu1 %v5518_v26  ;;  %v4445_v19 = vpop.eup %4444 }
 0x32f   : > { %v4447_v24 = vpop.eup %4446 }
 0x330   : > { %v2397_v20 = vadd.f32 0.5, %v2396_v18  ;;  %v2404_v21 = vmul.f32 %v4445_v19, %v2393_v61  ;;  %v2401_v25 = vmul.f32 0.5, %v4447_v24  ;;  %v6919_v18 = vld [vmem:[#allocation56_spill] sm:$0xff] }
 0x331   : > { %2529 = vmatpush1.bf16.msra.mxu0 %v5524_v27  ;;  %2570 = vmatpush1.bf16.msra.mxu1 %v5529_v28 }
 0x332   : > { %v2403_v13 = vmul.f32 %v2397_v20, %v5894_v10  ;;  %2530 = vmatprep.subr.bf16.mxu0 %v5532_v29  ;;  %2571 = vmatprep.subr.bf16.mxu1 %v5536_v30  ;;  %v2402_v26 = vadd.f32 0.5, %v2401_v25  ;;  %v6000_v30 = vld [vmem:[%s5114_s16 + $0xe4] ss:$16 sps:$4 sm:$0xff]   ;;  %v6074_v10 = vld [vmem:[%s5114_s16 + $0x60] ss:$16 sps:$4 sm:$0xff]  }
 0x333   : > { %6900 = vst [vmem:[#allocation24_spill] sm:$0xff] %v6074_v10 }
 0x334   : > { %v5978_v22 = vadd.f32 %v2404_v21, %v2403_v13 }
 0x335   : > { %2531 = vmatpush1.bf16.msra.mxu0 %v5540_v32  ;;  %2572 = vmatpush1.bf16.msra.mxu1 %v5545_v33  ;;  %v6004_v32 = vld [vmem:[%s5114_s16 + $0xec] ss:$16 sps:$4 sm:$0xff]   ;;  %v6008_v33 = vld [vmem:[%s5114_s16 + $0xe0] ss:$16 sps:$4 sm:$0xff]  }
 0x336   : > { %4448 = vtanh.f32 %v5978_v22  ;;  %2532 = vmatprep.subr.bf16.mxu0 %v5548_v34  ;;  %2573 = vmatprep.subr.bf16.mxu1 %v5552_v35  ;;  %v6016_v34 = vld [vmem:[%s5114_s16 + $0xc4] ss:$16 sps:$4 sm:$0xff]   ;;  %v6020_v35 = vld [vmem:[%s5114_s16 + $0xcc] ss:$16 sps:$4 sm:$0xff]  }
 0x339   : > { %2533 = vmatpush1.bf16.msra.mxu0 %v5556_v37  ;;  %2574 = vmatpush1.bf16.msra.mxu1 %v5561_v38  ;;  %v6026_v37 = vld [vmem:[%s5114_s16 + $0xc0] ss:$16 sps:$4 sm:$0xff]   ;;  %v6030_v38 = vld [vmem:[%s5114_s16 + $0xc8] ss:$16 sps:$4 sm:$0xff]  }
 0x33a   : > { %2534 = vmatprep.subr.bf16.mxu0 %v5564_v39  ;;  %2575 = vmatprep.subr.bf16.mxu1 %v5568_v40  ;;  %v6034_v39 = vld [vmem:[%s5114_s16 + $0xa4] ss:$16 sps:$4 sm:$0xff]   ;;  %v6038_v40 = vld [vmem:[%s5114_s16 + $0xac] ss:$16 sps:$4 sm:$0xff]  }
 0x33d   : > { %2535 = vmatpush1.bf16.msra.mxu0 %v5572_v41  ;;  %2576 = vmatpush1.bf16.msra.mxu1 %v5577_v43  ;;  %v6042_v41 = vld [vmem:[%s5114_s16 + $0xa0] ss:$16 sps:$4 sm:$0xff]   ;;  %v6046_v43 = vld [vmem:[%s5114_s16 + $0xa8] ss:$16 sps:$4 sm:$0xff]  }
 0x33e   : > { %2536 = vmatprep.subr.bf16.mxu0 %v5580_v44  ;;  %2577 = vmatprep.subr.bf16.mxu1 %v6852_v55  ;;  %6892 = vst [vmem:[#allocation48_spill] sm:$0xff] %v6042_v41  ;;  %6893 = vst [vmem:[#allocation17_spill] sm:$0xff] %v6046_v43  ;;  %v6050_v44 = vld [vmem:[%s5114_s16 + $0x84] ss:$16 sps:$4 sm:$0xff]   ;;  %v6078_v55 = vld [vmem:[%s5114_s16 + $0x68] ss:$16 sps:$4 sm:$0xff]  }
 0x33f   : > { %6894 = vst [vmem:[#allocation18_spill] sm:$0xff] %v6050_v44  ;;  %6901 = vst [vmem:[#allocation25_spill] sm:$0xff] %v6078_v55 }
 0x341   : > { %2537 = vmatpush1.bf16.msra.mxu0 %v5588_v46  ;;  %2578 = vmatpush1.bf16.msra.mxu1 %v5593_v47  ;;  %v6054_v46 = vld [vmem:[%s5114_s16 + $0x8c] ss:$16 sps:$4 sm:$0xff]   ;;  %v6058_v47 = vld [vmem:[%s5114_s16 + $0x80] ss:$16 sps:$4 sm:$0xff]  }
 0x342   : > { %2538 = vmatprep.subr.bf16.mxu0 %v5596_v48  ;;  %2579 = vmatprep.subr.bf16.mxu1 %v5600_v49  ;;  %6895 = vst [vmem:[#allocation19_spill] sm:$0xff] %v6054_v46  ;;  %6896 = vst [vmem:[#allocation20_spill] sm:$0xff] %v6058_v47  ;;  %v6062_v48 = vld [vmem:[%s5114_s16 + $0x88] ss:$16 sps:$4 sm:$0xff]   ;;  %v6066_v49 = vld [vmem:[%s5114_s16 + $0x64] ss:$16 sps:$4 sm:$0xff]  }
 0x343   : > { %v4449_v27 = vpop.eup %4448  ;;  %6897 = vst [vmem:[#allocation21_spill] sm:$0xff] %v6062_v48  ;;  %6898 = vst [vmem:[#allocation22_spill] sm:$0xff] %v6066_v49 }
 0x344   : > { %v2407_v28 = vmul.f32 %v4449_v27, %v2402_v26 }
 0x345   : > { %2539 = vmatpush1.bf16.msra.mxu0 %v5604_v50  ;;  %2580 = vmatpush1.bf16.msra.mxu1 %v5609_v17  ;;  %v6012_v17 = vld [vmem:[%s5114_s16 + $0xe8] ss:$16 sps:$4 sm:$0xff]   ;;  %v6070_v50 = vld [vmem:[%s5114_s16 + $0x6c] ss:$16 sps:$4 sm:$0xff]  }
 0x346   : > { %2408 = vst [vmem:[#allocation2 + $0x70] sm:$0xff] %v2407_v28  ;;  %v2523_v29 = vpack.c.bf16 %v2407_v28, %v2407_v28  ;;  %2634 = vmatprep.subr.bf16.mxu0 %v6000_v30  ;;  %2675 = vmatprep.subr.bf16.mxu1 %v6004_v32  ;;  %6899 = vst [vmem:[#allocation23_spill] sm:$0xff] %v6070_v50 }
 0x348   : > { %2557 = vmatmul.mubr.bf16.vlgmr.msra.gmra.mxu0 %v2523_v29  ;;  %2598 = vmatmul.mubr.bf16.vlgmr.msra.gmra.mxu1 %v2523_v29 }
 0x349   : > { %2635 = vmatpush1.bf16.msra.mxu0 %v6008_v33  ;;  %2676 = vmatpush1.bf16.msra.mxu1 %v6012_v17 }
 0x34a   : > { %2636 = vmatprep.subr.bf16.mxu0 %v6016_v34  ;;  %2677 = vmatprep.subr.bf16.mxu1 %v6020_v35 }
 0x34b   : > { %2666 = vmatprep.mubr.bf16.mxu0 %v6795_v45  ;;  %2707 = vmatprep.mubr.bf16.mxu1 %v6795_v45 }
 0x34d   : > { %2637 = vmatpush1.bf16.msra.mxu0 %v6026_v37  ;;  %2678 = vmatpush1.bf16.msra.mxu1 %v6030_v38 }
 0x34e   : > { %2638 = vmatprep.subr.bf16.mxu0 %v6034_v39  ;;  %2679 = vmatprep.subr.bf16.mxu1 %v6038_v40 }
 0x351   : > { %2639 = vmatpush1.bf16.msra.mxu0 %v6042_v41  ;;  %2680 = vmatpush1.bf16.msra.mxu1 %v6046_v43 }
 0x352   : > { %2640 = vmatprep.subr.bf16.mxu0 %v6050_v44  ;;  %2681 = vmatprep.subr.bf16.mxu1 %v6054_v46 }
 0x355   : > { %2641 = vmatpush1.bf16.msra.mxu0 %v6058_v47  ;;  %2682 = vmatpush1.bf16.msra.mxu1 %v6062_v48 }
 0x356   : > { %2642 = vmatprep.subr.bf16.mxu0 %v6066_v49  ;;  %2683 = vmatprep.subr.bf16.mxu1 %v6070_v50 }
 0x359   : > { %2643 = vmatpush1.bf16.msra.mxu0 %v6074_v10  ;;  %2684 = vmatpush1.bf16.msra.mxu1 %v6078_v55 }
 0x35a   : > { %2644 = vmatprep.subr.bf16.mxu0 %v6082_v11  ;;  %2685 = vmatprep.subr.bf16.mxu1 %v6086_v7 }
 0x35d   : > { %2645 = vmatpush1.bf16.msra.mxu0 %v6090_v4  ;;  %2686 = vmatpush1.bf16.msra.mxu1 %v6094_v16 }
 0x35e   : > { %2646 = vmatprep.subr.bf16.mxu0 %v6098_v23  ;;  %2687 = vmatprep.subr.bf16.mxu1 %v6102_v14 }
 0x361   : > { %2647 = vmatpush1.bf16.msra.mxu0 %v6106_v15  ;;  %2688 = vmatpush1.bf16.msra.mxu1 %v6110_v36 }
 0x362   : > { %2648 = vmatprep.subr.bf16.mxu0 %v6114_v51  ;;  %2689 = vmatprep.subr.bf16.mxu1 %v6118_v52 }
 0x365   : > { %2649 = vmatpush1.bf16.msra.mxu0 %v6122_v3  ;;  %2690 = vmatpush1.bf16.msra.mxu1 %v6126_v53 }
 0x366   : > { %2744 = vmatprep.subr.bf16.mxu0 %v6130_v6  ;;  %2785 = vmatprep.subr.bf16.mxu1 %v6134_v2 }
 0x3e8   : > { %v2448_v1 = vpop.f32.mrf.mxu0  ;;  %v2489_v56 = vpop.f32.mrf.mxu1 }
 0x3e9   : > { %v2496_v59 = vadd.f32 %v2448_v1, %v6916_v60  ;;  %v2498_v58 = vadd.f32 %v2489_v56, %v6918_v57 }
 0x3ea   : > { %v2450_v62 = vpop.f32.mrf.mxu0  ;;  %v2491_v54 = vpop.f32.mrf.mxu1 }
 0x3eb   : > { %v2500_v63 = vmul.f32 0.5, %v2496_v59  ;;  %v2497_v8 = vadd.f32 %v2450_v62, %v6917_v42  ;;  %v2499_v19 = vadd.f32 %v2491_v54, %v6919_v18  ;;  %v6920_v62 = vld [vmem:[#allocation97_spill] sm:$0xff] }
 0x3ec   : > { %v2452_v31 = vpop.f32.mrf.mxu0  ;;  %v2493_v9 = vpop.f32.mrf.mxu1 }
 0x3ed   : > { %4450 = vtanh.f32 %v2500_v63  ;;  %v2504_v5 = vmul.f32 0.5, %v2497_v8  ;;  %v2509_v20 = vmul.f32 0.5, %v2499_v19  ;;  %v6921_v9 = vld [vmem:[#allocation99_spill] sm:$0xff] }
 0x3ee   : > { %v2453_v0 = vpop.f32.mrf.mxu0  ;;  %v2494_v61 = vpop.f32.mrf.mxu1 }
 0x3ef   : > { %4452 = vtanh.f32 %v2504_v5 }
 0x3f0   : > { %4454 = vtanh.f32 %v2498_v58 }
 0x3f1   : > { %4456 = vtanh.f32 %v2509_v20 }
 0x3fa   : > { %v4451_v21 = vpop.eup %4450 }
 0x3fb   : > { %v2502_v13 = vmul.f32 0.5, %v4451_v21 }
 0x3fc   : > { %v4453_v24 = vpop.eup %4452 }
 0x3fd   : > { %v2503_v25 = vadd.f32 0.5, %v2502_v13  ;;  %v2506_v26 = vmul.f32 0.5, %v4453_v24  ;;  %v4455_v27 = vpop.eup %4454 }
 0x3fe   : > { %v4457_v63 = vpop.eup %4456 }
 0x3ff   : > { %v2507_v28 = vadd.f32 0.5, %v2506_v26  ;;  %v2514_v29 = vmul.f32 %v4455_v27, %v2503_v25  ;;  %v2511_v0 = vmul.f32 0.5, %v4457_v63  ;;  %v6923_v25 = vld [vmem:[#allocation100_spill] sm:$0xff] }
 0x401   : > { %v2513_v1 = vmul.f32 %v2507_v28, %v5956_v12  ;;  %v6922_v12 = vld [vmem:[#allocation98_spill] sm:$0xff]  ;;  %v2512_v21 = vadd.f32 0.5, %v2511_v0 }
 0x402   : > { %v6150_v28 = vld [vmem:[%s5114_s16 + $0x1e0] ss:$16 sps:$4 sm:$0xff]  }
 0x403   : > { %v6142_v56 = vadd.f32 %v2514_v29, %v2513_v1  ;;  %v6154_v29 = vld [vmem:[%s5114_s16 + $0x1e8] ss:$16 sps:$4 sm:$0xff]  }
 0x405   : > { %4458 = vtanh.f32 %v6142_v56 }
 0x408   : > { %v2558_v60 = vpop.f32.mrf.mxu0  ;;  %v2599_v59 = vpop.f32.mrf.mxu1 }
 0x409   : > { %v2606_v54 = vadd.f32 %v2558_v60, %v6920_v62  ;;  %v2608_v61 = vadd.f32 %v2599_v59, %v6922_v12  ;;  %v6158_v60 = vld [vmem:[%s5114_s16 + $0x1c4] ss:$16 sps:$4 sm:$0xff]   ;;  %v6162_v59 = vld [vmem:[%s5114_s16 + $0x1cc] ss:$16 sps:$4 sm:$0xff]  }
 0x40a   : > { %v2560_v42 = vpop.f32.mrf.mxu0  ;;  %v2601_v8 = vpop.f32.mrf.mxu1 }
 0x40b   : > { %v2610_v31 = vmul.f32 0.5, %v2606_v54  ;;  %v2607_v57 = vadd.f32 %v2560_v42, %v6921_v9  ;;  %v2609_v26 = vadd.f32 %v2601_v8, %v6923_v25  ;;  %v6168_v42 = vld [vmem:[%s5114_s16 + $0x1c0] ss:$16 sps:$4 sm:$0xff]   ;;  %v6172_v8 = vld [vmem:[%s5114_s16 + $0x1c8] ss:$16 sps:$4 sm:$0xff]  }
 0x40c   : > { %v2562_v58 = vpop.f32.mrf.mxu0  ;;  %v2603_v5 = vpop.f32.mrf.mxu1  ;;  %v6207_v25 = vld [vmem:[%s5114_s16 + $0x188] ss:$16 sps:$4 sm:$0xff]  }
 0x40d   : > { %4460 = vtanh.f32 %v2610_v31  ;;  %v2614_v18 = vmul.f32 0.5, %v2607_v57  ;;  %v2619_v1 = vmul.f32 0.5, %v2609_v26  ;;  %v6176_v57 = vld [vmem:[%s5114_s16 + $0x1a4] ss:$16 sps:$4 sm:$0xff]   ;;  %v6180_v58 = vld [vmem:[%s5114_s16 + $0x1ac] ss:$16 sps:$4 sm:$0xff]  }
 0x40e   : > { %v2563_v19 = vpop.f32.mrf.mxu0  ;;  %v2604_v20 = vpop.f32.mrf.mxu1  ;;  %v6216_v26 = vld [vmem:[%s5114_s16 + $0x16c] ss:$16 sps:$4 sm:$0xff]  }
 0x40f   : > { %4462 = vtanh.f32 %v2614_v18  ;;  %v6188_v18 = vld [vmem:[%s5114_s16 + $0x1a8] ss:$16 sps:$4 sm:$0xff]   ;;  %v6193_v20 = vld [vmem:[%s5114_s16 + $0x184] ss:$16 sps:$4 sm:$0xff]  }
 0x410   : > { %4464 = vtanh.f32 %v2608_v61  ;;  %v6184_v61 = vld [vmem:[%s5114_s16 + $0x1a0] ss:$16 sps:$4 sm:$0xff]  }
 0x411   : > { %4466 = vtanh.f32 %v2619_v1  ;;  %v6224_v1 = vld [vmem:[%s5114_s16 + $0x168] ss:$16 sps:$4 sm:$0xff]  }
 0x412   : > { %v4459_v13 = vpop.eup %4458 }
 0x413   : > { %v2517_v24 = vmul.f32 %v4459_v13, %v2512_v21  ;;  %v6197_v21 = vld [vmem:[%s5114_s16 + $0x18c] ss:$16 sps:$4 sm:$0xff]  }
 0x415   : > { %2518 = vst [vmem:[#allocation2 + $0x50] sm:$0xff] %v2517_v24  ;;  %v2633_v27 = vpack.c.bf16 %v2517_v24, %v2517_v24  ;;  %v6203_v24 = vld [vmem:[%s5114_s16 + $0x180] ss:$16 sps:$4 sm:$0xff]  }
 0x417   : > { %2667 = vmatmul.mubr.bf16.vlgmr.msra.gmra.mxu0 %v2633_v27  ;;  %2708 = vmatmul.mubr.bf16.vlgmr.msra.gmra.mxu1 %v2633_v27  ;;  %v6220_v27 = vld [vmem:[%s5114_s16 + $0x160] ss:$16 sps:$4 sm:$0xff]  }
 0x418   : > { %2745 = vmatpush1.bf16.msra.mxu0 %v6150_v28  ;;  %2786 = vmatpush1.bf16.msra.mxu1 %v6154_v29 }
 0x419   : > { %2746 = vmatprep.subr.bf16.mxu0 %v6158_v60  ;;  %2787 = vmatprep.subr.bf16.mxu1 %v6162_v59 }
 0x41a   : > { %v4461_v62 = vpop.eup %4460  ;;  %2776 = vmatprep.mubr.bf16.mxu0 %v6795_v45  ;;  %2817 = vmatprep.mubr.bf16.mxu1 %v6795_v45 }
 0x41b   : > { %v2612_v54 = vmul.f32 0.5, %v4461_v62  ;;  %v6228_v62 = vld [vmem:[%s5114_s16 + $0x144] ss:$16 sps:$4 sm:$0xff]  }
 0x41c   : > { %v4463_v63 = vpop.eup %4462  ;;  %2747 = vmatpush1.bf16.msra.mxu0 %v6168_v42  ;;  %2788 = vmatpush1.bf16.msra.mxu1 %v6172_v8  ;;  %6924 = vst [vmem:[#allocation40_spill] sm:$0xff] %v6228_v62 }
 0x41d   : > { %v2613_v31 = vadd.f32 0.5, %v2612_v54  ;;  %v2616_v9 = vmul.f32 0.5, %v4463_v63  ;;  %2748 = vmatprep.subr.bf16.mxu0 %v6176_v57  ;;  %2789 = vmatprep.subr.bf16.mxu1 %v6180_v58  ;;  %v4465_v5 = vpop.eup %4464  ;;  %v6232_v54 = vld [vmem:[%s5114_s16 + $0x14c] ss:$16 sps:$4 sm:$0xff]  }
 0x41e   : > { %6925 = vst [vmem:[#allocation41_spill] sm:$0xff] %v6232_v54  ;;  %v4467_v63 = vpop.eup %4466 }
 0x41f   : > { %v2617_v0 = vadd.f32 0.5, %v2616_v9  ;;  %v2624_v12 = vmul.f32 %v4465_v5, %v2613_v31  ;;  %v6236_v31 = vld [vmem:[%s5114_s16 + $0x140] ss:$16 sps:$4 sm:$0xff]   ;;  %v6240_v9 = vld [vmem:[%s5114_s16 + $0x148] ss:$16 sps:$4 sm:$0xff]   ;;  %v2621_v5 = vmul.f32 0.5, %v4467_v63 }
 0x420   : > { %2749 = vmatpush1.bf16.msra.mxu0 %v6184_v61  ;;  %2790 = vmatpush1.bf16.msra.mxu1 %v6188_v18  ;;  %6926 = vst [vmem:[#allocation42_spill] sm:$0xff] %v6236_v31  ;;  %6927 = vst [vmem:[#allocation43_spill] sm:$0xff] %v6240_v9  ;;  %v6260_v63 = vld [vmem:[%s5114_s16 + $0x104] ss:$16 sps:$4 sm:$0xff]  }
 0x421   : > { %v2623_v19 = vmul.f32 %v2617_v0, %v5978_v22  ;;  %2750 = vmatprep.subr.bf16.mxu0 %v6193_v20  ;;  %2791 = vmatprep.subr.bf16.mxu1 %v6197_v21  ;;  %v6212_v22 = vld [vmem:[%s5114_s16 + $0x164] ss:$16 sps:$4 sm:$0xff]  }
 0x422   : > { %v6244_v0 = vld [vmem:[%s5114_s16 + $0x124] ss:$16 sps:$4 sm:$0xff]  }
 0x423   : > { %v6200_v13 = vadd.f32 %v2624_v12, %v2623_v19  ;;  %6928 = vst [vmem:[#allocation44_spill] sm:$0xff] %v6244_v0  ;;  %v6248_v12 = vld [vmem:[%s5114_s16 + $0x12c] ss:$16 sps:$4 sm:$0xff]   ;;  %v6252_v19 = vld [vmem:[%s5114_s16 + $0x120] ss:$16 sps:$4 sm:$0xff]  }
 0x424   : > { %2751 = vmatpush1.bf16.msra.mxu0 %v6203_v24  ;;  %2792 = vmatpush1.bf16.msra.mxu1 %v6207_v25  ;;  %6929 = vst [vmem:[#allocation45_spill] sm:$0xff] %v6248_v12  ;;  %6930 = vst [vmem:[#allocation46_spill] sm:$0xff] %v6252_v19 }
 0x425   : > { %4468 = vtanh.f32 %v6200_v13  ;;  %2752 = vmatprep.subr.bf16.mxu0 %v6212_v22  ;;  %2793 = vmatprep.subr.bf16.mxu1 %v6216_v26 }
 0x428   : > { %2753 = vmatpush1.bf16.msra.mxu0 %v6220_v27  ;;  %2794 = vmatpush1.bf16.msra.mxu1 %v6224_v1 }
 0x429   : > { %2754 = vmatprep.subr.bf16.mxu0 %v6228_v62  ;;  %2795 = vmatprep.subr.bf16.mxu1 %v6232_v54  ;;  %v6264_v54 = vld [vmem:[%s5114_s16 + $0x10c] ss:$16 sps:$4 sm:$0xff]  }
 0x42c   : > { %2755 = vmatpush1.bf16.msra.mxu0 %v6236_v31  ;;  %2796 = vmatpush1.bf16.msra.mxu1 %v6240_v9  ;;  %v6256_v31 = vld [vmem:[%s5114_s16 + $0x128] ss:$16 sps:$4 sm:$0xff]   ;;  %v2622_v9 = vadd.f32 0.5, %v2621_v5 }
 0x42d   : > { %2756 = vmatprep.subr.bf16.mxu0 %v6244_v0  ;;  %2797 = vmatprep.subr.bf16.mxu1 %v6248_v12  ;;  %v6268_v12 = vld [vmem:[%s5114_s16 + $0x100] ss:$16 sps:$4 sm:$0xff]  }
 0x430   : > { %2757 = vmatpush1.bf16.msra.mxu0 %v6252_v19  ;;  %2798 = vmatpush1.bf16.msra.mxu1 %v6256_v31  ;;  %v6272_v19 = vld [vmem:[%s5114_s16 + $0x108] ss:$16 sps:$4 sm:$0xff]  }
 0x431   : > { %2758 = vmatprep.subr.bf16.mxu0 %v6260_v63  ;;  %2799 = vmatprep.subr.bf16.mxu1 %v6264_v54 }
 0x432   : > { %v4469_v0 = vpop.eup %4468 }
 0x433   : > { %v2627_v62 = vmul.f32 %v4469_v0, %v2622_v9  ;;  %v6931_v0 = vld [vmem:[#allocation57_spill] sm:$0xff] }
 0x434   : > { %2759 = vmatpush1.bf16.msra.mxu0 %v6268_v12  ;;  %2800 = vmatpush1.bf16.msra.mxu1 %v6272_v19 }
 0x435   : > { %2628 = vst [vmem:[#allocation2 + $0x38] sm:$0xff] %v2627_v62  ;;  %v2743_v5 = vpack.c.bf16 %v2627_v62, %v2627_v62  ;;  %2854 = vmatprep.subr.bf16.mxu0 %v6000_v30  ;;  %2895 = vmatprep.subr.bf16.mxu1 %v6004_v32 }
 0x437   : > { %2777 = vmatmul.mubr.bf16.vlgmr.msra.gmra.mxu0 %v2743_v5  ;;  %2818 = vmatmul.mubr.bf16.vlgmr.msra.gmra.mxu1 %v2743_v5 }
 0x438   : > { %2855 = vmatpush1.bf16.msra.mxu0 %v6008_v33  ;;  %2896 = vmatpush1.bf16.msra.mxu1 %v6012_v17 }
 0x439   : > { %2856 = vmatprep.subr.bf16.mxu0 %v6016_v34  ;;  %2897 = vmatprep.subr.bf16.mxu1 %v6020_v35 }
 0x43a   : > { %2886 = vmatprep.mubr.bf16.mxu0 %v6795_v45  ;;  %2927 = vmatprep.mubr.bf16.mxu1 %v6795_v45 }
 0x43c   : > { %2857 = vmatpush1.bf16.msra.mxu0 %v6026_v37  ;;  %2898 = vmatpush1.bf16.msra.mxu1 %v6030_v38 }
 0x43d   : > { %2858 = vmatprep.subr.bf16.mxu0 %v6034_v39  ;;  %2899 = vmatprep.subr.bf16.mxu1 %v6038_v40 }
 0x440   : > { %2859 = vmatpush1.bf16.msra.mxu0 %v6042_v41  ;;  %2900 = vmatpush1.bf16.msra.mxu1 %v6046_v43 }
 0x441   : > { %2860 = vmatprep.subr.bf16.mxu0 %v6050_v44  ;;  %2901 = vmatprep.subr.bf16.mxu1 %v6054_v46 }
 0x444   : > { %2861 = vmatpush1.bf16.msra.mxu0 %v6058_v47  ;;  %2902 = vmatpush1.bf16.msra.mxu1 %v6062_v48 }
 0x445   : > { %2862 = vmatprep.subr.bf16.mxu0 %v6066_v49  ;;  %2903 = vmatprep.subr.bf16.mxu1 %v6070_v50 }
 0x448   : > { %2863 = vmatpush1.bf16.msra.mxu0 %v6074_v10  ;;  %2904 = vmatpush1.bf16.msra.mxu1 %v6078_v55 }
 0x449   : > { %2864 = vmatprep.subr.bf16.mxu0 %v6082_v11  ;;  %2905 = vmatprep.subr.bf16.mxu1 %v6086_v7 }
 0x44c   : > { %2865 = vmatpush1.bf16.msra.mxu0 %v6090_v4  ;;  %2906 = vmatpush1.bf16.msra.mxu1 %v6094_v16 }
 0x44d   : > { %2866 = vmatprep.subr.bf16.mxu0 %v6098_v23  ;;  %2907 = vmatprep.subr.bf16.mxu1 %v6102_v14 }
 0x450   : > { %2867 = vmatpush1.bf16.msra.mxu0 %v6106_v15  ;;  %2908 = vmatpush1.bf16.msra.mxu1 %v6110_v36  ;;  %v6932_v36 = vld [vmem:[#allocation59_spill] sm:$0xff] }
 0x451   : > { %2868 = vmatprep.subr.bf16.mxu0 %v6114_v51  ;;  %2909 = vmatprep.subr.bf16.mxu1 %v6118_v52  ;;  %v6933_v52 = vld [vmem:[#allocation58_spill] sm:$0xff] }
 0x454   : > { %2869 = vmatpush1.bf16.msra.mxu0 %v6122_v3  ;;  %2910 = vmatpush1.bf16.msra.mxu1 %v6126_v53 }
 0x455   : > { %2964 = vmatprep.subr.bf16.mxu0 %v6130_v6  ;;  %3005 = vmatprep.subr.bf16.mxu1 %v6134_v2  ;;  %v6934_v2 = vld [vmem:[#allocation60_spill] sm:$0xff] }
 0x4d7   : > { %v2668_v62 = vpop.f32.mrf.mxu0  ;;  %v2709_v9 = vpop.f32.mrf.mxu1 }
 0x4d8   : > { %v2716_v5 = vadd.f32 %v2668_v62, %v6931_v0  ;;  %v2718_v3 = vadd.f32 %v2709_v9, %v6933_v52 }
 0x4d9   : > { %v2670_v14 = vpop.f32.mrf.mxu0  ;;  %v2711_v15 = vpop.f32.mrf.mxu1 }
 0x4da   : > { %v2720_v23 = vmul.f32 0.5, %v2716_v5  ;;  %v2717_v16 = vadd.f32 %v2670_v14, %v6932_v36  ;;  %v2719_v6 = vadd.f32 %v2711_v15, %v6934_v2 }
 0x4db   : > { %v2672_v51 = vpop.f32.mrf.mxu0  ;;  %v2713_v4 = vpop.f32.mrf.mxu1 }
 0x4dc   : > { %4470 = vtanh.f32 %v2720_v23  ;;  %v2724_v7 = vmul.f32 0.5, %v2717_v16  ;;  %v2729_v55 = vmul.f32 0.5, %v2719_v6  ;;  %v6935_v16 = vld [vmem:[#allocation93_spill] sm:$0xff]  ;;  %v6936_v6 = vld [vmem:[#allocation95_spill] sm:$0xff] }
 0x4dd   : > { %v2673_v53 = vpop.f32.mrf.mxu0  ;;  %v2714_v11 = vpop.f32.mrf.mxu1 }
 0x4de   : > { %4472 = vtanh.f32 %v2724_v7 }
 0x4df   : > { %4474 = vtanh.f32 %v2718_v3 }
 0x4e0   : > { %4476 = vtanh.f32 %v2729_v55 }
 0x4e9   : > { %v4471_v10 = vpop.eup %4470 }
 0x4ea   : > { %v2722_v62 = vmul.f32 0.5, %v4471_v10 }
 0x4eb   : > { %v4473_v0 = vpop.eup %4472 }
 0x4ec   : > { %v2723_v50 = vadd.f32 0.5, %v2722_v62  ;;  %v2726_v5 = vmul.f32 0.5, %v4473_v0  ;;  %v4475_v14 = vpop.eup %4474 }
 0x4ed   : > { %v4477_v52 = vpop.eup %4476 }
 0x4ee   : > { %v2727_v36 = vadd.f32 0.5, %v2726_v5  ;;  %v2734_v4 = vmul.f32 %v4475_v14, %v2723_v50  ;;  %v2731_v62 = vmul.f32 0.5, %v4477_v52  ;;  %v6937_v50 = vld [vmem:[#allocation94_spill] sm:$0xff] }
 0x4f0   : > { %v2733_v23 = vmul.f32 %v2727_v36, %v6142_v56  ;;  %v2732_v36 = vadd.f32 0.5, %v2731_v62 }
 0x4f2   : > { %v6316_v51 = vadd.f32 %v2734_v4, %v2733_v23 }
 0x4f4   : > { %4478 = vtanh.f32 %v6316_v51 }
 0x4f7   : > { %v2778_v11 = vpop.f32.mrf.mxu0  ;;  %v2819_v7 = vpop.f32.mrf.mxu1 }
 0x4f8   : > { %v2826_v15 = vadd.f32 %v2778_v11, %v6935_v16  ;;  %v2828_v56 = vadd.f32 %v2819_v7, %v6937_v50  ;;  %v6938_v11 = vld [vmem:[#allocation96_spill] sm:$0xff] }
 0x4f9   : > { %v2780_v3 = vpop.f32.mrf.mxu0  ;;  %v2821_v10 = vpop.f32.mrf.mxu1 }
 0x4fa   : > { %v2830_v53 = vmul.f32 0.5, %v2826_v15  ;;  %v2827_v2 = vadd.f32 %v2780_v3, %v6936_v6  ;;  %v2829_v16 = vadd.f32 %v2821_v10, %v6938_v11  ;;  %v6945_v11 = vld [vmem:[#allocation46_spill] sm:$0xff] }
 0x4fb   : > { %v2782_v55 = vpop.f32.mrf.mxu0  ;;  %v2823_v9 = vpop.f32.mrf.mxu1 }
 0x4fc   : > { %4480 = vtanh.f32 %v2830_v53  ;;  %v2834_v0 = vmul.f32 0.5, %v2827_v2  ;;  %v2839_v52 = vmul.f32 0.5, %v2829_v16 }
 0x4fd   : > { %v2783_v5 = vpop.f32.mrf.mxu0  ;;  %v2824_v14 = vpop.f32.mrf.mxu1 }
 0x4fe   : > { %4482 = vtanh.f32 %v2834_v0  ;;  %v6941_v5 = vld [vmem:[#allocation42_spill] sm:$0xff]  ;;  %v6942_v14 = vld [vmem:[#allocation43_spill] sm:$0xff] }
 0x4ff   : > { %4484 = vtanh.f32 %v2828_v56  ;;  %v6940_v56 = vld [vmem:[#allocation41_spill] sm:$0xff] }
 0x500   : > { %4486 = vtanh.f32 %v2839_v52 }
 0x501   : > { %v4479_v4 = vpop.eup %4478 }
 0x502   : > { %v2737_v23 = vmul.f32 %v4479_v4, %v2732_v36  ;;  %v6943_v4 = vld [vmem:[#allocation44_spill] sm:$0xff] }
 0x504   : > { %2738 = vst [vmem:[#allocation2 + $0x8] sm:$0xff] %v2737_v23  ;;  %v2853_v15 = vpack.c.bf16 %v2737_v23, %v2737_v23  ;;  %v6944_v23 = vld [vmem:[#allocation45_spill] sm:$0xff] }
 0x506   : > { %2887 = vmatmul.mubr.bf16.vlgmr.msra.gmra.mxu0 %v2853_v15  ;;  %2928 = vmatmul.mubr.bf16.vlgmr.msra.gmra.mxu1 %v2853_v15 }
 0x507   : > { %2965 = vmatpush1.bf16.msra.mxu0 %v6150_v28  ;;  %3006 = vmatpush1.bf16.msra.mxu1 %v6154_v29 }
 0x508   : > { %2966 = vmatprep.subr.bf16.mxu0 %v6158_v60  ;;  %3007 = vmatprep.subr.bf16.mxu1 %v6162_v59 }
 0x509   : > { %v4481_v7 = vpop.eup %4480  ;;  %2996 = vmatprep.mubr.bf16.mxu0 %v6795_v45  ;;  %3037 = vmatprep.mubr.bf16.mxu1 %v6795_v45 }
 0x50a   : > { %v2832_v3 = vmul.f32 0.5, %v4481_v7 }
 0x50b   : > { %v4483_v53 = vpop.eup %4482  ;;  %2967 = vmatpush1.bf16.msra.mxu0 %v6168_v42  ;;  %3008 = vmatpush1.bf16.msra.mxu1 %v6172_v8 }
 0x50c   : > { %v2833_v10 = vadd.f32 0.5, %v2832_v3  ;;  %v2836_v6 = vmul.f32 0.5, %v4483_v53  ;;  %2968 = vmatprep.subr.bf16.mxu0 %v6176_v57  ;;  %3009 = vmatprep.subr.bf16.mxu1 %v6180_v58  ;;  %v4485_v2 = vpop.eup %4484  ;;  %v6946_v3 = vld [vmem:[#allocation23_spill] sm:$0xff]  ;;  %v6947_v53 = vld [vmem:[#allocation24_spill] sm:$0xff] }
 0x50d   : > { %v4487_v0 = vpop.eup %4486 }
 0x50e   : > { %v2837_v55 = vadd.f32 0.5, %v2836_v6  ;;  %v2844_v9 = vmul.f32 %v4485_v2, %v2833_v10  ;;  %v2841_v36 = vmul.f32 0.5, %v4487_v0  ;;  %v6948_v10 = vld [vmem:[#allocation25_spill] sm:$0xff]  ;;  %v6949_v6 = vld [vmem:[#allocation26_spill] sm:$0xff]  ;;  %v6950_v2 = vld [vmem:[#allocation27_spill] sm:$0xff] }
 0x50f   : > { %2969 = vmatpush1.bf16.msra.mxu0 %v6184_v61  ;;  %3010 = vmatpush1.bf16.msra.mxu1 %v6188_v18  ;;  %v6954_v0 = vld [vmem:[#allocation31_spill] sm:$0xff] }
 0x510   : > { %v2843_v62 = vmul.f32 %v2837_v55, %v6200_v13  ;;  %2970 = vmatprep.subr.bf16.mxu0 %v6193_v20  ;;  %3011 = vmatprep.subr.bf16.mxu1 %v6197_v21  ;;  %v6939_v13 = vld [vmem:[#allocation40_spill] sm:$0xff]  ;;  %v2842_v16 = vadd.f32 0.5, %v2841_v36 }
 0x511   : > { %v6951_v55 = vld [vmem:[#allocation28_spill] sm:$0xff] }
 0x512   : > { %v6338_v50 = vadd.f32 %v2844_v9, %v2843_v62  ;;  %v6952_v9 = vld [vmem:[#allocation29_spill] sm:$0xff]  ;;  %v6953_v62 = vld [vmem:[#allocation30_spill] sm:$0xff]  ;;  %v6955_v36 = vld [vmem:[#allocation32_spill] sm:$0xff] }
 0x513   : > { %2971 = vmatpush1.bf16.msra.mxu0 %v6203_v24  ;;  %3012 = vmatpush1.bf16.msra.mxu1 %v6207_v25 }
 0x514   : > { %4488 = vtanh.f32 %v6338_v50  ;;  %2972 = vmatprep.subr.bf16.mxu0 %v6212_v22  ;;  %3013 = vmatprep.subr.bf16.mxu1 %v6216_v26 }
 0x517   : > { %2973 = vmatpush1.bf16.msra.mxu0 %v6220_v27  ;;  %3014 = vmatpush1.bf16.msra.mxu1 %v6224_v1 }
 0x518   : > { %2974 = vmatprep.subr.bf16.mxu0 %v6939_v13  ;;  %3015 = vmatprep.subr.bf16.mxu1 %v6940_v56 }
 0x51b   : > { %2975 = vmatpush1.bf16.msra.mxu0 %v6941_v5  ;;  %3016 = vmatpush1.bf16.msra.mxu1 %v6942_v14 }
 0x51c   : > { %2976 = vmatprep.subr.bf16.mxu0 %v6943_v4  ;;  %3017 = vmatprep.subr.bf16.mxu1 %v6944_v23 }
 0x51f   : > { %2977 = vmatpush1.bf16.msra.mxu0 %v6945_v11  ;;  %3018 = vmatpush1.bf16.msra.mxu1 %v6256_v31 }
 0x520   : > { %2978 = vmatprep.subr.bf16.mxu0 %v6260_v63  ;;  %3019 = vmatprep.subr.bf16.mxu1 %v6264_v54 }
 0x521   : > { %v4489_v15 = vpop.eup %4488 }
 0x522   : > { %v2847_v52 = vmul.f32 %v4489_v15, %v2842_v16  ;;  %v6956_v16 = vld [vmem:[#allocation33_spill] sm:$0xff]  ;;  %v6957_v15 = vld [vmem:[#allocation34_spill] sm:$0xff] }
 0x523   : > { %2979 = vmatpush1.bf16.msra.mxu0 %v6268_v12  ;;  %3020 = vmatpush1.bf16.msra.mxu1 %v6272_v19 }
 0x524   : > { %2848 = vst [vmem:[#allocation2 + $0x20] sm:$0xff] %v2847_v52  ;;  %v2963_v7 = vpack.c.bf16 %v2847_v52, %v2847_v52  ;;  %3074 = vmatprep.subr.bf16.mxu0 %v6000_v30  ;;  %3115 = vmatprep.subr.bf16.mxu1 %v6004_v32  ;;  %v6958_v52 = vld [vmem:[#allocation35_spill] sm:$0xff] }
 0x526   : > { %2997 = vmatmul.mubr.bf16.vlgmr.msra.gmra.mxu0 %v2963_v7  ;;  %3038 = vmatmul.mubr.bf16.vlgmr.msra.gmra.mxu1 %v2963_v7  ;;  %v6959_v7 = vld [vmem:[#allocation36_spill] sm:$0xff] }
 0x527   : > { %3075 = vmatpush1.bf16.msra.mxu0 %v6008_v33  ;;  %3116 = vmatpush1.bf16.msra.mxu1 %v6012_v17 }
 0x528   : > { %3076 = vmatprep.subr.bf16.mxu0 %v6016_v34  ;;  %3117 = vmatprep.subr.bf16.mxu1 %v6020_v35 }
 0x529   : > { %3106 = vmatprep.mubr.bf16.mxu0 %v6795_v45  ;;  %3147 = vmatprep.mubr.bf16.mxu1 %v6795_v45 }
 0x52b   : > { %3077 = vmatpush1.bf16.msra.mxu0 %v6026_v37  ;;  %3118 = vmatpush1.bf16.msra.mxu1 %v6030_v38 }
 0x52c   : > { %3078 = vmatprep.subr.bf16.mxu0 %v6034_v39  ;;  %3119 = vmatprep.subr.bf16.mxu1 %v6038_v40 }
 0x52f   : > { %3079 = vmatpush1.bf16.msra.mxu0 %v6042_v41  ;;  %3120 = vmatpush1.bf16.msra.mxu1 %v6046_v43 }
 0x530   : > { %3080 = vmatprep.subr.bf16.mxu0 %v6050_v44  ;;  %3121 = vmatprep.subr.bf16.mxu1 %v6054_v46 }
 0x533   : > { %3081 = vmatpush1.bf16.msra.mxu0 %v6058_v47  ;;  %3122 = vmatpush1.bf16.msra.mxu1 %v6062_v48 }
 0x534   : > { %3082 = vmatprep.subr.bf16.mxu0 %v6066_v49  ;;  %3123 = vmatprep.subr.bf16.mxu1 %v6946_v3 }
 0x537   : > { %3083 = vmatpush1.bf16.msra.mxu0 %v6947_v53  ;;  %3124 = vmatpush1.bf16.msra.mxu1 %v6948_v10  ;;  %v6963_v10 = vld [vmem:[#allocation61_spill] sm:$0xff] }
 0x538   : > { %3084 = vmatprep.subr.bf16.mxu0 %v6949_v6  ;;  %3125 = vmatprep.subr.bf16.mxu1 %v6950_v2  ;;  %v6960_v6 = vld [vmem:[#allocation37_spill] sm:$0xff]  ;;  %v6961_v2 = vld [vmem:[#allocation38_spill] sm:$0xff] }
 0x53b   : > { %3085 = vmatpush1.bf16.msra.mxu0 %v6951_v55  ;;  %3126 = vmatpush1.bf16.msra.mxu1 %v6952_v9  ;;  %v6962_v55 = vld [vmem:[#allocation39_spill] sm:$0xff] }
 0x53c   : > { %3086 = vmatprep.subr.bf16.mxu0 %v6953_v62  ;;  %3127 = vmatprep.subr.bf16.mxu1 %v6954_v0 }
 0x53f   : > { %3087 = vmatpush1.bf16.msra.mxu0 %v6955_v36  ;;  %3128 = vmatpush1.bf16.msra.mxu1 %v6956_v16  ;;  %v6964_v16 = vld [vmem:[#allocation63_spill] sm:$0xff] }
 0x540   : > { %3088 = vmatprep.subr.bf16.mxu0 %v6957_v15  ;;  %3129 = vmatprep.subr.bf16.mxu1 %v6958_v52  ;;  %v6965_v52 = vld [vmem:[#allocation62_spill] sm:$0xff] }
 0x543   : > { %3089 = vmatpush1.bf16.msra.mxu0 %v6959_v7  ;;  %3130 = vmatpush1.bf16.msra.mxu1 %v6960_v6 }
 0x544   : > { %3184 = vmatprep.subr.bf16.mxu0 %v6961_v2  ;;  %3225 = vmatprep.subr.bf16.mxu1 %v6962_v55  ;;  %v6966_v55 = vld [vmem:[#allocation64_spill] sm:$0xff] }
 0x5c6   : > { %v2888_v9 = vpop.f32.mrf.mxu0  ;;  %v2929_v62 = vpop.f32.mrf.mxu1 }
 0x5c7   : > { %v2936_v0 = vadd.f32 %v2888_v9, %v6963_v10  ;;  %v2938_v7 = vadd.f32 %v2929_v62, %v6965_v52 }
 0x5c8   : > { %v2890_v53 = vpop.f32.mrf.mxu0  ;;  %v2931_v36 = vpop.f32.mrf.mxu1 }
 0x5c9   : > { %v2940_v3 = vmul.f32 0.5, %v2936_v0  ;;  %v2937_v49 = vadd.f32 %v2890_v53, %v6964_v16  ;;  %v2939_v2 = vadd.f32 %v2931_v36, %v6966_v55 }
 0x5ca   : > { %v2892_v15 = vpop.f32.mrf.mxu0  ;;  %v2933_v48 = vpop.f32.mrf.mxu1 }
 0x5cb   : > { %4490 = vtanh.f32 %v2940_v3  ;;  %v2944_v47 = vmul.f32 0.5, %v2937_v49  ;;  %v2949_v44 = vmul.f32 0.5, %v2939_v2  ;;  %v6967_v49 = vld [vmem:[#allocation89_spill] sm:$0xff]  ;;  %v6968_v15 = vld [vmem:[#allocation91_spill] sm:$0xff] }
 0x5cc   : > { %v2893_v6 = vpop.f32.mrf.mxu0  ;;  %v2934_v46 = vpop.f32.mrf.mxu1 }
 0x5cd   : > { %4492 = vtanh.f32 %v2944_v47 }
 0x5ce   : > { %4494 = vtanh.f32 %v2938_v7 }
 0x5cf   : > { %4496 = vtanh.f32 %v2949_v44 }
 0x5d8   : > { %v4491_v43 = vpop.eup %4490 }
 0x5d9   : > { %v2942_v10 = vmul.f32 0.5, %v4491_v43 }
 0x5da   : > { %v4493_v9 = vpop.eup %4492 }
 0x5db   : > { %v2943_v41 = vadd.f32 0.5, %v2942_v10  ;;  %v2946_v0 = vmul.f32 0.5, %v4493_v9  ;;  %v4495_v53 = vpop.eup %4494 }
 0x5dc   : > { %v4497_v2 = vpop.eup %4496 }
 0x5dd   : > { %v2947_v16 = vadd.f32 0.5, %v2946_v0  ;;  %v2954_v48 = vmul.f32 %v4495_v53, %v2943_v41  ;;  %v2951_v10 = vmul.f32 0.5, %v4497_v2  ;;  %v6969_v41 = vld [vmem:[#allocation90_spill] sm:$0xff] }
 0x5df   : > { %v2953_v3 = vmul.f32 %v2947_v16, %v6316_v51  ;;  %v2952_v16 = vadd.f32 0.5, %v2951_v10 }
 0x5e1   : > { %v6400_v62 = vadd.f32 %v2954_v48, %v2953_v3 }
 0x5e3   : > { %4498 = vtanh.f32 %v6400_v62 }
 0x5e6   : > { %v2998_v46 = vpop.f32.mrf.mxu0  ;;  %v3039_v47 = vpop.f32.mrf.mxu1 }
 0x5e7   : > { %v3046_v6 = vadd.f32 %v2998_v46, %v6967_v49  ;;  %v3048_v51 = vadd.f32 %v3039_v47, %v6969_v41  ;;  %v6970_v46 = vld [vmem:[#allocation92_spill] sm:$0xff] }
 0x5e8   : > { %v3000_v55 = vpop.f32.mrf.mxu0  ;;  %v3041_v43 = vpop.f32.mrf.mxu1 }
 0x5e9   : > { %v3050_v36 = vmul.f32 0.5, %v3046_v6  ;;  %v3047_v52 = vadd.f32 %v3000_v55, %v6968_v15  ;;  %v3049_v49 = vadd.f32 %v3041_v43, %v6970_v46  ;;  %v6983_v46 = vld [vmem:[#allocation28_spill] sm:$0xff] }
 0x5ea   : > { %v3002_v44 = vpop.f32.mrf.mxu0  ;;  %v3043_v7 = vpop.f32.mrf.mxu1 }
 0x5eb   : > { %4500 = vtanh.f32 %v3050_v36  ;;  %v3054_v9 = vmul.f32 0.5, %v3047_v52  ;;  %v3059_v2 = vmul.f32 0.5, %v3049_v49  ;;  %v6984_v49 = vld [vmem:[#allocation29_spill] sm:$0xff] }
 0x5ec   : > { %v3003_v0 = vpop.f32.mrf.mxu0  ;;  %v3044_v53 = vpop.f32.mrf.mxu1 }
 0x5ed   : > { %4502 = vtanh.f32 %v3054_v9 }
 0x5ee   : > { %4504 = vtanh.f32 %v3048_v51 }
 0x5ef   : > { %4506 = vtanh.f32 %v3059_v2  ;;  %v6986_v2 = vld [vmem:[#allocation31_spill] sm:$0xff] }
 0x5f0   : > { %v4499_v48 = vpop.eup %4498 }
 0x5f1   : > { %v2957_v3 = vmul.f32 %v4499_v48, %v2952_v16  ;;  %v6977_v48 = vld [vmem:[#allocation22_spill] sm:$0xff] }
 0x5f3   : > { %2958 = vst [vmem:[#allocation2 + $0x40] sm:$0xff] %v2957_v3  ;;  %v3073_v6 = vpack.c.bf16 %v2957_v3, %v2957_v3  ;;  %v6982_v3 = vld [vmem:[#allocation27_spill] sm:$0xff] }
 0x5f5   : > { %3107 = vmatmul.mubr.bf16.vlgmr.msra.gmra.mxu0 %v3073_v6  ;;  %3148 = vmatmul.mubr.bf16.vlgmr.msra.gmra.mxu1 %v3073_v6  ;;  %v6985_v6 = vld [vmem:[#allocation30_spill] sm:$0xff] }
 0x5f6   : > { %3185 = vmatpush1.bf16.msra.mxu0 %v6150_v28  ;;  %3226 = vmatpush1.bf16.msra.mxu1 %v6154_v29 }
 0x5f7   : > { %3186 = vmatprep.subr.bf16.mxu0 %v6158_v60  ;;  %3227 = vmatprep.subr.bf16.mxu1 %v6162_v59 }
 0x5f8   : > { %v4501_v47 = vpop.eup %4500  ;;  %3216 = vmatprep.mubr.bf16.mxu0 %v6795_v45  ;;  %3257 = vmatprep.mubr.bf16.mxu1 %v6795_v45 }
 0x5f9   : > { %v3052_v55 = vmul.f32 0.5, %v4501_v47  ;;  %v6987_v47 = vld [vmem:[#allocation32_spill] sm:$0xff] }
 0x5fa   : > { %v4503_v36 = vpop.eup %4502  ;;  %3187 = vmatpush1.bf16.msra.mxu0 %v6168_v42  ;;  %3228 = vmatpush1.bf16.msra.mxu1 %v6172_v8 }
 0x5fb   : > { %v3053_v43 = vadd.f32 0.5, %v3052_v55  ;;  %v3056_v15 = vmul.f32 0.5, %v4503_v36  ;;  %3188 = vmatprep.subr.bf16.mxu0 %v6176_v57  ;;  %3229 = vmatprep.subr.bf16.mxu1 %v6180_v58  ;;  %v4505_v52 = vpop.eup %4504  ;;  %v6988_v55 = vld [vmem:[#allocation33_spill] sm:$0xff]  ;;  %v6989_v36 = vld [vmem:[#allocation34_spill] sm:$0xff] }
 0x5fd   : > { %v3057_v44 = vadd.f32 0.5, %v3056_v15  ;;  %v3064_v7 = vmul.f32 %v4505_v52, %v3053_v43  ;;  %v6990_v43 = vld [vmem:[#allocation35_spill] sm:$0xff]  ;;  %v6991_v15 = vld [vmem:[#allocation36_spill] sm:$0xff]  ;;  %v6992_v52 = vld [vmem:[#allocation37_spill] sm:$0xff] }
 0x5fe   : > { %3189 = vmatpush1.bf16.msra.mxu0 %v6184_v61  ;;  %3230 = vmatpush1.bf16.msra.mxu1 %v6188_v18 }
 0x5ff   : > { %v3063_v10 = vmul.f32 %v3057_v44, %v6338_v50  ;;  %3190 = vmatprep.subr.bf16.mxu0 %v6193_v20  ;;  %3231 = vmatprep.subr.bf16.mxu1 %v6197_v21  ;;  %v4507_v50 = vpop.eup %4506  ;;  %v6993_v44 = vld [vmem:[#allocation38_spill] sm:$0xff] }
 0x600   : > { %v3061_v51 = vmul.f32 0.5, %v4507_v50 }
 0x601   : > { %v6422_v41 = vadd.f32 %v3064_v7, %v3063_v10  ;;  %v6994_v7 = vld [vmem:[#allocation39_spill] sm:$0xff] }
 0x602   : > { %3191 = vmatpush1.bf16.msra.mxu0 %v6203_v24  ;;  %3232 = vmatpush1.bf16.msra.mxu1 %v6207_v25  ;;  %v3062_v9 = vadd.f32 0.5, %v3061_v51  ;;  %v6995_v51 = vld [vmem:[#allocation65_spill] sm:$0xff] }
 0x603   : > { %4508 = vtanh.f32 %v6422_v41  ;;  %3192 = vmatprep.subr.bf16.mxu0 %v6212_v22  ;;  %3233 = vmatprep.subr.bf16.mxu1 %v6216_v26 }
 0x606   : > { %3193 = vmatpush1.bf16.msra.mxu0 %v6220_v27  ;;  %3234 = vmatpush1.bf16.msra.mxu1 %v6224_v1 }
 0x607   : > { %3194 = vmatprep.subr.bf16.mxu0 %v6939_v13  ;;  %3235 = vmatprep.subr.bf16.mxu1 %v6940_v56 }
 0x60a   : > { %3195 = vmatpush1.bf16.msra.mxu0 %v6941_v5  ;;  %3236 = vmatpush1.bf16.msra.mxu1 %v6942_v14 }
 0x60b   : > { %3196 = vmatprep.subr.bf16.mxu0 %v6943_v4  ;;  %3237 = vmatprep.subr.bf16.mxu1 %v6944_v23 }
 0x60e   : > { %3197 = vmatpush1.bf16.msra.mxu0 %v6945_v11  ;;  %3238 = vmatpush1.bf16.msra.mxu1 %v6256_v31 }
 0x60f   : > { %3198 = vmatprep.subr.bf16.mxu0 %v6260_v63  ;;  %3239 = vmatprep.subr.bf16.mxu1 %v6264_v54 }
 0x610   : > { %v4509_v0 = vpop.eup %4508 }
 0x611   : > { %v3067_v53 = vmul.f32 %v4509_v0, %v3062_v9 }
 0x612   : > { %3199 = vmatpush1.bf16.msra.mxu0 %v6268_v12  ;;  %3240 = vmatpush1.bf16.msra.mxu1 %v6272_v19 }
 0x613   : > { %3068 = vst [vmem:[#allocation2 + $0x48] sm:$0xff] %v3067_v53  ;;  %v3183_v16 = vpack.c.bf16 %v3067_v53, %v3067_v53  ;;  %3294 = vmatprep.subr.bf16.mxu0 %v6000_v30  ;;  %3335 = vmatprep.subr.bf16.mxu1 %v6004_v32  ;;  %v6971_v30 = vld [vmem:[#allocation48_spill] sm:$0xff]  ;;  %v6972_v32 = vld [vmem:[#allocation17_spill] sm:$0xff] }
 0x615   : > { %3217 = vmatmul.mubr.bf16.vlgmr.msra.gmra.mxu0 %v3183_v16  ;;  %3258 = vmatmul.mubr.bf16.vlgmr.msra.gmra.mxu1 %v3183_v16 }
 0x616   : > { %3295 = vmatpush1.bf16.msra.mxu0 %v6008_v33  ;;  %3336 = vmatpush1.bf16.msra.mxu1 %v6012_v17  ;;  %v6973_v33 = vld [vmem:[#allocation18_spill] sm:$0xff]  ;;  %v6974_v17 = vld [vmem:[#allocation19_spill] sm:$0xff] }
 0x617   : > { %3296 = vmatprep.subr.bf16.mxu0 %v6016_v34  ;;  %3337 = vmatprep.subr.bf16.mxu1 %v6020_v35  ;;  %v6975_v34 = vld [vmem:[#allocation20_spill] sm:$0xff]  ;;  %v6976_v35 = vld [vmem:[#allocation21_spill] sm:$0xff] }
 0x618   : > { %3326 = vmatprep.mubr.bf16.mxu0 %v6795_v45  ;;  %3367 = vmatprep.mubr.bf16.mxu1 %v6795_v45 }
 0x61a   : > { %3297 = vmatpush1.bf16.msra.mxu0 %v6026_v37  ;;  %3338 = vmatpush1.bf16.msra.mxu1 %v6030_v38  ;;  %v6978_v37 = vld [vmem:[#allocation23_spill] sm:$0xff]  ;;  %v6979_v38 = vld [vmem:[#allocation24_spill] sm:$0xff] }
 0x61b   : > { %3298 = vmatprep.subr.bf16.mxu0 %v6034_v39  ;;  %3339 = vmatprep.subr.bf16.mxu1 %v6038_v40  ;;  %v6980_v39 = vld [vmem:[#allocation25_spill] sm:$0xff]  ;;  %v6981_v40 = vld [vmem:[#allocation26_spill] sm:$0xff] }
 0x61e   : > { %3299 = vmatpush1.bf16.msra.mxu0 %v6971_v30  ;;  %3340 = vmatpush1.bf16.msra.mxu1 %v6972_v32  ;;  %v6996_v30 = vld [vmem:[#allocation67_spill] sm:$0xff] }
 0x61f   : > { %3300 = vmatprep.subr.bf16.mxu0 %v6973_v33  ;;  %3341 = vmatprep.subr.bf16.mxu1 %v6974_v17 }
 0x622   : > { %3301 = vmatpush1.bf16.msra.mxu0 %v6975_v34  ;;  %3342 = vmatpush1.bf16.msra.mxu1 %v6976_v35  ;;  %v6997_v34 = vld [vmem:[#allocation66_spill] sm:$0xff] }
 0x623   : > { %3302 = vmatprep.subr.bf16.mxu0 %v6977_v48  ;;  %3343 = vmatprep.subr.bf16.mxu1 %v6978_v37 }
 0x626   : > { %3303 = vmatpush1.bf16.msra.mxu0 %v6979_v38  ;;  %3344 = vmatpush1.bf16.msra.mxu1 %v6980_v39  ;;  %v6998_v39 = vld [vmem:[#allocation68_spill] sm:$0xff] }
 0x627   : > { %3304 = vmatprep.subr.bf16.mxu0 %v6981_v40  ;;  %3345 = vmatprep.subr.bf16.mxu1 %v6982_v3 }
 0x62a   : > { %3305 = vmatpush1.bf16.msra.mxu0 %v6983_v46  ;;  %3346 = vmatpush1.bf16.msra.mxu1 %v6984_v49 }
 0x62b   : > { %3306 = vmatprep.subr.bf16.mxu0 %v6985_v6  ;;  %3347 = vmatprep.subr.bf16.mxu1 %v6986_v2 }
 0x62e   : > { %3307 = vmatpush1.bf16.msra.mxu0 %v6987_v47  ;;  %3348 = vmatpush1.bf16.msra.mxu1 %v6988_v55 }
 0x62f   : > { %3308 = vmatprep.subr.bf16.mxu0 %v6989_v36  ;;  %3349 = vmatprep.subr.bf16.mxu1 %v6990_v43 }
 0x632   : > { %3309 = vmatpush1.bf16.msra.mxu0 %v6991_v15  ;;  %3350 = vmatpush1.bf16.msra.mxu1 %v6992_v52 }
 0x633   : > { %3404 = vmatprep.subr.bf16.mxu0 %v6993_v44  ;;  %3445 = vmatprep.subr.bf16.mxu1 %v6994_v7 }
 0x6b5   : > { %v3108_v10 = vpop.f32.mrf.mxu0  ;;  %v3149_v50 = vpop.f32.mrf.mxu1 }
 0x6b6   : > { %v3156_v9 = vadd.f32 %v3108_v10, %v6995_v51  ;;  %v3158_v35 = vadd.f32 %v3149_v50, %v6997_v34  ;;  %v6999_v10 = vld [vmem:[#allocation85_spill] sm:$0xff]  ;;  %v7001_v34 = vld [vmem:[#allocation86_spill] sm:$0xff] }
 0x6b7   : > { %v3110_v0 = vpop.f32.mrf.mxu0  ;;  %v3151_v53 = vpop.f32.mrf.mxu1 }
 0x6b8   : > { %v3160_v16 = vmul.f32 0.5, %v3156_v9  ;;  %v3157_v32 = vadd.f32 %v3110_v0, %v6996_v30  ;;  %v3159_v40 = vadd.f32 %v3151_v53, %v6998_v39 }
 0x6b9   : > { %v3112_v33 = vpop.f32.mrf.mxu0  ;;  %v3153_v17 = vpop.f32.mrf.mxu1 }
 0x6ba   : > { %4510 = vtanh.f32 %v3160_v16  ;;  %v3164_v48 = vmul.f32 0.5, %v3157_v32  ;;  %v3169_v3 = vmul.f32 0.5, %v3159_v40  ;;  %v7000_v16 = vld [vmem:[#allocation87_spill] sm:$0xff] }
 0x6bb   : > { %v3113_v37 = vpop.f32.mrf.mxu0  ;;  %v3154_v38 = vpop.f32.mrf.mxu1 }
 0x6bc   : > { %4512 = vtanh.f32 %v3164_v48 }
 0x6bd   : > { %4514 = vtanh.f32 %v3158_v35 }
 0x6be   : > { %4516 = vtanh.f32 %v3169_v3  ;;  %v7002_v3 = vld [vmem:[#allocation88_spill] sm:$0xff] }
 0x6c7   : > { %v4511_v46 = vpop.eup %4510 }
 0x6c8   : > { %v3162_v49 = vmul.f32 0.5, %v4511_v46 }
 0x6c9   : > { %v4513_v6 = vpop.eup %4512 }
 0x6ca   : > { %v3163_v2 = vadd.f32 0.5, %v3162_v49  ;;  %v3166_v47 = vmul.f32 0.5, %v4513_v6  ;;  %v4515_v55 = vpop.eup %4514 }
 0x6cb   : > { %v4517_v51 = vpop.eup %4516 }
 0x6cc   : > { %v3167_v36 = vadd.f32 0.5, %v3166_v47  ;;  %v3174_v43 = vmul.f32 %v4515_v55, %v3163_v2  ;;  %v3171_v17 = vmul.f32 0.5, %v4517_v51  ;;  %v4659_v51 = vld [vmem:[%s5114_s16 + $0x2c] ss:$16 sps:$4 sm:$0xff]  }
 0x6ce   : > { %v3173_v15 = vmul.f32 %v3167_v36, %v6400_v62  ;;  %v3172_v38 = vadd.f32 0.5, %v3171_v17  ;;  %v4667_v17 = vld [vmem:[%s5114_s16 + $0x1ec] ss:$16 sps:$4 sm:$0xff]  }
 0x6d0   : > { %v6484_v52 = vadd.f32 %v3174_v43, %v3173_v15  ;;  %v4654_v15 = vld [vmem:[%s5114_s16 + $0x44] ss:$16 sps:$4 sm:$0xff]  }
 0x6d2   : > { %4518 = vtanh.f32 %v6484_v52 }
 0x6d5   : > { %v3218_v44 = vpop.f32.mrf.mxu0  ;;  %v3259_v7 = vpop.f32.mrf.mxu1 }
 0x6d6   : > { %v3266_v50 = vadd.f32 %v3218_v44, %v6999_v10  ;;  %v3268_v62 = vadd.f32 %v3259_v7, %v7001_v34  ;;  %v4655_v44 = vld [vmem:[%s5114_s16 + $0x4c] ss:$16 sps:$4 sm:$0xff]   ;;  %v4656_v7 = vld [vmem:[%s5114_s16 + $0x40] ss:$16 sps:$4 sm:$0xff]   ;;  %v4657_v10 = vld [vmem:[%s5114_s16 + $0x48] ss:$16 sps:$4 sm:$0xff]  }
 0x6d7   : > { %v3220_v9 = vpop.f32.mrf.mxu0  ;;  %v3261_v0 = vpop.f32.mrf.mxu1 }
 0x6d8   : > { %v3270_v53 = vmul.f32 0.5, %v3266_v50  ;;  %v3267_v30 = vadd.f32 %v3220_v9, %v7000_v16  ;;  %v3269_v46 = vadd.f32 %v3261_v0, %v7002_v3  ;;  %v4658_v50 = vld [vmem:[%s5114_s16 + $0x24] ss:$16 sps:$4 sm:$0xff]   ;;  %v4660_v9 = vld [vmem:[%s5114_s16 + $0x20] ss:$16 sps:$4 sm:$0xff]  }
 0x6d9   : > { %v3222_v32 = vpop.f32.mrf.mxu0  ;;  %v3263_v33 = vpop.f32.mrf.mxu1  ;;  %v4661_v0 = vld [vmem:[%s5114_s16 + $0x28] ss:$16 sps:$4 sm:$0xff]   ;;  %v4663_v16 = vld [vmem:[%s5114_s16 + $0xc] ss:$16 sps:$4 sm:$0xff]  }
 0x6da   : > { %4520 = vtanh.f32 %v3270_v53  ;;  %v3274_v35 = vmul.f32 0.5, %v3267_v30  ;;  %v3279_v6 = vmul.f32 0.5, %v3269_v46  ;;  %v4662_v53 = vld [vmem:[%s5114_s16 + $0x4] ss:$16 sps:$4 sm:$0xff]   ;;  %v4664_v30 = vld [vmem:[%s5114_s16] ss:$16 sps:$4 sm:$0xff]  }
 0x6db   : > { %v3223_v48 = vpop.f32.mrf.mxu0  ;;  %v3264_v37 = vpop.f32.mrf.mxu1  ;;  %v4665_v32 = vld [vmem:[%s5114_s16 + $0x8] ss:$16 sps:$4 sm:$0xff]   ;;  %v4666_v33 = vld [vmem:[%s5114_s16 + $0x1e4] ss:$16 sps:$4 sm:$0xff]  }
 0x6dc   : > { %4522 = vtanh.f32 %v3274_v35  ;;  %v7003_v35 = vld [vmem:[#allocation69_spill] sm:$0xff] }
 0x6dd   : > { %4524 = vtanh.f32 %v3268_v62 }
 0x6de   : > { %4526 = vtanh.f32 %v3279_v6  ;;  %v7005_v6 = vld [vmem:[#allocation70_spill] sm:$0xff] }
 0x6df   : > { %v4519_v39 = vpop.eup %4518 }
 0x6e0   : > { %v3177_v40 = vmul.f32 %v4519_v39, %v3172_v38 }
 0x6e2   : > { %3178 = vst [vmem:[#allocation2 + $0x10] sm:$0xff] %v3177_v40  ;;  %v3293_v49 = vpack.c.bf16 %v3177_v40, %v3177_v40  ;;  %v7004_v40 = vld [vmem:[#allocation71_spill] sm:$0xff] }
 0x6e4   : > { %3327 = vmatmul.mubr.bf16.vlgmr.msra.gmra.mxu0 %v3293_v49  ;;  %3368 = vmatmul.mubr.bf16.vlgmr.msra.gmra.mxu1 %v3293_v49 }
 0x6e5   : > { %3405 = vmatpush1.bf16.msra.mxu0 %v6150_v28  ;;  %3446 = vmatpush1.bf16.msra.mxu1 %v6154_v29 }
 0x6e6   : > { %3406 = vmatprep.subr.bf16.mxu0 %v6158_v60  ;;  %3447 = vmatprep.subr.bf16.mxu1 %v6162_v59 }
 0x6e7   : > { %v4521_v2 = vpop.eup %4520  ;;  %3436 = vmatprep.mubr.bf16.mxu0 %v6795_v45  ;;  %3477 = vmatprep.mubr.bf16.mxu1 %v6795_v45 }
 0x6e8   : > { %v3272_v47 = vmul.f32 0.5, %v4521_v2 }
 0x6e9   : > { %v4523_v55 = vpop.eup %4522  ;;  %3407 = vmatpush1.bf16.msra.mxu0 %v6168_v42  ;;  %3448 = vmatpush1.bf16.msra.mxu1 %v6172_v8 }
 0x6ea   : > { %v3273_v36 = vadd.f32 0.5, %v3272_v47  ;;  %v3276_v28 = vmul.f32 0.5, %v4523_v55  ;;  %3408 = vmatprep.subr.bf16.mxu0 %v6176_v57  ;;  %3449 = vmatprep.subr.bf16.mxu1 %v6180_v58  ;;  %v4525_v29 = vpop.eup %4524 }
 0x6eb   : > { %v4527_v8 = vpop.eup %4526 }
 0x6ec   : > { %v3277_v60 = vadd.f32 0.5, %v3276_v28  ;;  %v3284_v59 = vmul.f32 %v4525_v29, %v3273_v36  ;;  %v3281_v57 = vmul.f32 0.5, %v4527_v8  ;;  %v7006_v28 = vld [vmem:[#allocation72_spill] sm:$0xff] }
 0x6ed   : > { %3409 = vmatpush1.bf16.msra.mxu0 %v6184_v61  ;;  %3450 = vmatpush1.bf16.msra.mxu1 %v6188_v18 }
 0x6ee   : > { %v3283_v43 = vmul.f32 %v3277_v60, %v6422_v41  ;;  %3410 = vmatprep.subr.bf16.mxu0 %v6193_v20  ;;  %3451 = vmatprep.subr.bf16.mxu1 %v6197_v21  ;;  %v3282_v58 = vadd.f32 0.5, %v3281_v57  ;;  %v4634_v21 = vld [vmem:[%s5114_s16 + $0xe4] ss:$16 sps:$4 sm:$0xff]   ;;  %v4653_v41 = vld [vmem:[%s5114_s16 + $0x68] ss:$16 sps:$4 sm:$0xff]  }
 0x6f0   : > { %v6506_v42 = vadd.f32 %v3284_v59, %v3283_v43 }
 0x6f1   : > { %3411 = vmatpush1.bf16.msra.mxu0 %v6203_v24  ;;  %3452 = vmatpush1.bf16.msra.mxu1 %v6207_v25  ;;  %v4635_v24 = vld [vmem:[%s5114_s16 + $0xec] ss:$16 sps:$4 sm:$0xff]   ;;  %v4636_v25 = vld [vmem:[%s5114_s16 + $0xe0] ss:$16 sps:$4 sm:$0xff]  }
 0x6f2   : > { %4528 = vtanh.f32 %v6506_v42  ;;  %3412 = vmatprep.subr.bf16.mxu0 %v6212_v22  ;;  %3453 = vmatprep.subr.bf16.mxu1 %v6216_v26  ;;  %v4637_v22 = vld [vmem:[%s5114_s16 + $0xe8] ss:$16 sps:$4 sm:$0xff]   ;;  %v4638_v26 = vld [vmem:[%s5114_s16 + $0xc4] ss:$16 sps:$4 sm:$0xff]  }
 0x6f5   : > { %3413 = vmatpush1.bf16.msra.mxu0 %v6220_v27  ;;  %3454 = vmatpush1.bf16.msra.mxu1 %v6224_v1  ;;  %v4639_v27 = vld [vmem:[%s5114_s16 + $0xcc] ss:$16 sps:$4 sm:$0xff]   ;;  %v4640_v1 = vld [vmem:[%s5114_s16 + $0xc0] ss:$16 sps:$4 sm:$0xff]  }
 0x6f6   : > { %3414 = vmatprep.subr.bf16.mxu0 %v6939_v13  ;;  %3455 = vmatprep.subr.bf16.mxu1 %v6940_v56  ;;  %v4646_v13 = vld [vmem:[%s5114_s16 + $0x84] ss:$16 sps:$4 sm:$0xff]   ;;  %v4647_v56 = vld [vmem:[%s5114_s16 + $0x8c] ss:$16 sps:$4 sm:$0xff]  }
 0x6f9   : > { %3415 = vmatpush1.bf16.msra.mxu0 %v6941_v5  ;;  %3456 = vmatpush1.bf16.msra.mxu1 %v6942_v14  ;;  %v4648_v5 = vld [vmem:[%s5114_s16 + $0x80] ss:$16 sps:$4 sm:$0xff]   ;;  %v4649_v14 = vld [vmem:[%s5114_s16 + $0x88] ss:$16 sps:$4 sm:$0xff]  }
 0x6fa   : > { %3416 = vmatprep.subr.bf16.mxu0 %v6943_v4  ;;  %3457 = vmatprep.subr.bf16.mxu1 %v6944_v23  ;;  %v4650_v4 = vld [vmem:[%s5114_s16 + $0x64] ss:$16 sps:$4 sm:$0xff]   ;;  %v4651_v23 = vld [vmem:[%s5114_s16 + $0x6c] ss:$16 sps:$4 sm:$0xff]  }
 0x6fd   : > { %3417 = vmatpush1.bf16.msra.mxu0 %v6945_v11  ;;  %3458 = vmatpush1.bf16.msra.mxu1 %v6256_v31  ;;  %v4642_v31 = vld [vmem:[%s5114_s16 + $0xa4] ss:$16 sps:$4 sm:$0xff]   ;;  %v4652_v11 = vld [vmem:[%s5114_s16 + $0x60] ss:$16 sps:$4 sm:$0xff]  }
 0x6fe   : > { %3418 = vmatprep.subr.bf16.mxu0 %v6260_v63  ;;  %3459 = vmatprep.subr.bf16.mxu1 %v6264_v54  ;;  %v4641_v54 = vld [vmem:[%s5114_s16 + $0xc8] ss:$16 sps:$4 sm:$0xff]  }
 0x6ff   : > { %v4529_v61 = vpop.eup %4528  ;;  %v4645_v63 = vld [vmem:[%s5114_s16 + $0xa8] ss:$16 sps:$4 sm:$0xff]  }
 0x700   : > { %v3287_v18 = vmul.f32 %v4529_v61, %v3282_v58 }
 0x701   : > { %3419 = vmatpush1.bf16.msra.mxu0 %v6268_v12  ;;  %3460 = vmatpush1.bf16.msra.mxu1 %v6272_v19  ;;  %v4643_v12 = vld [vmem:[%s5114_s16 + $0xac] ss:$16 sps:$4 sm:$0xff]   ;;  %v4644_v19 = vld [vmem:[%s5114_s16 + $0xa0] ss:$16 sps:$4 sm:$0xff]  }
 0x702   : > { %3288 = vst [vmem:[#allocation2 + $0x68] sm:$0xff] %v3287_v18  ;;  %v3403_v20 = vpack.c.bf16 %v3287_v18, %v3287_v18  ;;  %3514 = vmatprep.subr.bf16.mxu0 %v4634_v21  ;;  %3555 = vmatprep.subr.bf16.mxu1 %v4635_v24 }
 0x704   : > { %3437 = vmatmul.mubr.bf16.vlgmr.msra.gmra.mxu0 %v3403_v20  ;;  %3478 = vmatmul.mubr.bf16.vlgmr.msra.gmra.mxu1 %v3403_v20 }
 0x705   : > { %3515 = vmatpush1.bf16.msra.mxu0 %v4636_v25  ;;  %3556 = vmatpush1.bf16.msra.mxu1 %v4637_v22 }
 0x706   : > { %3516 = vmatprep.subr.bf16.mxu0 %v4638_v26  ;;  %3557 = vmatprep.subr.bf16.mxu1 %v4639_v27  ;;  %v7007_v26 = vld [vmem:[#allocation81_spill] sm:$0xff] }
 0x707   : > { %3546 = vmatprep.mubr.bf16.mxu0 %v6795_v45  ;;  %3587 = vmatprep.mubr.bf16.mxu1 %v6795_v45 }
 0x709   : > { %3517 = vmatpush1.bf16.msra.mxu0 %v4640_v1  ;;  %3558 = vmatpush1.bf16.msra.mxu1 %v4641_v54 }
 0x70a   : > { %3518 = vmatprep.subr.bf16.mxu0 %v4642_v31  ;;  %3559 = vmatprep.subr.bf16.mxu1 %v4643_v12 }
 0x70d   : > { %3519 = vmatpush1.bf16.msra.mxu0 %v4644_v19  ;;  %3560 = vmatpush1.bf16.msra.mxu1 %v4645_v63  ;;  %v7008_v19 = vld [vmem:[#allocation83_spill] sm:$0xff] }
 0x70e   : > { %3520 = vmatprep.subr.bf16.mxu0 %v4646_v13  ;;  %3561 = vmatprep.subr.bf16.mxu1 %v4647_v56 }
 0x711   : > { %3521 = vmatpush1.bf16.msra.mxu0 %v4648_v5  ;;  %3562 = vmatpush1.bf16.msra.mxu1 %v4649_v14 }
 0x712   : > { %3522 = vmatprep.subr.bf16.mxu0 %v4650_v4  ;;  %3563 = vmatprep.subr.bf16.mxu1 %v4651_v23 }
 0x715   : > { %3523 = vmatpush1.bf16.msra.mxu0 %v4652_v11  ;;  %3564 = vmatpush1.bf16.msra.mxu1 %v4653_v41 }
 0x716   : > { %3524 = vmatprep.subr.bf16.mxu0 %v4654_v15  ;;  %3565 = vmatprep.subr.bf16.mxu1 %v4655_v44 }
 0x719   : > { %3525 = vmatpush1.bf16.msra.mxu0 %v4656_v7  ;;  %3566 = vmatpush1.bf16.msra.mxu1 %v4657_v10  ;;  %v7010_v7 = vld [vmem:[#allocation84_spill] sm:$0xff] }
 0x71a   : > { %3526 = vmatprep.subr.bf16.mxu0 %v4658_v50  ;;  %3567 = vmatprep.subr.bf16.mxu1 %v4659_v51  ;;  %v4668_v51 = vld [vmem:[%s5114_s16 + $0x1e0] ss:$16 sps:$4 sm:$0xff]  }
 0x71d   : > { %3527 = vmatpush1.bf16.msra.mxu0 %v4660_v9  ;;  %3568 = vmatpush1.bf16.msra.mxu1 %v4661_v0  ;;  %v4669_v9 = vld [vmem:[%s5114_s16 + $0x1e8] ss:$16 sps:$4 sm:$0xff]  }
 0x71e   : > { %3528 = vmatprep.subr.bf16.mxu0 %v4662_v53  ;;  %3569 = vmatprep.subr.bf16.mxu1 %v4663_v16  ;;  %v4670_v53 = vld [vmem:[%s5114_s16 + $0x1c4] ss:$16 sps:$4 sm:$0xff]   ;;  %v4671_v16 = vld [vmem:[%s5114_s16 + $0x1cc] ss:$16 sps:$4 sm:$0xff]  }
 0x721   : > { %3529 = vmatpush1.bf16.msra.mxu0 %v4664_v30  ;;  %3570 = vmatpush1.bf16.msra.mxu1 %v4665_v32 }
 0x722   : > { %3624 = vmatprep.subr.bf16.mxu0 %v4666_v33  ;;  %3665 = vmatprep.subr.bf16.mxu1 %v4667_v17  ;;  %v4672_v17 = vld [vmem:[%s5114_s16 + $0x1c0] ss:$16 sps:$4 sm:$0xff]  }
 0x7a4   : > { %v3328_v34 = vpop.f32.mrf.mxu0  ;;  %v3369_v62 = vpop.f32.mrf.mxu1 }
 0x7a5   : > { %v3376_v48 = vadd.f32 %v3328_v34, %v7003_v35  ;;  %v3378_v2 = vadd.f32 %v3369_v62, %v7005_v6  ;;  %v4673_v34 = vld [vmem:[%s5114_s16 + $0x1c8] ss:$16 sps:$4 sm:$0xff]   ;;  %v4679_v6 = vld [vmem:[%s5114_s16 + $0x18c] ss:$16 sps:$4 sm:$0xff]  }
 0x7a6   : > { %v3330_v37 = vpop.f32.mrf.mxu0  ;;  %v3371_v38 = vpop.f32.mrf.mxu1 }
 0x7a7   : > { %v3380_v39 = vmul.f32 0.5, %v3376_v48  ;;  %v3377_v3 = vadd.f32 %v3330_v37, %v7004_v40  ;;  %v3379_v29 = vadd.f32 %v3371_v38, %v7006_v28  ;;  %v4674_v48 = vld [vmem:[%s5114_s16 + $0x1a4] ss:$16 sps:$4 sm:$0xff]   ;;  %v4675_v37 = vld [vmem:[%s5114_s16 + $0x1ac] ss:$16 sps:$4 sm:$0xff]  }
 0x7a8   : > { %v3332_v46 = vpop.f32.mrf.mxu0  ;;  %v3373_v49 = vpop.f32.mrf.mxu1  ;;  %v4676_v40 = vld [vmem:[%s5114_s16 + $0x1a0] ss:$16 sps:$4 sm:$0xff]  }
 0x7a9   : > { %4530 = vtanh.f32 %v3380_v39  ;;  %v3384_v47 = vmul.f32 0.5, %v3377_v3  ;;  %v3389_v60 = vmul.f32 0.5, %v3379_v29  ;;  %v4677_v3 = vld [vmem:[%s5114_s16 + $0x1a8] ss:$16 sps:$4 sm:$0xff]   ;;  %v4678_v49 = vld [vmem:[%s5114_s16 + $0x184] ss:$16 sps:$4 sm:$0xff]  }
 0x7aa   : > { %v3333_v55 = vpop.f32.mrf.mxu0  ;;  %v3374_v36 = vpop.f32.mrf.mxu1  ;;  %v4684_v28 = vld [vmem:[%s5114_s16 + $0x160] ss:$16 sps:$4 sm:$0xff]   ;;  %v4685_v29 = vld [vmem:[%s5114_s16 + $0x168] ss:$16 sps:$4 sm:$0xff]  }
 0x7ab   : > { %4532 = vtanh.f32 %v3384_v47  ;;  %v4680_v47 = vld [vmem:[%s5114_s16 + $0x180] ss:$16 sps:$4 sm:$0xff]   ;;  %v4681_v55 = vld [vmem:[%s5114_s16 + $0x188] ss:$16 sps:$4 sm:$0xff]   ;;  %v4682_v36 = vld [vmem:[%s5114_s16 + $0x164] ss:$16 sps:$4 sm:$0xff]  }
 0x7ac   : > { %4534 = vtanh.f32 %v3378_v2 }
 0x7ad   : > { %4536 = vtanh.f32 %v3389_v60  ;;  %v4686_v60 = vld [vmem:[%s5114_s16 + $0x144] ss:$16 sps:$4 sm:$0xff]  }
 0x7b6   : > { %v4531_v59 = vpop.eup %4530 }
 0x7b7   : > { %v3382_v43 = vmul.f32 0.5, %v4531_v59  ;;  %v4687_v59 = vld [vmem:[%s5114_s16 + $0x14c] ss:$16 sps:$4 sm:$0xff]  }
 0x7b8   : > { %v4533_v8 = vpop.eup %4532 }
 0x7b9   : > { %v3383_v57 = vadd.f32 0.5, %v3382_v43  ;;  %v3386_v58 = vmul.f32 0.5, %v4533_v8  ;;  %v4535_v61 = vpop.eup %4534  ;;  %v4688_v8 = vld [vmem:[%s5114_s16 + $0x140] ss:$16 sps:$4 sm:$0xff]  }
 0x7ba   : > { %v4537_v1 = vpop.eup %4536 }
 0x7bb   : > { %v3387_v18 = vadd.f32 0.5, %v3386_v58  ;;  %v3394_v20 = vmul.f32 %v4535_v61, %v3383_v57  ;;  %v3391_v5 = vmul.f32 0.5, %v4537_v1  ;;  %v4689_v57 = vld [vmem:[%s5114_s16 + $0x148] ss:$16 sps:$4 sm:$0xff]   ;;  %v4690_v61 = vld [vmem:[%s5114_s16 + $0x124] ss:$16 sps:$4 sm:$0xff]  }
 0x7bd   : > { %v3393_v21 = vmul.f32 %v3387_v18, %v6484_v52  ;;  %v7009_v52 = vld [vmem:[#allocation82_spill] sm:$0xff]  ;;  %v3392_v41 = vadd.f32 0.5, %v3391_v5 }
 0x7be   : > { %v4691_v18 = vld [vmem:[%s5114_s16 + $0x12c] ss:$16 sps:$4 sm:$0xff]  }
 0x7bf   : > { %v6568_v24 = vadd.f32 %v3394_v20, %v3393_v21  ;;  %v4692_v20 = vld [vmem:[%s5114_s16 + $0x120] ss:$16 sps:$4 sm:$0xff]   ;;  %v4693_v21 = vld [vmem:[%s5114_s16 + $0x128] ss:$16 sps:$4 sm:$0xff]  }
 0x7c1   : > { %4538 = vtanh.f32 %v6568_v24 }
 0x7c4   : > { %v3438_v25 = vpop.f32.mrf.mxu0  ;;  %v3479_v22 = vpop.f32.mrf.mxu1 }
 0x7c5   : > { %v3486_v27 = vadd.f32 %v3438_v25, %v7007_v26  ;;  %v3488_v14 = vadd.f32 %v3479_v22, %v7009_v52  ;;  %v4694_v22 = vld [vmem:[%s5114_s16 + $0x104] ss:$16 sps:$4 sm:$0xff]   ;;  %v4695_v26 = vld [vmem:[%s5114_s16 + $0x10c] ss:$16 sps:$4 sm:$0xff]  }
 0x7c6   : > { %v3440_v54 = vpop.f32.mrf.mxu0  ;;  %v3481_v31 = vpop.f32.mrf.mxu1 }
 0x7c7   : > { %v3490_v12 = vmul.f32 0.5, %v3486_v27  ;;  %v3487_v63 = vadd.f32 %v3440_v54, %v7008_v19  ;;  %v3489_v10 = vadd.f32 %v3481_v31, %v7010_v7  ;;  %v4696_v54 = vld [vmem:[%s5114_s16 + $0x100] ss:$16 sps:$4 sm:$0xff]   ;;  %v4697_v31 = vld [vmem:[%s5114_s16 + $0x108] ss:$16 sps:$4 sm:$0xff]  }
 0x7c8   : > { %v3442_v13 = vpop.f32.mrf.mxu0  ;;  %v3483_v56 = vpop.f32.mrf.mxu1 }
 0x7c9   : > { %4540 = vtanh.f32 %v3490_v12  ;;  %v3494_v4 = vmul.f32 0.5, %v3487_v63  ;;  %v3499_v0 = vmul.f32 0.5, %v3489_v10  ;;  %v7011_v13 = vld [vmem:[#allocation73_spill] sm:$0xff] }
 0x7ca   : > { %v3443_v23 = vpop.f32.mrf.mxu0  ;;  %v3484_v11 = vpop.f32.mrf.mxu1 }
 0x7cb   : > { %4542 = vtanh.f32 %v3494_v4  ;;  %v7012_v4 = vld [vmem:[#allocation75_spill] sm:$0xff] }
 0x7cc   : > { %4544 = vtanh.f32 %v3488_v14 }
 0x7cd   : > { %4546 = vtanh.f32 %v3499_v0 }
 0x7ce   : > { %v4539_v15 = vpop.eup %4538 }
 0x7cf   : > { %v3397_v44 = vmul.f32 %v4539_v15, %v3392_v41  ;;  %v7013_v15 = vld [vmem:[#allocation74_spill] sm:$0xff] }
 0x7d1   : > { %3398 = vst [vmem:[#allocation2 + $0x60] sm:$0xff] %v3397_v44  ;;  %v3513_v50 = vpack.c.bf16 %v3397_v44, %v3397_v44 }
 0x7d3   : > { %3547 = vmatmul.mubr.bf16.vlgmr.msra.gmra.mxu0 %v3513_v50  ;;  %3588 = vmatmul.mubr.bf16.vlgmr.msra.gmra.mxu1 %v3513_v50 }
 0x7d4   : > { %3625 = vmatpush1.bf16.msra.mxu0 %v4668_v51  ;;  %3666 = vmatpush1.bf16.msra.mxu1 %v4669_v9  ;;  %v7014_v51 = vld [vmem:[#allocation76_spill] sm:$0xff] }
 0x7d5   : > { %3626 = vmatprep.subr.bf16.mxu0 %v4670_v53  ;;  %3667 = vmatprep.subr.bf16.mxu1 %v4671_v16 }
 0x7d6   : > { %v4541_v30 = vpop.eup %4540  ;;  %3656 = vmatprep.mubr.bf16.mxu0 %v6795_v45  ;;  %3697 = vmatprep.mubr.bf16.mxu1 %v6795_v45 }
 0x7d7   : > { %v3492_v32 = vmul.f32 0.5, %v4541_v30 }
 0x7d8   : > { %v4543_v33 = vpop.eup %4542  ;;  %3627 = vmatpush1.bf16.msra.mxu0 %v4672_v17  ;;  %3668 = vmatpush1.bf16.msra.mxu1 %v4673_v34 }
 0x7d9   : > { %v3493_v62 = vadd.f32 0.5, %v3492_v32  ;;  %v3496_v35 = vmul.f32 0.5, %v4543_v33  ;;  %3628 = vmatprep.subr.bf16.mxu0 %v4674_v48  ;;  %3669 = vmatprep.subr.bf16.mxu1 %v4675_v37  ;;  %v4545_v45 = vpop.eup %4544 }
 0x7da   : > { %v4547_v43 = vpop.eup %4546 }
 0x7db   : > { %v3497_v38 = vadd.f32 0.5, %v3496_v35  ;;  %v3504_v39 = vmul.f32 %v4545_v45, %v3493_v62  ;;  %v3501_v58 = vmul.f32 0.5, %v4547_v43 }
 0x7dc   : > { %3629 = vmatpush1.bf16.msra.mxu0 %v4676_v40  ;;  %3670 = vmatpush1.bf16.msra.mxu1 %v4677_v3 }
 0x7dd   : > { %v3503_v46 = vmul.f32 %v3497_v38, %v6506_v42  ;;  %3630 = vmatprep.subr.bf16.mxu0 %v4678_v49  ;;  %3671 = vmatprep.subr.bf16.mxu1 %v4679_v6  ;;  %v4683_v42 = vld [vmem:[%s5114_s16 + $0x16c] ss:$16 sps:$4 sm:$0xff]   ;;  %v3502_v25 = vadd.f32 0.5, %v3501_v58  ;;  %v7015_v38 = vld [vmem:[#allocation77_spill] sm:$0xff]  ;;  %v7016_v6 = vld [vmem:[#allocation79_spill] sm:$0xff] }
 0x7de   : > { %v7018_v58 = vld [vmem:[#allocation80_spill] sm:$0xff] }
 0x7df   : > { %v6590_v2 = vadd.f32 %v3504_v39, %v3503_v46 }
 0x7e0   : > { %3631 = vmatpush1.bf16.msra.mxu0 %v4680_v47  ;;  %3672 = vmatpush1.bf16.msra.mxu1 %v4681_v55 }
 0x7e1   : > { %4548 = vtanh.f32 %v6590_v2  ;;  %3632 = vmatprep.subr.bf16.mxu0 %v4682_v36  ;;  %3673 = vmatprep.subr.bf16.mxu1 %v4683_v42 }
 0x7e4   : > { %3633 = vmatpush1.bf16.msra.mxu0 %v4684_v28  ;;  %3674 = vmatpush1.bf16.msra.mxu1 %v4685_v29  ;;  %v7017_v28 = vld [vmem:[#allocation78_spill] sm:$0xff] }
 0x7e5   : > { %3634 = vmatprep.subr.bf16.mxu0 %v4686_v60  ;;  %3675 = vmatprep.subr.bf16.mxu1 %v4687_v59 }
 0x7e8   : > { %3635 = vmatpush1.bf16.msra.mxu0 %v4688_v8  ;;  %3676 = vmatpush1.bf16.msra.mxu1 %v4689_v57 }
 0x7e9   : > { %3636 = vmatprep.subr.bf16.mxu0 %v4690_v61  ;;  %3677 = vmatprep.subr.bf16.mxu1 %v4691_v18 }
 0x7ec   : > { %3637 = vmatpush1.bf16.msra.mxu0 %v4692_v20  ;;  %3678 = vmatpush1.bf16.msra.mxu1 %v4693_v21 }
 0x7ed   : > { %3638 = vmatprep.subr.bf16.mxu0 %v4694_v22  ;;  %3679 = vmatprep.subr.bf16.mxu1 %v4695_v26 }
 0x7ee   : > { %v4549_v27 = vpop.eup %4548 }
 0x7ef   : > { %v3507_v1 = vmul.f32 %v4549_v27, %v3502_v25 }
 0x7f0   : > { %3639 = vmatpush1.bf16.msra.mxu0 %v4696_v54  ;;  %3680 = vmatpush1.bf16.msra.mxu1 %v4697_v31 }
 0x7f1   : > { %3508 = vst [vmem:[#allocation2 + $0x18] sm:$0xff] %v3507_v1  ;;  %v3623_v12 = vpack.c.bf16 %v3507_v1, %v3507_v1 }
 0x7f3   : > { %3657 = vmatmul.mubr.bf16.vlgmr.msra.gmra.mxu0 %v3623_v12  ;;  %3698 = vmatmul.mubr.bf16.vlgmr.msra.gmra.mxu1 %v3623_v12 }
 0x893   : > { %v3548_v19 = vpop.f32.mrf.mxu0  ;;  %v3589_v63 = vpop.f32.mrf.mxu1 }
 0x894   : > { %v3596_v56 = vadd.f32 %v3548_v19, %v7011_v13  ;;  %v3598_v44 = vadd.f32 %v3589_v63, %v7013_v15 }
 0x895   : > { %v3550_v5 = vpop.f32.mrf.mxu0  ;;  %v3591_v52 = vpop.f32.mrf.mxu1 }
 0x896   : > { %v3600_v14 = vmul.f32 0.5, %v3596_v56  ;;  %v3597_v23 = vadd.f32 %v3550_v5, %v7012_v4  ;;  %v3599_v9 = vadd.f32 %v3591_v52, %v7014_v51 }
 0x897   : > { %v3552_v11 = vpop.f32.mrf.mxu0  ;;  %v3593_v41 = vpop.f32.mrf.mxu1 }
 0x898   : > { %4550 = vtanh.f32 %v3600_v14  ;;  %v3604_v7 = vmul.f32 0.5, %v3597_v23  ;;  %v3609_v0 = vmul.f32 0.5, %v3599_v9 }
 0x899   : > { %v3553_v10 = vpop.f32.mrf.mxu0  ;;  %v3594_v50 = vpop.f32.mrf.mxu1 }
 0x89a   : > { %4552 = vtanh.f32 %v3604_v7 }
 0x89b   : > { %4554 = vtanh.f32 %v3598_v44 }
 0x89c   : > { %4556 = vtanh.f32 %v3609_v0 }
 0x8a5   : > { %v4551_v53 = vpop.eup %4550 }
 0x8a6   : > { %v3602_v16 = vmul.f32 0.5, %v4551_v53 }
 0x8a7   : > { %v4553_v30 = vpop.eup %4552 }
 0x8a8   : > { %v3603_v32 = vadd.f32 0.5, %v3602_v16  ;;  %v3606_v33 = vmul.f32 0.5, %v4553_v30  ;;  %v4555_v17 = vpop.eup %4554 }
 0x8a9   : > { %v4557_v40 = vpop.eup %4556 }
 0x8aa   : > { %v3607_v34 = vadd.f32 0.5, %v3606_v33  ;;  %v3614_v62 = vmul.f32 %v4555_v17, %v3603_v32  ;;  %v3611_v42 = vmul.f32 0.5, %v4557_v40 }
 0x8ac   : > { %v3613_v35 = vmul.f32 %v3607_v34, %v6568_v24  ;;  %v3612_v43 = vadd.f32 0.5, %v3611_v42 }
 0x8ae   : > { %v3615_v48 = vadd.f32 %v3614_v62, %v3613_v35 }
 0x8b0   : > { %4558 = vtanh.f32 %v3615_v48 }
 0x8b3   : > { %v3658_v37 = vpop.f32.mrf.mxu0  ;;  %v3699_v45 = vpop.f32.mrf.mxu1 }
 0x8b4   : > { %v3706_v39 = vadd.f32 %v3658_v37, %v7015_v38  ;;  %v3708_v29 = vadd.f32 %v3699_v45, %v7017_v28 }
 0x8b5   : > { %v3660_v3 = vpop.f32.mrf.mxu0  ;;  %v3701_v46 = vpop.f32.mrf.mxu1 }
 0x8b6   : > { %v3710_v49 = vmul.f32 0.5, %v3706_v39  ;;  %v3707_v47 = vadd.f32 %v3660_v3, %v7016_v6  ;;  %v3709_v61 = vadd.f32 %v3701_v46, %v7018_v58 }
 0x8b7   : > { %v3662_v55 = vpop.f32.mrf.mxu0  ;;  %v3703_v36 = vpop.f32.mrf.mxu1 }
 0x8b8   : > { %4560 = vtanh.f32 %v3710_v49  ;;  %v3714_v60 = vmul.f32 0.5, %v3707_v47  ;;  %v3719_v18 = vmul.f32 0.5, %v3709_v61 }
 0x8b9   : > { %v3663_v24 = vpop.f32.mrf.mxu0  ;;  %v3704_v59 = vpop.f32.mrf.mxu1 }
 0x8ba   : > { %4562 = vtanh.f32 %v3714_v60 }
 0x8bb   : > { %4564 = vtanh.f32 %v3708_v29 }
 0x8bc   : > { %4566 = vtanh.f32 %v3719_v18 }
 0x8bd   : > { %v4559_v8 = vpop.eup %4558 }
 0x8be   : > { %v3617_v57 = vmul.f32 %v4559_v8, %v3612_v43 }
 0x8c0   : > { %3618 = vst [vmem:[#allocation2 + $0x78] sm:$0xff] %v3617_v57 }
 0x8c5   : > { %v4561_v20 = vpop.eup %4560 }
 0x8c6   : > { %v3712_v21 = vmul.f32 0.5, %v4561_v20 }
 0x8c7   : > { %v4563_v25 = vpop.eup %4562 }
 0x8c8   : > { %v3713_v22 = vadd.f32 0.5, %v3712_v21  ;;  %v3716_v26 = vmul.f32 0.5, %v4563_v25  ;;  %v4565_v27 = vpop.eup %4564 }
 0x8c9   : > { %v4567_v19 = vpop.eup %4566 }
 0x8ca   : > { %v3717_v1 = vadd.f32 0.5, %v3716_v26  ;;  %v3724_v54 = vmul.f32 %v4565_v27, %v3713_v22  ;;  %v3721_v63 = vmul.f32 0.5, %v4567_v19 }
 0x8cc   : > { %v3723_v31 = vmul.f32 %v3717_v1, %v6590_v2  ;;  %v3722_v13 = vadd.f32 0.5, %v3721_v63 }
 0x8ce   : > { %v3725_v12 = vadd.f32 %v3724_v54, %v3723_v31 }
 0x8d0   : > { %4568 = vtanh.f32 %v3725_v12 }
 0x8dc   : > { %3732 = sbr.rel (%p4176_p12) target bundleno = 2502 (0x9c6), region = 72 }
 0x8dd   : > { %v4569_v56 = vpop.eup %4568 }
 0x8de   : > { %v3727_v5 = vmul.f32 %v4569_v56, %v3722_v13 }
 0x8e0   : > { %3728 = vst [vmem:[#allocation2] sm:$0xff] %v3727_v5 }
 0x8e1   : > { %v3751_v52 = vld [vmem:[#allocation9 + $0x78] sm:$0xff]  ;;  %v4890_v14 = vmov 0.0   ;;  %v3750_v4 = vld [vmem:[#allocation9 + $0x70] sm:$0xff]  ;;  %vm4891_vm0 = vmmov 0   ;;  %v3749_v2 = vld [vmem:[#allocation9 + $0x68] sm:$0xff] }
 0x8e2   : > { %4200 = vmatprep.subr.mxu0 %v4890_v14  ;;  %4232 = vmatprep.mubr.msk.f32.mxu0 %vm4891_vm0, %v4890_v14  ;;  %v3748_v23 = vld [vmem:[#allocation9 + $0x60] sm:$0xff]  ;;  %v3747_v11 = vld [vmem:[#allocation9 + $0x58] sm:$0xff]  ;;  %v3746_v41 = vld [vmem:[#allocation9 + $0x50] sm:$0xff] }
 0x8e3   : > { %4201 = vmatpush3.msra.mxu0 %v3751_v52  ;;  %v3745_v15 = vld [vmem:[#allocation9 + $0x48] sm:$0xff]  ;;  %v3744_v44 = vld [vmem:[#allocation9 + $0x40] sm:$0xff]  ;;  %v3743_v7 = vld [vmem:[#allocation9 + $0x38] sm:$0xff] }
 0x8e4   : > { %4202 = vmatprep.subr.mxu0 %v4890_v14  ;;  %v3742_v10 = vld [vmem:[#allocation9 + $0x30] sm:$0xff]  ;;  %v3741_v50 = vld [vmem:[#allocation9 + $0x28] sm:$0xff]  ;;  %v3740_v51 = vld [vmem:[#allocation9 + $0x20] sm:$0xff] }
 0x8e5   : > { %4203 = vmatpush3.msra.mxu0 %v3750_v4  ;;  %v3739_v9 = vld [vmem:[#allocation9 + $0x18] sm:$0xff]  ;;  %v3738_v0 = vld [vmem:[#allocation9 + $0x10] sm:$0xff]  ;;  %v3733_v53 = vld [vmem:[#allocation2 + $0x78] sm:$0xff] }
 0x8e6   : > { %4204 = vmatprep.subr.mxu0 %v4890_v14  ;;  %v3734_v16 = vld [vmem:[#allocation2 + $0x28] sm:$0xff]  ;;  %v3737_v30 = vld [vmem:[#allocation9 + $0x8] sm:$0xff]  ;;  %v3736_v32 = vld [vmem:[#allocation9] sm:$0xff] }
 0x8e7   : > { %4205 = vmatpush3.msra.mxu0 %v3749_v2  ;;  %v3735_v33 = vadd.f32 %v3734_v16, %v3733_v53  ;;  %v4177_v17 = vld [vmem:[#allocation11] ss:$0 sm:$0xff] }
 0x8e8   : > { %4206 = vmatprep.subr.mxu0 %v4890_v14 }
 0x8e9   : > { %4207 = vmatpush3.msra.mxu0 %v3748_v23 }
 0x8ea   : > { %4208 = vmatprep.subr.mxu0 %v4890_v14 }
 0x8eb   : > { %4209 = vmatpush3.msra.mxu0 %v3747_v11 }
 0x8ec   : > { %4210 = vmatprep.subr.mxu0 %v4890_v14 }
 0x8ed   : > { %4211 = vmatpush3.msra.mxu0 %v3746_v41 }
 0x8ee   : > { %4212 = vmatprep.subr.mxu0 %v4890_v14 }
 0x8ef   : > { %4213 = vmatpush3.msra.mxu0 %v3745_v15 }
 0x8f0   : > { %4214 = vmatprep.subr.mxu0 %v4890_v14 }
 0x8f1   : > { %4215 = vmatpush3.msra.mxu0 %v3744_v44 }
 0x8f2   : > { %4216 = vmatprep.subr.mxu0 %v4890_v14 }
 0x8f3   : > { %4217 = vmatpush3.msra.mxu0 %v3743_v7 }
 0x8f4   : > { %4218 = vmatprep.subr.mxu0 %v4890_v14 }
 0x8f5   : > { %4219 = vmatpush3.msra.mxu0 %v3742_v10 }
 0x8f6   : > { %4220 = vmatprep.subr.mxu0 %v4890_v14 }
 0x8f7   : > { %4221 = vmatpush3.msra.mxu0 %v3741_v50 }
 0x8f8   : > { %4222 = vmatprep.subr.mxu0 %v4890_v14 }
 0x8f9   : > { %4223 = vmatpush3.msra.mxu0 %v3740_v51 }
 0x8fa   : > { %4224 = vmatprep.subr.mxu0 %v4890_v14 }
 0x8fb   : > { %4225 = vmatpush3.msra.mxu0 %v3739_v9 }
 0x8fc   : > { %4226 = vmatprep.subr.mxu0 %v4890_v14 }
 0x8fd   : > { %4227 = vmatpush3.msra.mxu0 %v3738_v0 }
 0x8fe   : > { %4228 = vmatprep.subr.mxu0 %v4890_v14 }
 0x8ff   : > { %4229 = vmatpush3.msra.mxu0 %v3737_v30 }
 0x900   : > { %4230 = vmatprep.subr.mxu0 %v4890_v14 }
 0x901   : > { %4231 = vmatpush3.msra.mxu0 %v3736_v32 }
 0x902   : > { %4233 = vmatmul.mubr.f32.vlgmr.msra.gmra.mxu0 %v3735_v33 }
 0x9c2   : > { %v3825_v34 = vpop.f32.mrf.mxu0 }
 0x9c3   : > { %v3826_v62 = vadd.f32 %v4177_v17, %v3825_v34 }
 0x9c4   : > { %v4234_v35 = vpop.f32.mrf.mxu0 }
 0x9c5   : > { %3829 = vst [vmem:[%s6644_s6] sm:$0xff] %v3826_v62 }
 0x9c6 PF: > { %s7019_s16 = sld [smem:[#allocation15_spill]]  ;;  %p20_p1 = scmp.ge.s32.totalorder %s4949_s26, 7  }
 0x9c7   : > { %s7020_s23 = sld [smem:[#allocation16_spill]]  ;;  %s7021_s21 = smov %s4868_s22 }
 0x9c8   : > { %s7023_s24 = smov %s4949_s26  ;;  %22 = sbr.rel (!%p20_p1) target bundleno = 10 (0xa), region = 121 }
 0x9cc   : > { %s7022_s22 = smov %s7019_s16 }
 0x9cd   :  { %3841 = vsyncpa [#allocation5], 1 }
 0x9ce   :  { %3843 = vsyncpa [#allocation5 + $0x1], 1 }
 0x9cf   :  { %3844 = vsyncpa [#allocation7], 1 }
 0x9d0   :  { %3846 = vsyncpa [#allocation7 + $0x1], 1 }
 0x9d1   :  { %3847 = vsyncpa [#allocation10], 1 }

</bundles_post_ra>
